<compile_context>
chip_gen: v5e
topology: v5e:2x2
jax: 0.10.0
libtpu: 0.0.40
codegen_flags: <defaults>
</compile_context>

<pallas_src>
import functools

import jax
import jax.numpy as jnp
from jax.experimental import pallas as pl
from jax.experimental.pallas import tpu as pltpu

LANE = 128


def _round_up(n, m):
    return ((n + m - 1) // m) * m


# ---------------------------------------------------------------------------
# Fused Pallas kernel: all TemporalBlocks + Linear head + log_softmax
# ---------------------------------------------------------------------------
def _tcn_fused_kernel(*refs, has_downsample, ksize, output_size):
    x_ref = refs[0]
    out_ref = refs[-1]
    wrefs = refs[1:-1]

    xb = x_ref[...]                                  # (Bt, L, C0pad) f32
    Bt, L, c0 = xb.shape
    M = Bt * L
    y = xb.reshape(M, c0)                            # layout no-op (L % 8 == 0)

    # Hoisted once per grid step: local (per-sample) time index of every row.
    # Built with compares only (no integer div/rem) -> pure VPU, Bt is small & static.
    row = jax.lax.broadcasted_iota(jnp.int32, (M, 1), 0)
    t_local = row
    for b in range(1, Bt):
        t_local = jnp.where(row >= b * L, row - b * L, t_local)

    def shifted_tap(inp, s):
        # causal shift within each sample: out[b, t] = inp[b, t - s], zeros for t < s.
        if s == 0:
            return inp
        if s >= L:
            return jnp.zeros_like(inp)
        rolled = pltpu.roll(inp, shift=s, axis=0)    # XLU sublane rotate (== jnp.roll)
        # mask kills both the wrap-around rows and cross-sample leakage
        return jnp.where(t_local < s, 0.0, rolled)

    def causal_conv(inp, w_ref, b_ref, dilation):
        # K dilation taps fused on the lane axis -> one bf16 MXU matmul, f32 accumulate.
        taps = [shifted_tap(inp, (ksize - 1 - k) * dilation) for k in range(ksize)]
        cat = taps[0] if len(taps) == 1 else jnp.concatenate(taps, axis=1)
        # TODO(synk): on v5e (128-wide MXU) skip the concat and accumulate K per-tap
        # matmuls instead; the fused K*C contraction only pays on v6e/v7x.
        # TODO(synk): at real L/C, stage `cat` in a reused VMEM scratch (scratch_shapes)
        # to cap the live-temporary high-water mark across the unrolled layer loop.
        out = jnp.dot(cat.astype(jnp.bfloat16), w_ref[...],
                      preferred_element_type=jnp.float32)
        return out + b_ref[...]                      # (1, Cout_pad) f32 bias broadcast

    idx = 0
    for i, has_ds in enumerate(has_downsample):
        d = 2 ** i
        w1, b1, w2, b2 = wrefs[idx], wrefs[idx + 1], wrefs[idx + 2], wrefs[idx + 3]
        idx += 4
        h1 = jnp.maximum(causal_conv(y, w1, b1, d), 0.0)
        # TODO(synk): nn.Dropout is an inference-mode identity here (no RNG mask).
        h2 = causal_conv(h1, w2, b2, d)
        if has_ds:                                   # 1x1 conv on the residual path
            wd, bd = wrefs[idx], wrefs[idx + 1]
            idx += 2
            res = jnp.dot(y.astype(jnp.bfloat16), wd[...],
                          preferred_element_type=jnp.float32) + bd[...]
        else:                                        # Cin == Cout -> res = x, no matmul
            res = y
        y = jnp.maximum(h2 + res, 0.0)

    # Head fused into the same kernel: Linear + log_softmax on the last time step.
    w_lin, b_lin = wrefs[idx], wrefs[idx + 1]
    c_last = y.shape[1]
    y_last = y.reshape(Bt, L, c_last)[:, L - 1, :]   # static one-row slice per sample
    logits = jnp.dot(y_last.astype(jnp.bfloat16), w_lin[...],
                     preferred_element_type=jnp.float32) + b_lin[...]
    cls = jax.lax.broadcasted_iota(jnp.int32, logits.shape, 1)
    logits = jnp.where(cls < output_size, logits, -1e30)   # keep padded classes out of LSE
    m = jnp.max(logits, axis=1, keepdims=True)
    z = logits - m
    lse = jnp.log(jnp.sum(jnp.exp(z), axis=1, keepdims=True))
    out_ref[0] = z - lse                             # lane-dense (Bt, Opad) store


# ---------------------------------------------------------------------------
# Parameter packing: per-layer 128 padding, tap fusion, bf16 weights / f32 biases
# ---------------------------------------------------------------------------
def pack_tcn_params(blocks, head, input_size):
    packed, has_ds = [], []
    cin = input_size
    cin_pad = _round_up(cin, LANE)
    c0pad = cin_pad

    def pad_conv(w, b, ci, ci_pad, co, co_pad):      # w: (K, Cin, Cout), b: (1, Cout)
        K = w.shape[0]
        wp = jnp.zeros((K, ci_pad, co_pad), jnp.float32).at[:, :ci, :co].set(w)
        bp = jnp.zeros((1, co_pad), jnp.float32).at[:, :co].set(b)
        return wp.reshape(K * ci_pad, co_pad).astype(jnp.bfloat16), bp

    for (w1, b1, w2, b2, wd, bd) in blocks:
        cout = w1.shape[2]
        cout_pad = _round_up(cout, LANE)
        w1p, b1p = pad_conv(w1, b1, cin, cin_pad, cout, cout_pad)
        w2p, b2p = pad_conv(w2, b2, cout, cout_pad, cout, cout_pad)
        packed += [w1p, b1p, w2p, b2p]
        if wd is not None:
            wdp = (jnp.zeros((cin_pad, cout_pad), jnp.float32)
                   .at[:cin, :cout].set(wd).astype(jnp.bfloat16))
            bdp = jnp.zeros((1, cout_pad), jnp.float32).at[:, :cout].set(bd)
            packed += [wdp, bdp]
            has_ds.append(True)
        else:
            has_ds.append(False)
        cin, cin_pad = cout, cout_pad

    w_lin, b_lin = head                              # (C_last, O), (1, O)
    out_dim = w_lin.shape[1]
    opad = _round_up(out_dim, LANE)
    wlp = (jnp.zeros((cin_pad, opad), jnp.float32)
           .at[:w_lin.shape[0], :out_dim].set(w_lin).astype(jnp.bfloat16))
    blp = jnp.zeros((1, opad), jnp.float32).at[:, :out_dim].set(b_lin)
    packed += [wlp, blp]
    return packed, tuple(has_ds), c0pad, opad


# ---------------------------------------------------------------------------
# Wrapper: single pallas_call, grid over batch tiles
# ---------------------------------------------------------------------------
def tcn_forward(x, packed_ws, has_ds, kernel_size, c0pad, opad, output_size,
                batch_tile=2):
    """x: (B, L, input_size) f32 — same layout as the PyTorch module's input (pre-permute)."""
    B, L, cin = x.shape
    bt = min(batch_tile, B)
    assert B % bt == 0, "batch must be divisible by batch_tile"
    assert L % 8 == 0, "sequence length must be a multiple of 8 (sublane alignment)"
    x_p = jnp.pad(x.astype(jnp.float32), ((0, 0), (0, 0), (0, c0pad - cin)))

    kern = functools.partial(_tcn_fused_kernel, has_downsample=has_ds,
                             ksize=kernel_size, output_size=output_size)

    # TODO(synk): for real TCN sizes (long L / wide C) add an innermost "arbitrary"
    # L-tiling grid axis with a (K-1)*dilation history halo carried in VMEM scratch so
    # live activations stay bounded on v7x's 64 MiB VMEM.
    def build_and_run(single_buffer_weights):
        wkw = {"pipeline_mode": pl.Buffered(1)} if single_buffer_weights else {}
        in_specs = [pl.BlockSpec((bt, L, c0pad), lambda b: (b, 0, 0))]     # batch tile
        in_specs += [pl.BlockSpec(tuple(w.shape), lambda b: (0, 0), **wkw)  # resident W
                     for w in packed_ws]
        return pl.pallas_call(
            kern,
            out_shape=jax.ShapeDtypeStruct((B // bt, bt, opad), jnp.float32),
            grid=(B // bt,),
            in_specs=in_specs,
            out_specs=pl.BlockSpec((1, bt, opad), lambda b: (b, 0, 0)),
            compiler_params=pltpu.CompilerParams(
                dimension_semantics=("parallel",),
                vmem_limit_bytes=56 * 1024 * 1024,   # leaves headroom under v7x's 64 MiB
            ),
        )(x_p, *packed_ws)

    try:
        out = build_and_run(True)      # single-buffer the constant-index weights
    except Exception:
        # Fallback if pl.Buffered(1) is rejected by this jax version: default buffering.
        out = build_and_run(False)
    return out.reshape(B, opad)[:, :output_size]


# ---------------------------------------------------------------------------
# Deterministic parameter init (weight_norm applied in glue JAX)
# ---------------------------------------------------------------------------
def init_tcn_params(key, input_size, output_size, num_channels, kernel_size):
    def weight_norm_conv(k, cout, cin, ks):
        kv, kg, kb = jax.random.split(k, 3)
        v = 0.01 * jax.random.normal(kv, (cout, cin, ks), jnp.float32)
        g = 0.5 + jax.random.uniform(kg, (cout,), jnp.float32)
        norm = jnp.sqrt(jnp.sum(v * v, axis=(1, 2)) + 1e-12)
        w = (g / norm)[:, None, None] * v              # (cout, cin, K)  torch layout
        b = 0.01 * jax.random.normal(kb, (cout,), jnp.float32)
        return jnp.transpose(w, (2, 1, 0)), b.reshape(1, cout)   # (K, cin, cout)

    blocks = []
    in_c = input_size
    for out_c in num_channels:
        key, k1, k2, k3 = jax.random.split(key, 4)
        w1, b1 = weight_norm_conv(k1, out_c, in_c, kernel_size)
        w2, b2 = weight_norm_conv(k2, out_c, out_c, kernel_size)
        if in_c != out_c:
            kdw, kdb = jax.random.split(k3)
            wd = jnp.transpose(0.01 * jax.random.normal(kdw, (out_c, in_c), jnp.float32))
            bd = (0.01 * jax.random.normal(kdb, (out_c,), jnp.float32)).reshape(1, out_c)
        else:
            wd, bd = None, None                         # "res = x" branch
        blocks.append((w1, b1, w2, b2, wd, bd))
        in_c = out_c

    key, kw, kb = jax.random.split(key, 3)
    w_lin = jnp.transpose(0.1 * jax.random.normal(kw, (output_size, in_c), jnp.float32))
    b_lin = (0.1 * jax.random.normal(kb, (output_size,), jnp.float32)).reshape(1, output_size)
    return blocks, (w_lin, b_lin)


# ---------------------------------------------------------------------------
# Pure-JAX f32 reference (same math, no Pallas) for the correctness check
# ---------------------------------------------------------------------------
def tcn_reference(x, blocks, head, kernel_size):
    def causal_conv(inp, w, b, d):
        L = inp.shape[1]
        K = w.shape[0]
        acc = jnp.zeros((inp.shape[0], L, w.shape[2]), jnp.float32)
        for k in range(K):
            s = (K - 1 - k) * d
            shifted = jnp.pad(inp, ((0, 0), (s, 0), (0, 0)))[:, :L, :]
            acc = acc + jnp.einsum('blc,cd->bld', shifted, w[k])
        return acc + b[0]

    y = x
    for i, (w1, b1, w2, b2, wd, bd) in enumerate(blocks):
        d = 2 ** i
        h1 = jnp.maximum(causal_conv(y, w1, b1, d), 0.0)
        h2 = causal_conv(h1, w2, b2, d)
        res = y if wd is None else jnp.einsum('blc,cd->bld', y, wd) + bd[0]
        y = jnp.maximum(h2 + res, 0.0)
    w_lin, b_lin = head
    logits = y[:, -1, :] @ w_lin + b_lin[0]
    return jax.nn.log_softmax(logits, axis=1)


if __name__ == "__main__":
    input_size, output_size = 4, 10
    num_channels = [8, 16, 16]        # covers both downsample and identity residual paths
    kernel_size = 2
    B, L = 4, 16                       # B=4 with batch_tile=2 -> grid=(2,), 2 cores busy

    key = jax.random.PRNGKey(0)
    kx, kp = jax.random.split(key)
    x = jax.random.normal(kx, (B, L, input_size), jnp.float32)
    blocks, head = init_tcn_params(kp, input_size, output_size,
                                   num_channels, kernel_size)

    packed_ws, has_ds, c0pad, opad = pack_tcn_params(blocks, head, input_size)
    out = tcn_forward(x, packed_ws, has_ds, kernel_size, c0pad, opad, output_size,
                      batch_tile=2)
    out = jax.block_until_ready(out)

    ref = tcn_reference(x, blocks, head, kernel_size)
    assert out.shape == (B, output_size)
    # bf16 matmul operands -> looser tolerance than the f32 reference
    assert jnp.allclose(out, ref, atol=1e-1, rtol=1e-1), (out, ref)
    # log_softmax rows must still normalize exactly
    assert jnp.allclose(jnp.sum(jnp.exp(out), axis=1), 1.0, atol=1e-3)
    print("KERNEL_OK")
</pallas_src>

<mosaic_0001>
module attributes {stable_mosaic.version = 11 : i64} {
  func.func @_tcn_fused_kernel(%arg0: i32, %arg1: memref<2x16x128xf32, #tpu.memory_space<vmem>>, %arg2: memref<256x128xbf16, #tpu.memory_space<vmem>>, %arg3: memref<1x128xf32, #tpu.memory_space<vmem>>, %arg4: memref<256x128xbf16, #tpu.memory_space<vmem>>, %arg5: memref<1x128xf32, #tpu.memory_space<vmem>>, %arg6: memref<128x128xbf16, #tpu.memory_space<vmem>>, %arg7: memref<1x128xf32, #tpu.memory_space<vmem>>, %arg8: memref<256x128xbf16, #tpu.memory_space<vmem>>, %arg9: memref<1x128xf32, #tpu.memory_space<vmem>>, %arg10: memref<256x128xbf16, #tpu.memory_space<vmem>>, %arg11: memref<1x128xf32, #tpu.memory_space<vmem>>, %arg12: memref<128x128xbf16, #tpu.memory_space<vmem>>, %arg13: memref<1x128xf32, #tpu.memory_space<vmem>>, %arg14: memref<256x128xbf16, #tpu.memory_space<vmem>>, %arg15: memref<1x128xf32, #tpu.memory_space<vmem>>, %arg16: memref<256x128xbf16, #tpu.memory_space<vmem>>, %arg17: memref<1x128xf32, #tpu.memory_space<vmem>>, %arg18: memref<128x128xbf16, #tpu.memory_space<vmem>>, %arg19: memref<1x128xf32, #tpu.memory_space<vmem>>, %arg20: memref<1x2x128xf32, #tpu.memory_space<vmem>>) attributes {dimension_semantics = [#tpu.dimension_semantics<parallel>], iteration_bounds = array<i64: 2>, scalar_prefetch = 0 : i64, scratch_operands = 0 : i64, tpu.core_type = #tpu.core_type<tc>, window_params = [{transform_indices = @transform_0, window_bounds = array<i64: 2, 16, 128>}, {pipeline_mode = #tpu.pipeline_mode<synchronous>, transform_indices = @transform_1, window_bounds = array<i64: 256, 128>}, {pipeline_mode = #tpu.pipeline_mode<synchronous>, transform_indices = @transform_2, window_bounds = array<i64: 1, 128>}, {pipeline_mode = #tpu.pipeline_mode<synchronous>, transform_indices = @transform_3, window_bounds = array<i64: 256, 128>}, {pipeline_mode = #tpu.pipeline_mode<synchronous>, transform_indices = @transform_4, window_bounds = array<i64: 1, 128>}, {pipeline_mode = #tpu.pipeline_mode<synchronous>, transform_indices = @transform_5, window_bounds = array<i64: 128, 128>}, {pipeline_mode = #tpu.pipeline_mode<synchronous>, transform_indices = @transform_6, window_bounds = array<i64: 1, 128>}, {pipeline_mode = #tpu.pipeline_mode<synchronous>, transform_indices = @transform_7, window_bounds = array<i64: 256, 128>}, {pipeline_mode = #tpu.pipeline_mode<synchronous>, transform_indices = @transform_8, window_bounds = array<i64: 1, 128>}, {pipeline_mode = #tpu.pipeline_mode<synchronous>, transform_indices = @transform_9, window_bounds = array<i64: 256, 128>}, {pipeline_mode = #tpu.pipeline_mode<synchronous>, transform_indices = @transform_10, window_bounds = array<i64: 1, 128>}, {pipeline_mode = #tpu.pipeline_mode<synchronous>, transform_indices = @transform_11, window_bounds = array<i64: 128, 128>}, {pipeline_mode = #tpu.pipeline_mode<synchronous>, transform_indices = @transform_12, window_bounds = array<i64: 1, 128>}, {pipeline_mode = #tpu.pipeline_mode<synchronous>, transform_indices = @transform_13, window_bounds = array<i64: 256, 128>}, {pipeline_mode = #tpu.pipeline_mode<synchronous>, transform_indices = @transform_14, window_bounds = array<i64: 1, 128>}, {pipeline_mode = #tpu.pipeline_mode<synchronous>, transform_indices = @transform_15, window_bounds = array<i64: 256, 128>}, {pipeline_mode = #tpu.pipeline_mode<synchronous>, transform_indices = @transform_16, window_bounds = array<i64: 1, 128>}, {pipeline_mode = #tpu.pipeline_mode<synchronous>, transform_indices = @transform_17, window_bounds = array<i64: 128, 128>}, {pipeline_mode = #tpu.pipeline_mode<synchronous>, transform_indices = @transform_18, window_bounds = array<i64: 1, 128>}, {transform_indices = @transform_19, window_bounds = array<i64: 1, 2, 128>}]} {
    %c0 = arith.constant 0 : index
    %c0_0 = arith.constant 0 : index
    %c0_1 = arith.constant 0 : index
    %0 = vector.load %arg1[%c0, %c0_0, %c0_1] : memref<2x16x128xf32, #tpu.memory_space<vmem>>, vector<2x16x128xf32>
    %1 = vector.shape_cast %0 : vector<2x16x128xf32> to vector<32x128xf32>
    %2 = tpu.iota {dimensions = array<i32: 0>} : vector<32x1xi32>
    %c16_i32 = arith.constant 16 : i32
    %3 = vector.broadcast %c16_i32 : i32 to vector<32x1xi32>
    %4 = arith.cmpi sge, %2, %3 : vector<32x1xi32>
    %c16_i32_2 = arith.constant 16 : i32
    %5 = vector.broadcast %c16_i32_2 : i32 to vector<32x1xi32>
    %6 = arith.subi %2, %5 : vector<32x1xi32>
    %7 = arith.select %4, %6, %2 : vector<32x1xi1>, vector<32x1xi32>
    %c1_i32 = arith.constant 1 : i32
    %8 = tpu.dynamic_rotate %1 by %c1_i32 dim 0 : vector<32x128xf32>, i32 -> vector<32x128xf32>
    %c1_i32_3 = arith.constant 1 : i32
    %9 = vector.broadcast %c1_i32_3 : i32 to vector<32x1xi32>
    %10 = arith.cmpi slt, %7, %9 : vector<32x1xi32>
    %cst = arith.constant 0.000000e+00 : f32
    %11 = vector.shape_cast %10 : vector<32x1xi1> to vector<32x1xi1>
    %12 = vector.broadcast %11 : vector<32x1xi1> to vector<32x128xi1>
    %13 = vector.broadcast %cst : f32 to vector<32x128xf32>
    %14 = arith.select %12, %13, %8 : vector<32x128xi1>, vector<32x128xf32>
    %15 = tpu.concatenate %14, %1 in 1 : vector<32x128xf32>, vector<32x128xf32> -> vector<32x256xf32>
    %16 = arith.truncf %15 : vector<32x256xf32> to vector<32x256xbf16>
    %c0_4 = arith.constant 0 : index
    %c0_5 = arith.constant 0 : index
    %17 = vector.load %arg2[%c0_4, %c0_5] : memref<256x128xbf16, #tpu.memory_space<vmem>>, vector<256x128xbf16>
    %cst_6 = arith.constant dense<0.000000e+00> : vector<32x128xf32>
    %18 = tpu.matmul %16, %17, %cst_6 {dimension_numbers = #tpu.dot_dimension_numbers<[1], [0], [0], [1], [0, 0, 1, 1], [], []>} : vector<32x256xbf16>, vector<256x128xbf16>, vector<32x128xf32> -> vector<32x128xf32>
    %c0_7 = arith.constant 0 : index
    %c0_8 = arith.constant 0 : index
    %19 = vector.load %arg3[%c0_7, %c0_8] : memref<1x128xf32, #tpu.memory_space<vmem>>, vector<1x128xf32>
    %20 = vector.broadcast %19 : vector<1x128xf32> to vector<32x128xf32>
    %21 = arith.addf %18, %20 : vector<32x128xf32>
    %cst_9 = arith.constant 0.000000e+00 : f32
    %22 = vector.broadcast %cst_9 : f32 to vector<32x128xf32>
    %23 = arith.maximumf %21, %22 : vector<32x128xf32>
    %c1_i32_10 = arith.constant 1 : i32
    %24 = tpu.dynamic_rotate %23 by %c1_i32_10 dim 0 : vector<32x128xf32>, i32 -> vector<32x128xf32>
    %c1_i32_11 = arith.constant 1 : i32
    %25 = vector.broadcast %c1_i32_11 : i32 to vector<32x1xi32>
    %26 = arith.cmpi slt, %7, %25 : vector<32x1xi32>
    %cst_12 = arith.constant 0.000000e+00 : f32
    %27 = vector.shape_cast %26 : vector<32x1xi1> to vector<32x1xi1>
    %28 = vector.broadcast %27 : vector<32x1xi1> to vector<32x128xi1>
    %29 = vector.broadcast %cst_12 : f32 to vector<32x128xf32>
    %30 = arith.select %28, %29, %24 : vector<32x128xi1>, vector<32x128xf32>
    %31 = tpu.concatenate %30, %23 in 1 : vector<32x128xf32>, vector<32x128xf32> -> vector<32x256xf32>
    %32 = arith.truncf %31 : vector<32x256xf32> to vector<32x256xbf16>
    %c0_13 = arith.constant 0 : index
    %c0_14 = arith.constant 0 : index
    %33 = vector.load %arg4[%c0_13, %c0_14] : memref<256x128xbf16, #tpu.memory_space<vmem>>, vector<256x128xbf16>
    %cst_15 = arith.constant dense<0.000000e+00> : vector<32x128xf32>
    %34 = tpu.matmul %32, %33, %cst_15 {dimension_numbers = #tpu.dot_dimension_numbers<[1], [0], [0], [1], [0, 0, 1, 1], [], []>} : vector<32x256xbf16>, vector<256x128xbf16>, vector<32x128xf32> -> vector<32x128xf32>
    %c0_16 = arith.constant 0 : index
    %c0_17 = arith.constant 0 : index
    %35 = vector.load %arg5[%c0_16, %c0_17] : memref<1x128xf32, #tpu.memory_space<vmem>>, vector<1x128xf32>
    %36 = vector.broadcast %35 : vector<1x128xf32> to vector<32x128xf32>
    %37 = arith.addf %34, %36 : vector<32x128xf32>
    %38 = arith.truncf %1 : vector<32x128xf32> to vector<32x128xbf16>
    %c0_18 = arith.constant 0 : index
    %c0_19 = arith.constant 0 : index
    %39 = vector.load %arg6[%c0_18, %c0_19] : memref<128x128xbf16, #tpu.memory_space<vmem>>, vector<128x128xbf16>
    %cst_20 = arith.constant dense<0.000000e+00> : vector<32x128xf32>
    %40 = tpu.matmul %38, %39, %cst_20 {dimension_numbers = #tpu.dot_dimension_numbers<[1], [0], [0], [1], [0, 0, 1, 1], [], []>} : vector<32x128xbf16>, vector<128x128xbf16>, vector<32x128xf32> -> vector<32x128xf32>
    %c0_21 = arith.constant 0 : index
    %c0_22 = arith.constant 0 : index
    %41 = vector.load %arg7[%c0_21, %c0_22] : memref<1x128xf32, #tpu.memory_space<vmem>>, vector<1x128xf32>
    %42 = vector.broadcast %41 : vector<1x128xf32> to vector<32x128xf32>
    %43 = arith.addf %40, %42 : vector<32x128xf32>
    %44 = arith.addf %37, %43 : vector<32x128xf32>
    %cst_23 = arith.constant 0.000000e+00 : f32
    %45 = vector.broadcast %cst_23 : f32 to vector<32x128xf32>
    %46 = arith.maximumf %44, %45 : vector<32x128xf32>
    %c2_i32 = arith.constant 2 : i32
    %47 = tpu.dynamic_rotate %46 by %c2_i32 dim 0 : vector<32x128xf32>, i32 -> vector<32x128xf32>
    %c2_i32_24 = arith.constant 2 : i32
    %48 = vector.broadcast %c2_i32_24 : i32 to vector<32x1xi32>
    %49 = arith.cmpi slt, %7, %48 : vector<32x1xi32>
    %cst_25 = arith.constant 0.000000e+00 : f32
    %50 = vector.shape_cast %49 : vector<32x1xi1> to vector<32x1xi1>
    %51 = vector.broadcast %50 : vector<32x1xi1> to vector<32x128xi1>
    %52 = vector.broadcast %cst_25 : f32 to vector<32x128xf32>
    %53 = arith.select %51, %52, %47 : vector<32x128xi1>, vector<32x128xf32>
    %54 = tpu.concatenate %53, %46 in 1 : vector<32x128xf32>, vector<32x128xf32> -> vector<32x256xf32>
    %55 = arith.truncf %54 : vector<32x256xf32> to vector<32x256xbf16>
    %c0_26 = arith.constant 0 : index
    %c0_27 = arith.constant 0 : index
    %56 = vector.load %arg8[%c0_26, %c0_27] : memref<256x128xbf16, #tpu.memory_space<vmem>>, vector<256x128xbf16>
    %cst_28 = arith.constant dense<0.000000e+00> : vector<32x128xf32>
    %57 = tpu.matmul %55, %56, %cst_28 {dimension_numbers = #tpu.dot_dimension_numbers<[1], [0], [0], [1], [0, 0, 1, 1], [], []>} : vector<32x256xbf16>, vector<256x128xbf16>, vector<32x128xf32> -> vector<32x128xf32>
    %c0_29 = arith.constant 0 : index
    %c0_30 = arith.constant 0 : index
    %58 = vector.load %arg9[%c0_29, %c0_30] : memref<1x128xf32, #tpu.memory_space<vmem>>, vector<1x128xf32>
    %59 = vector.broadcast %58 : vector<1x128xf32> to vector<32x128xf32>
    %60 = arith.addf %57, %59 : vector<32x128xf32>
    %cst_31 = arith.constant 0.000000e+00 : f32
    %61 = vector.broadcast %cst_31 : f32 to vector<32x128xf32>
    %62 = arith.maximumf %60, %61 : vector<32x128xf32>
    %c2_i32_32 = arith.constant 2 : i32
    %63 = tpu.dynamic_rotate %62 by %c2_i32_32 dim 0 : vector<32x128xf32>, i32 -> vector<32x128xf32>
    %c2_i32_33 = arith.constant 2 : i32
    %64 = vector.broadcast %c2_i32_33 : i32 to vector<32x1xi32>
    %65 = arith.cmpi slt, %7, %64 : vector<32x1xi32>
    %cst_34 = arith.constant 0.000000e+00 : f32
    %66 = vector.shape_cast %65 : vector<32x1xi1> to vector<32x1xi1>
    %67 = vector.broadcast %66 : vector<32x1xi1> to vector<32x128xi1>
    %68 = vector.broadcast %cst_34 : f32 to vector<32x128xf32>
    %69 = arith.select %67, %68, %63 : vector<32x128xi1>, vector<32x128xf32>
    %70 = tpu.concatenate %69, %62 in 1 : vector<32x128xf32>, vector<32x128xf32> -> vector<32x256xf32>
    %71 = arith.truncf %70 : vector<32x256xf32> to vector<32x256xbf16>
    %c0_35 = arith.constant 0 : index
    %c0_36 = arith.constant 0 : index
    %72 = vector.load %arg10[%c0_35, %c0_36] : memref<256x128xbf16, #tpu.memory_space<vmem>>, vector<256x128xbf16>
    %cst_37 = arith.constant dense<0.000000e+00> : vector<32x128xf32>
    %73 = tpu.matmul %71, %72, %cst_37 {dimension_numbers = #tpu.dot_dimension_numbers<[1], [0], [0], [1], [0, 0, 1, 1], [], []>} : vector<32x256xbf16>, vector<256x128xbf16>, vector<32x128xf32> -> vector<32x128xf32>
    %c0_38 = arith.constant 0 : index
    %c0_39 = arith.constant 0 : index
    %74 = vector.load %arg11[%c0_38, %c0_39] : memref<1x128xf32, #tpu.memory_space<vmem>>, vector<1x128xf32>
    %75 = vector.broadcast %74 : vector<1x128xf32> to vector<32x128xf32>
    %76 = arith.addf %73, %75 : vector<32x128xf32>
    %77 = arith.truncf %46 : vector<32x128xf32> to vector<32x128xbf16>
    %c0_40 = arith.constant 0 : index
    %c0_41 = arith.constant 0 : index
    %78 = vector.load %arg12[%c0_40, %c0_41] : memref<128x128xbf16, #tpu.memory_space<vmem>>, vector<128x128xbf16>
    %cst_42 = arith.constant dense<0.000000e+00> : vector<32x128xf32>
    %79 = tpu.matmul %77, %78, %cst_42 {dimension_numbers = #tpu.dot_dimension_numbers<[1], [0], [0], [1], [0, 0, 1, 1], [], []>} : vector<32x128xbf16>, vector<128x128xbf16>, vector<32x128xf32> -> vector<32x128xf32>
    %c0_43 = arith.constant 0 : index
    %c0_44 = arith.constant 0 : index
    %80 = vector.load %arg13[%c0_43, %c0_44] : memref<1x128xf32, #tpu.memory_space<vmem>>, vector<1x128xf32>
    %81 = vector.broadcast %80 : vector<1x128xf32> to vector<32x128xf32>
    %82 = arith.addf %79, %81 : vector<32x128xf32>
    %83 = arith.addf %76, %82 : vector<32x128xf32>
    %cst_45 = arith.constant 0.000000e+00 : f32
    %84 = vector.broadcast %cst_45 : f32 to vector<32x128xf32>
    %85 = arith.maximumf %83, %84 : vector<32x128xf32>
    %c4_i32 = arith.constant 4 : i32
    %86 = tpu.dynamic_rotate %85 by %c4_i32 dim 0 : vector<32x128xf32>, i32 -> vector<32x128xf32>
    %c4_i32_46 = arith.constant 4 : i32
    %87 = vector.broadcast %c4_i32_46 : i32 to vector<32x1xi32>
    %88 = arith.cmpi slt, %7, %87 : vector<32x1xi32>
    %cst_47 = arith.constant 0.000000e+00 : f32
    %89 = vector.shape_cast %88 : vector<32x1xi1> to vector<32x1xi1>
    %90 = vector.broadcast %89 : vector<32x1xi1> to vector<32x128xi1>
    %91 = vector.broadcast %cst_47 : f32 to vector<32x128xf32>
    %92 = arith.select %90, %91, %86 : vector<32x128xi1>, vector<32x128xf32>
    %93 = tpu.concatenate %92, %85 in 1 : vector<32x128xf32>, vector<32x128xf32> -> vector<32x256xf32>
    %94 = arith.truncf %93 : vector<32x256xf32> to vector<32x256xbf16>
    %c0_48 = arith.constant 0 : index
    %c0_49 = arith.constant 0 : index
    %95 = vector.load %arg14[%c0_48, %c0_49] : memref<256x128xbf16, #tpu.memory_space<vmem>>, vector<256x128xbf16>
    %cst_50 = arith.constant dense<0.000000e+00> : vector<32x128xf32>
    %96 = tpu.matmul %94, %95, %cst_50 {dimension_numbers = #tpu.dot_dimension_numbers<[1], [0], [0], [1], [0, 0, 1, 1], [], []>} : vector<32x256xbf16>, vector<256x128xbf16>, vector<32x128xf32> -> vector<32x128xf32>
    %c0_51 = arith.constant 0 : index
    %c0_52 = arith.constant 0 : index
    %97 = vector.load %arg15[%c0_51, %c0_52] : memref<1x128xf32, #tpu.memory_space<vmem>>, vector<1x128xf32>
    %98 = vector.broadcast %97 : vector<1x128xf32> to vector<32x128xf32>
    %99 = arith.addf %96, %98 : vector<32x128xf32>
    %cst_53 = arith.constant 0.000000e+00 : f32
    %100 = vector.broadcast %cst_53 : f32 to vector<32x128xf32>
    %101 = arith.maximumf %99, %100 : vector<32x128xf32>
    %c4_i32_54 = arith.constant 4 : i32
    %102 = tpu.dynamic_rotate %101 by %c4_i32_54 dim 0 : vector<32x128xf32>, i32 -> vector<32x128xf32>
    %c4_i32_55 = arith.constant 4 : i32
    %103 = vector.broadcast %c4_i32_55 : i32 to vector<32x1xi32>
    %104 = arith.cmpi slt, %7, %103 : vector<32x1xi32>
    %cst_56 = arith.constant 0.000000e+00 : f32
    %105 = vector.shape_cast %104 : vector<32x1xi1> to vector<32x1xi1>
    %106 = vector.broadcast %105 : vector<32x1xi1> to vector<32x128xi1>
    %107 = vector.broadcast %cst_56 : f32 to vector<32x128xf32>
    %108 = arith.select %106, %107, %102 : vector<32x128xi1>, vector<32x128xf32>
    %109 = tpu.concatenate %108, %101 in 1 : vector<32x128xf32>, vector<32x128xf32> -> vector<32x256xf32>
    %110 = arith.truncf %109 : vector<32x256xf32> to vector<32x256xbf16>
    %c0_57 = arith.constant 0 : index
    %c0_58 = arith.constant 0 : index
    %111 = vector.load %arg16[%c0_57, %c0_58] : memref<256x128xbf16, #tpu.memory_space<vmem>>, vector<256x128xbf16>
    %cst_59 = arith.constant dense<0.000000e+00> : vector<32x128xf32>
    %112 = tpu.matmul %110, %111, %cst_59 {dimension_numbers = #tpu.dot_dimension_numbers<[1], [0], [0], [1], [0, 0, 1, 1], [], []>} : vector<32x256xbf16>, vector<256x128xbf16>, vector<32x128xf32> -> vector<32x128xf32>
    %c0_60 = arith.constant 0 : index
    %c0_61 = arith.constant 0 : index
    %113 = vector.load %arg17[%c0_60, %c0_61] : memref<1x128xf32, #tpu.memory_space<vmem>>, vector<1x128xf32>
    %114 = vector.broadcast %113 : vector<1x128xf32> to vector<32x128xf32>
    %115 = arith.addf %112, %114 : vector<32x128xf32>
    %116 = arith.addf %115, %85 : vector<32x128xf32>
    %cst_62 = arith.constant 0.000000e+00 : f32
    %117 = vector.broadcast %cst_62 : f32 to vector<32x128xf32>
    %118 = arith.maximumf %116, %117 : vector<32x128xf32>
    %119 = vector.shape_cast %118 : vector<32x128xf32> to vector<2x16x128xf32>
    %120 = vector.extract_strided_slice %119 {offsets = [0, 15, 0], sizes = [2, 1, 128], strides = [1, 1, 1]} : vector<2x16x128xf32> to vector<2x1x128xf32>
    %121 = vector.shape_cast %120 : vector<2x1x128xf32> to vector<2x128xf32>
    %122 = arith.truncf %121 : vector<2x128xf32> to vector<2x128xbf16>
    %c0_63 = arith.constant 0 : index
    %c0_64 = arith.constant 0 : index
    %123 = vector.load %arg18[%c0_63, %c0_64] : memref<128x128xbf16, #tpu.memory_space<vmem>>, vector<128x128xbf16>
    %cst_65 = arith.constant dense<0.000000e+00> : vector<2x128xf32>
    %124 = tpu.matmul %122, %123, %cst_65 {dimension_numbers = #tpu.dot_dimension_numbers<[1], [0], [0], [1], [0, 0, 1, 1], [], []>} : vector<2x128xbf16>, vector<128x128xbf16>, vector<2x128xf32> -> vector<2x128xf32>
    %c0_66 = arith.constant 0 : index
    %c0_67 = arith.constant 0 : index
    %125 = vector.load %arg19[%c0_66, %c0_67] : memref<1x128xf32, #tpu.memory_space<vmem>>, vector<1x128xf32>
    %126 = vector.broadcast %125 : vector<1x128xf32> to vector<2x128xf32>
    %127 = arith.addf %124, %126 : vector<2x128xf32>
    %128 = tpu.iota {dimensions = array<i32: 1>} : vector<2x128xi32>
    %c10_i32 = arith.constant 10 : i32
    %129 = vector.broadcast %c10_i32 : i32 to vector<2x128xi32>
    %130 = arith.cmpi slt, %128, %129 : vector<2x128xi32>
    %cst_68 = arith.constant -1.000000e+30 : f32
    %131 = vector.broadcast %cst_68 : f32 to vector<2x128xf32>
    %132 = arith.select %130, %127, %131 : vector<2x128xi1>, vector<2x128xf32>
    %cst_69 = arith.constant dense<0xFF800000> : vector<2xf32>
    %133 = vector.multi_reduction <maximumf>, %132, %cst_69 [1] : vector<2x128xf32> to vector<2xf32>
    %134 = vector.shape_cast %133 : vector<2xf32> to vector<2x1xf32>
    %135 = vector.broadcast %134 : vector<2x1xf32> to vector<2x128xf32>
    %136 = arith.subf %132, %135 : vector<2x128xf32>
    %137 = math.exp %136 : vector<2x128xf32>
    %cst_70 = arith.constant dense<0.000000e+00> : vector<2xf32>
    %138 = vector.multi_reduction <add>, %137, %cst_70 [1] : vector<2x128xf32> to vector<2xf32>
    %139 = vector.shape_cast %138 : vector<2xf32> to vector<2x1xf32>
    %140 = math.log %139 : vector<2x1xf32>
    %141 = vector.broadcast %140 : vector<2x1xf32> to vector<2x128xf32>
    %142 = arith.subf %136, %141 : vector<2x128xf32>
    %c0_71 = arith.constant 0 : index
    %c0_72 = arith.constant 0 : index
    %c0_73 = arith.constant 0 : index
    %143 = vector.load %arg20[%c0_71, %c0_72, %c0_73] : memref<1x2x128xf32, #tpu.memory_space<vmem>>, vector<1x2x128xf32>
    %144 = vector.shape_cast %143 : vector<1x2x128xf32> to vector<2x128xf32>
    %145 = vector.shape_cast %142 : vector<2x128xf32> to vector<1x2x128xf32>
    tpu.vector_store %arg20[%c0_71, %c0_72, %c0_73], %145 {strides = array<i32>} : memref<1x2x128xf32, #tpu.memory_space<vmem>>, vector<1x2x128xf32>,
    return
  }
  func.func @transform_0(%arg0: i32) -> (i32, i32, i32) {
    %c0_i32 = arith.constant 0 : i32
    %c0_i32_0 = arith.constant 0 : i32
    %c0_i32_1 = arith.constant 0 : i32
    return %arg0, %c0_i32, %c0_i32_0 : i32, i32, i32
  }
  func.func @transform_1(%arg0: i32) -> (i32, i32) {
    %c0_i32 = arith.constant 0 : i32
    %c0_i32_0 = arith.constant 0 : i32
    %c0_i32_1 = arith.constant 0 : i32
    return %c0_i32, %c0_i32_0 : i32, i32
  }
  func.func @transform_2(%arg0: i32) -> (i32, i32) {
    %c0_i32 = arith.constant 0 : i32
    %c0_i32_0 = arith.constant 0 : i32
    %c0_i32_1 = arith.constant 0 : i32
    return %c0_i32, %c0_i32_0 : i32, i32
  }
  func.func @transform_3(%arg0: i32) -> (i32, i32) {
    %c0_i32 = arith.constant 0 : i32
    %c0_i32_0 = arith.constant 0 : i32
    %c0_i32_1 = arith.constant 0 : i32
    return %c0_i32, %c0_i32_0 : i32, i32
  }
  func.func @transform_4(%arg0: i32) -> (i32, i32) {
    %c0_i32 = arith.constant 0 : i32
    %c0_i32_0 = arith.constant 0 : i32
    %c0_i32_1 = arith.constant 0 : i32
    return %c0_i32, %c0_i32_0 : i32, i32
  }
  func.func @transform_5(%arg0: i32) -> (i32, i32) {
    %c0_i32 = arith.constant 0 : i32
    %c0_i32_0 = arith.constant 0 : i32
    %c0_i32_1 = arith.constant 0 : i32
    return %c0_i32, %c0_i32_0 : i32, i32
  }
  func.func @transform_6(%arg0: i32) -> (i32, i32) {
    %c0_i32 = arith.constant 0 : i32
    %c0_i32_0 = arith.constant 0 : i32
    %c0_i32_1 = arith.constant 0 : i32
    return %c0_i32, %c0_i32_0 : i32, i32
  }
  func.func @transform_7(%arg0: i32) -> (i32, i32) {
    %c0_i32 = arith.constant 0 : i32
    %c0_i32_0 = arith.constant 0 : i32
    %c0_i32_1 = arith.constant 0 : i32
    return %c0_i32, %c0_i32_0 : i32, i32
  }
  func.func @transform_8(%arg0: i32) -> (i32, i32) {
    %c0_i32 = arith.constant 0 : i32
    %c0_i32_0 = arith.constant 0 : i32
    %c0_i32_1 = arith.constant 0 : i32
    return %c0_i32, %c0_i32_0 : i32, i32
  }
  func.func @transform_9(%arg0: i32) -> (i32, i32) {
    %c0_i32 = arith.constant 0 : i32
    %c0_i32_0 = arith.constant 0 : i32
    %c0_i32_1 = arith.constant 0 : i32
    return %c0_i32, %c0_i32_0 : i32, i32
  }
  func.func @transform_10(%arg0: i32) -> (i32, i32) {
    %c0_i32 = arith.constant 0 : i32
    %c0_i32_0 = arith.constant 0 : i32
    %c0_i32_1 = arith.constant 0 : i32
    return %c0_i32, %c0_i32_0 : i32, i32
  }
  func.func @transform_11(%arg0: i32) -> (i32, i32) {
    %c0_i32 = arith.constant 0 : i32
    %c0_i32_0 = arith.constant 0 : i32
    %c0_i32_1 = arith.constant 0 : i32
    return %c0_i32, %c0_i32_0 : i32, i32
  }
  func.func @transform_12(%arg0: i32) -> (i32, i32) {
    %c0_i32 = arith.constant 0 : i32
    %c0_i32_0 = arith.constant 0 : i32
    %c0_i32_1 = arith.constant 0 : i32
    return %c0_i32, %c0_i32_0 : i32, i32
  }
  func.func @transform_13(%arg0: i32) -> (i32, i32) {
    %c0_i32 = arith.constant 0 : i32
    %c0_i32_0 = arith.constant 0 : i32
    %c0_i32_1 = arith.constant 0 : i32
    return %c0_i32, %c0_i32_0 : i32, i32
  }
  func.func @transform_14(%arg0: i32) -> (i32, i32) {
    %c0_i32 = arith.constant 0 : i32
    %c0_i32_0 = arith.constant 0 : i32
    %c0_i32_1 = arith.constant 0 : i32
    return %c0_i32, %c0_i32_0 : i32, i32
  }
  func.func @transform_15(%arg0: i32) -> (i32, i32) {
    %c0_i32 = arith.constant 0 : i32
    %c0_i32_0 = arith.constant 0 : i32
    %c0_i32_1 = arith.constant 0 : i32
    return %c0_i32, %c0_i32_0 : i32, i32
  }
  func.func @transform_16(%arg0: i32) -> (i32, i32) {
    %c0_i32 = arith.constant 0 : i32
    %c0_i32_0 = arith.constant 0 : i32
    %c0_i32_1 = arith.constant 0 : i32
    return %c0_i32, %c0_i32_0 : i32, i32
  }
  func.func @transform_17(%arg0: i32) -> (i32, i32) {
    %c0_i32 = arith.constant 0 : i32
    %c0_i32_0 = arith.constant 0 : i32
    %c0_i32_1 = arith.constant 0 : i32
    return %c0_i32, %c0_i32_0 : i32, i32
  }
  func.func @transform_18(%arg0: i32) -> (i32, i32) {
    %c0_i32 = arith.constant 0 : i32
    %c0_i32_0 = arith.constant 0 : i32
    %c0_i32_1 = arith.constant 0 : i32
    return %c0_i32, %c0_i32_0 : i32, i32
  }
  func.func @transform_19(%arg0: i32) -> (i32, i32, i32) {
    %c0_i32 = arith.constant 0 : i32
    %c0_i32_0 = arith.constant 0 : i32
    %c0_i32_1 = arith.constant 0 : i32
    return %arg0, %c0_i32, %c0_i32_0 : i32, i32, i32
  }
}

module attributes {stable_mosaic.version = 11 : i64} {
  func.func @_tcn_fused_kernel(%arg0: i32, %arg1: memref<2x16x128xf32, #tpu.memory_space<vmem>>, %arg2: memref<256x128xbf16, #tpu.memory_space<vmem>>, %arg3: memref<1x128xf32, #tpu.memory_space<vmem>>, %arg4: memref<256x128xbf16, #tpu.memory_space<vmem>>, %arg5: memref<1x128xf32, #tpu.memory_space<vmem>>, %arg6: memref<128x128xbf16, #tpu.memory_space<vmem>>, %arg7: memref<1x128xf32, #tpu.memory_space<vmem>>, %arg8: memref<256x128xbf16, #tpu.memory_space<vmem>>, %arg9: memref<1x128xf32, #tpu.memory_space<vmem>>, %arg10: memref<256x128xbf16, #tpu.memory_space<vmem>>, %arg11: memref<1x128xf32, #tpu.memory_space<vmem>>, %arg12: memref<128x128xbf16, #tpu.memory_space<vmem>>, %arg13: memref<1x128xf32, #tpu.memory_space<vmem>>, %arg14: memref<256x128xbf16, #tpu.memory_space<vmem>>, %arg15: memref<1x128xf32, #tpu.memory_space<vmem>>, %arg16: memref<256x128xbf16, #tpu.memory_space<vmem>>, %arg17: memref<1x128xf32, #tpu.memory_space<vmem>>, %arg18: memref<128x128xbf16, #tpu.memory_space<vmem>>, %arg19: memref<1x128xf32, #tpu.memory_space<vmem>>, %arg20: memref<1x2x128xf32, #tpu.memory_space<vmem>>) attributes {dimension_semantics = [#tpu.dimension_semantics<parallel>], iteration_bounds = array<i64: 2>, scalar_prefetch = 0 : i64, scratch_operands = 0 : i64, tpu.core_type = #tpu.core_type<tc>, window_params = [{transform_indices = @transform_0, window_bounds = array<i64: 2, 16, 128>}, {pipeline_mode = #tpu.pipeline_mode<synchronous>, transform_indices = @transform_1, window_bounds = array<i64: 256, 128>}, {pipeline_mode = #tpu.pipeline_mode<synchronous>, transform_indices = @transform_2, window_bounds = array<i64: 1, 128>}, {pipeline_mode = #tpu.pipeline_mode<synchronous>, transform_indices = @transform_3, window_bounds = array<i64: 256, 128>}, {pipeline_mode = #tpu.pipeline_mode<synchronous>, transform_indices = @transform_4, window_bounds = array<i64: 1, 128>}, {pipeline_mode = #tpu.pipeline_mode<synchronous>, transform_indices = @transform_5, window_bounds = array<i64: 128, 128>}, {pipeline_mode = #tpu.pipeline_mode<synchronous>, transform_indices = @transform_6, window_bounds = array<i64: 1, 128>}, {pipeline_mode = #tpu.pipeline_mode<synchronous>, transform_indices = @transform_7, window_bounds = array<i64: 256, 128>}, {pipeline_mode = #tpu.pipeline_mode<synchronous>, transform_indices = @transform_8, window_bounds = array<i64: 1, 128>}, {pipeline_mode = #tpu.pipeline_mode<synchronous>, transform_indices = @transform_9, window_bounds = array<i64: 256, 128>}, {pipeline_mode = #tpu.pipeline_mode<synchronous>, transform_indices = @transform_10, window_bounds = array<i64: 1, 128>}, {pipeline_mode = #tpu.pipeline_mode<synchronous>, transform_indices = @transform_11, window_bounds = array<i64: 128, 128>}, {pipeline_mode = #tpu.pipeline_mode<synchronous>, transform_indices = @transform_12, window_bounds = array<i64: 1, 128>}, {pipeline_mode = #tpu.pipeline_mode<synchronous>, transform_indices = @transform_13, window_bounds = array<i64: 256, 128>}, {pipeline_mode = #tpu.pipeline_mode<synchronous>, transform_indices = @transform_14, window_bounds = array<i64: 1, 128>}, {pipeline_mode = #tpu.pipeline_mode<synchronous>, transform_indices = @transform_15, window_bounds = array<i64: 256, 128>}, {pipeline_mode = #tpu.pipeline_mode<synchronous>, transform_indices = @transform_16, window_bounds = array<i64: 1, 128>}, {pipeline_mode = #tpu.pipeline_mode<synchronous>, transform_indices = @transform_17, window_bounds = array<i64: 128, 128>}, {pipeline_mode = #tpu.pipeline_mode<synchronous>, transform_indices = @transform_18, window_bounds = array<i64: 1, 128>}, {transform_indices = @transform_19, window_bounds = array<i64: 1, 2, 128>}]} {
    %c0 = arith.constant 0 : index
    %c0_0 = arith.constant 0 : index
    %c0_1 = arith.constant 0 : index
    %0 = vector.load %arg1[%c0, %c0_0, %c0_1] : memref<2x16x128xf32, #tpu.memory_space<vmem>>, vector<2x16x128xf32>
    %1 = vector.shape_cast %0 : vector<2x16x128xf32> to vector<32x128xf32>
    %2 = tpu.iota {dimensions = array<i32: 0>} : vector<32x1xi32>
    %c16_i32 = arith.constant 16 : i32
    %3 = vector.broadcast %c16_i32 : i32 to vector<32x1xi32>
    %4 = arith.cmpi sge, %2, %3 : vector<32x1xi32>
    %c16_i32_2 = arith.constant 16 : i32
    %5 = vector.broadcast %c16_i32_2 : i32 to vector<32x1xi32>
    %6 = arith.subi %2, %5 : vector<32x1xi32>
    %7 = arith.select %4, %6, %2 : vector<32x1xi1>, vector<32x1xi32>
    %c1_i32 = arith.constant 1 : i32
    %8 = tpu.dynamic_rotate %1 by %c1_i32 dim 0 : vector<32x128xf32>, i32 -> vector<32x128xf32>
    %c1_i32_3 = arith.constant 1 : i32
    %9 = vector.broadcast %c1_i32_3 : i32 to vector<32x1xi32>
    %10 = arith.cmpi slt, %7, %9 : vector<32x1xi32>
    %cst = arith.constant 0.000000e+00 : f32
    %11 = vector.shape_cast %10 : vector<32x1xi1> to vector<32x1xi1>
    %12 = vector.broadcast %11 : vector<32x1xi1> to vector<32x128xi1>
    %13 = vector.broadcast %cst : f32 to vector<32x128xf32>
    %14 = arith.select %12, %13, %8 : vector<32x128xi1>, vector<32x128xf32>
    %15 = tpu.concatenate %14, %1 in 1 : vector<32x128xf32>, vector<32x128xf32> -> vector<32x256xf32>
    %16 = arith.truncf %15 : vector<32x256xf32> to vector<32x256xbf16>
    %c0_4 = arith.constant 0 : index
    %c0_5 = arith.constant 0 : index
    %17 = vector.load %arg2[%c0_4, %c0_5] : memref<256x128xbf16, #tpu.memory_space<vmem>>, vector<256x128xbf16>
    %cst_6 = arith.constant dense<0.000000e+00> : vector<32x128xf32>
    %18 = tpu.matmul %16, %17, %cst_6 {dimension_numbers = #tpu.dot_dimension_numbers<[1], [0], [0], [1], [0, 0, 1, 1], [], []>} : vector<32x256xbf16>, vector<256x128xbf16>, vector<32x128xf32> -> vector<32x128xf32>
    %c0_7 = arith.constant 0 : index
    %c0_8 = arith.constant 0 : index
    %19 = vector.load %arg3[%c0_7, %c0_8] : memref<1x128xf32, #tpu.memory_space<vmem>>, vector<1x128xf32>
    %20 = vector.broadcast %19 : vector<1x128xf32> to vector<32x128xf32>
    %21 = arith.addf %18, %20 : vector<32x128xf32>
    %cst_9 = arith.constant 0.000000e+00 : f32
    %22 = vector.broadcast %cst_9 : f32 to vector<32x128xf32>
    %23 = arith.maximumf %21, %22 : vector<32x128xf32>
    %c1_i32_10 = arith.constant 1 : i32
    %24 = tpu.dynamic_rotate %23 by %c1_i32_10 dim 0 : vector<32x128xf32>, i32 -> vector<32x128xf32>
    %c1_i32_11 = arith.constant 1 : i32
    %25 = vector.broadcast %c1_i32_11 : i32 to vector<32x1xi32>
    %26 = arith.cmpi slt, %7, %25 : vector<32x1xi32>
    %cst_12 = arith.constant 0.000000e+00 : f32
    %27 = vector.shape_cast %26 : vector<32x1xi1> to vector<32x1xi1>
    %28 = vector.broadcast %27 : vector<32x1xi1> to vector<32x128xi1>
    %29 = vector.broadcast %cst_12 : f32 to vector<32x128xf32>
    %30 = arith.select %28, %29, %24 : vector<32x128xi1>, vector<32x128xf32>
    %31 = tpu.concatenate %30, %23 in 1 : vector<32x128xf32>, vector<32x128xf32> -> vector<32x256xf32>
    %32 = arith.truncf %31 : vector<32x256xf32> to vector<32x256xbf16>
    %c0_13 = arith.constant 0 : index
    %c0_14 = arith.constant 0 : index
    %33 = vector.load %arg4[%c0_13, %c0_14] : memref<256x128xbf16, #tpu.memory_space<vmem>>, vector<256x128xbf16>
    %cst_15 = arith.constant dense<0.000000e+00> : vector<32x128xf32>
    %34 = tpu.matmul %32, %33, %cst_15 {dimension_numbers = #tpu.dot_dimension_numbers<[1], [0], [0], [1], [0, 0, 1, 1], [], []>} : vector<32x256xbf16>, vector<256x128xbf16>, vector<32x128xf32> -> vector<32x128xf32>
    %c0_16 = arith.constant 0 : index
    %c0_17 = arith.constant 0 : index
    %35 = vector.load %arg5[%c0_16, %c0_17] : memref<1x128xf32, #tpu.memory_space<vmem>>, vector<1x128xf32>
    %36 = vector.broadcast %35 : vector<1x128xf32> to vector<32x128xf32>
    %37 = arith.addf %34, %36 : vector<32x128xf32>
    %38 = arith.truncf %1 : vector<32x128xf32> to vector<32x128xbf16>
    %c0_18 = arith.constant 0 : index
    %c0_19 = arith.constant 0 : index
    %39 = vector.load %arg6[%c0_18, %c0_19] : memref<128x128xbf16, #tpu.memory_space<vmem>>, vector<128x128xbf16>
    %cst_20 = arith.constant dense<0.000000e+00> : vector<32x128xf32>
    %40 = tpu.matmul %38, %39, %cst_20 {dimension_numbers = #tpu.dot_dimension_numbers<[1], [0], [0], [1], [0, 0, 1, 1], [], []>} : vector<32x128xbf16>, vector<128x128xbf16>, vector<32x128xf32> -> vector<32x128xf32>
    %c0_21 = arith.constant 0 : index
    %c0_22 = arith.constant 0 : index
    %41 = vector.load %arg7[%c0_21, %c0_22] : memref<1x128xf32, #tpu.memory_space<vmem>>, vector<1x128xf32>
    %42 = vector.broadcast %41 : vector<1x128xf32> to vector<32x128xf32>
    %43 = arith.addf %40, %42 : vector<32x128xf32>
    %44 = arith.addf %37, %43 : vector<32x128xf32>
    %cst_23 = arith.constant 0.000000e+00 : f32
    %45 = vector.broadcast %cst_23 : f32 to vector<32x128xf32>
    %46 = arith.maximumf %44, %45 : vector<32x128xf32>
    %c2_i32 = arith.constant 2 : i32
    %47 = tpu.dynamic_rotate %46 by %c2_i32 dim 0 : vector<32x128xf32>, i32 -> vector<32x128xf32>
    %c2_i32_24 = arith.constant 2 : i32
    %48 = vector.broadcast %c2_i32_24 : i32 to vector<32x1xi32>
    %49 = arith.cmpi slt, %7, %48 : vector<32x1xi32>
    %cst_25 = arith.constant 0.000000e+00 : f32
    %50 = vector.shape_cast %49 : vector<32x1xi1> to vector<32x1xi1>
    %51 = vector.broadcast %50 : vector<32x1xi1> to vector<32x128xi1>
    %52 = vector.broadcast %cst_25 : f32 to vector<32x128xf32>
    %53 = arith.select %51, %52, %47 : vector<32x128xi1>, vector<32x128xf32>
    %54 = tpu.concatenate %53, %46 in 1 : vector<32x128xf32>, vector<32x128xf32> -> vector<32x256xf32>
    %55 = arith.truncf %54 : vector<32x256xf32> to vector<32x256xbf16>
    %c0_26 = arith.constant 0 : index
    %c0_27 = arith.constant 0 : index
    %56 = vector.load %arg8[%c0_26, %c0_27] : memref<256x128xbf16, #tpu.memory_space<vmem>>, vector<256x128xbf16>
    %cst_28 = arith.constant dense<0.000000e+00> : vector<32x128xf32>
    %57 = tpu.matmul %55, %56, %cst_28 {dimension_numbers = #tpu.dot_dimension_numbers<[1], [0], [0], [1], [0, 0, 1, 1], [], []>} : vector<32x256xbf16>, vector<256x128xbf16>, vector<32x128xf32> -> vector<32x128xf32>
    %c0_29 = arith.constant 0 : index
    %c0_30 = arith.constant 0 : index
    %58 = vector.load %arg9[%c0_29, %c0_30] : memref<1x128xf32, #tpu.memory_space<vmem>>, vector<1x128xf32>
    %59 = vector.broadcast %58 : vector<1x128xf32> to vector<32x128xf32>
    %60 = arith.addf %57, %59 : vector<32x128xf32>
    %cst_31 = arith.constant 0.000000e+00 : f32
    %61 = vector.broadcast %cst_31 : f32 to vector<32x128xf32>
    %62 = arith.maximumf %60, %61 : vector<32x128xf32>
    %c2_i32_32 = arith.constant 2 : i32
    %63 = tpu.dynamic_rotate %62 by %c2_i32_32 dim 0 : vector<32x128xf32>, i32 -> vector<32x128xf32>
    %c2_i32_33 = arith.constant 2 : i32
    %64 = vector.broadcast %c2_i32_33 : i32 to vector<32x1xi32>
    %65 = arith.cmpi slt, %7, %64 : vector<32x1xi32>
    %cst_34 = arith.constant 0.000000e+00 : f32
    %66 = vector.shape_cast %65 : vector<32x1xi1> to vector<32x1xi1>
    %67 = vector.broadcast %66 : vector<32x1xi1> to vector<32x128xi1>
    %68 = vector.broadcast %cst_34 : f32 to vector<32x128xf32>
    %69 = arith.select %67, %68, %63 : vector<32x128xi1>, vector<32x128xf32>
    %70 = tpu.concatenate %69, %62 in 1 : vector<32x128xf32>, vector<32x128xf32> -> vector<32x256xf32>
    %71 = arith.truncf %70 : vector<32x256xf32> to vector<32x256xbf16>
    %c0_35 = arith.constant 0 : index
    %c0_36 = arith.constant 0 : index
    %72 = vector.load %arg10[%c0_35, %c0_36] : memref<256x128xbf16, #tpu.memory_space<vmem>>, vector<256x128xbf16>
    %cst_37 = arith.constant dense<0.000000e+00> : vector<32x128xf32>
    %73 = tpu.matmul %71, %72, %cst_37 {dimension_numbers = #tpu.dot_dimension_numbers<[1], [0], [0], [1], [0, 0, 1, 1], [], []>} : vector<32x256xbf16>, vector<256x128xbf16>, vector<32x128xf32> -> vector<32x128xf32>
    %c0_38 = arith.constant 0 : index
    %c0_39 = arith.constant 0 : index
    %74 = vector.load %arg11[%c0_38, %c0_39] : memref<1x128xf32, #tpu.memory_space<vmem>>, vector<1x128xf32>
    %75 = vector.broadcast %74 : vector<1x128xf32> to vector<32x128xf32>
    %76 = arith.addf %73, %75 : vector<32x128xf32>
    %77 = arith.truncf %46 : vector<32x128xf32> to vector<32x128xbf16>
    %c0_40 = arith.constant 0 : index
    %c0_41 = arith.constant 0 : index
    %78 = vector.load %arg12[%c0_40, %c0_41] : memref<128x128xbf16, #tpu.memory_space<vmem>>, vector<128x128xbf16>
    %cst_42 = arith.constant dense<0.000000e+00> : vector<32x128xf32>
    %79 = tpu.matmul %77, %78, %cst_42 {dimension_numbers = #tpu.dot_dimension_numbers<[1], [0], [0], [1], [0, 0, 1, 1], [], []>} : vector<32x128xbf16>, vector<128x128xbf16>, vector<32x128xf32> -> vector<32x128xf32>
    %c0_43 = arith.constant 0 : index
    %c0_44 = arith.constant 0 : index
    %80 = vector.load %arg13[%c0_43, %c0_44] : memref<1x128xf32, #tpu.memory_space<vmem>>, vector<1x128xf32>
    %81 = vector.broadcast %80 : vector<1x128xf32> to vector<32x128xf32>
    %82 = arith.addf %79, %81 : vector<32x128xf32>
    %83 = arith.addf %76, %82 : vector<32x128xf32>
    %cst_45 = arith.constant 0.000000e+00 : f32
    %84 = vector.broadcast %cst_45 : f32 to vector<32x128xf32>
    %85 = arith.maximumf %83, %84 : vector<32x128xf32>
    %c4_i32 = arith.constant 4 : i32
    %86 = tpu.dynamic_rotate %85 by %c4_i32 dim 0 : vector<32x128xf32>, i32 -> vector<32x128xf32>
    %c4_i32_46 = arith.constant 4 : i32
    %87 = vector.broadcast %c4_i32_46 : i32 to vector<32x1xi32>
    %88 = arith.cmpi slt, %7, %87 : vector<32x1xi32>
    %cst_47 = arith.constant 0.000000e+00 : f32
    %89 = vector.shape_cast %88 : vector<32x1xi1> to vector<32x1xi1>
    %90 = vector.broadcast %89 : vector<32x1xi1> to vector<32x128xi1>
    %91 = vector.broadcast %cst_47 : f32 to vector<32x128xf32>
    %92 = arith.select %90, %91, %86 : vector<32x128xi1>, vector<32x128xf32>
    %93 = tpu.concatenate %92, %85 in 1 : vector<32x128xf32>, vector<32x128xf32> -> vector<32x256xf32>
    %94 = arith.truncf %93 : vector<32x256xf32> to vector<32x256xbf16>
    %c0_48 = arith.constant 0 : index
    %c0_49 = arith.constant 0 : index
    %95 = vector.load %arg14[%c0_48, %c0_49] : memref<256x128xbf16, #tpu.memory_space<vmem>>, vector<256x128xbf16>
    %cst_50 = arith.constant dense<0.000000e+00> : vector<32x128xf32>
    %96 = tpu.matmul %94, %95, %cst_50 {dimension_numbers = #tpu.dot_dimension_numbers<[1], [0], [0], [1], [0, 0, 1, 1], [], []>} : vector<32x256xbf16>, vector<256x128xbf16>, vector<32x128xf32> -> vector<32x128xf32>
    %c0_51 = arith.constant 0 : index
    %c0_52 = arith.constant 0 : index
    %97 = vector.load %arg15[%c0_51, %c0_52] : memref<1x128xf32, #tpu.memory_space<vmem>>, vector<1x128xf32>
    %98 = vector.broadcast %97 : vector<1x128xf32> to vector<32x128xf32>
    %99 = arith.addf %96, %98 : vector<32x128xf32>
    %cst_53 = arith.constant 0.000000e+00 : f32
    %100 = vector.broadcast %cst_53 : f32 to vector<32x128xf32>
    %101 = arith.maximumf %99, %100 : vector<32x128xf32>
    %c4_i32_54 = arith.constant 4 : i32
    %102 = tpu.dynamic_rotate %101 by %c4_i32_54 dim 0 : vector<32x128xf32>, i32 -> vector<32x128xf32>
    %c4_i32_55 = arith.constant 4 : i32
    %103 = vector.broadcast %c4_i32_55 : i32 to vector<32x1xi32>
    %104 = arith.cmpi slt, %7, %103 : vector<32x1xi32>
    %cst_56 = arith.constant 0.000000e+00 : f32
    %105 = vector.shape_cast %104 : vector<32x1xi1> to vector<32x1xi1>
    %106 = vector.broadcast %105 : vector<32x1xi1> to vector<32x128xi1>
    %107 = vector.broadcast %cst_56 : f32 to vector<32x128xf32>
    %108 = arith.select %106, %107, %102 : vector<32x128xi1>, vector<32x128xf32>
    %109 = tpu.concatenate %108, %101 in 1 : vector<32x128xf32>, vector<32x128xf32> -> vector<32x256xf32>
    %110 = arith.truncf %109 : vector<32x256xf32> to vector<32x256xbf16>
    %c0_57 = arith.constant 0 : index
    %c0_58 = arith.constant 0 : index
    %111 = vector.load %arg16[%c0_57, %c0_58] : memref<256x128xbf16, #tpu.memory_space<vmem>>, vector<256x128xbf16>
    %cst_59 = arith.constant dense<0.000000e+00> : vector<32x128xf32>
    %112 = tpu.matmul %110, %111, %cst_59 {dimension_numbers = #tpu.dot_dimension_numbers<[1], [0], [0], [1], [0, 0, 1, 1], [], []>} : vector<32x256xbf16>, vector<256x128xbf16>, vector<32x128xf32> -> vector<32x128xf32>
    %c0_60 = arith.constant 0 : index
    %c0_61 = arith.constant 0 : index
    %113 = vector.load %arg17[%c0_60, %c0_61] : memref<1x128xf32, #tpu.memory_space<vmem>>, vector<1x128xf32>
    %114 = vector.broadcast %113 : vector<1x128xf32> to vector<32x128xf32>
    %115 = arith.addf %112, %114 : vector<32x128xf32>
    %116 = arith.addf %115, %85 : vector<32x128xf32>
    %cst_62 = arith.constant 0.000000e+00 : f32
    %117 = vector.broadcast %cst_62 : f32 to vector<32x128xf32>
    %118 = arith.maximumf %116, %117 : vector<32x128xf32>
    %119 = vector.shape_cast %118 : vector<32x128xf32> to vector<2x16x128xf32>
    %120 = vector.extract_strided_slice %119 {offsets = [0, 15, 0], sizes = [2, 1, 128], strides = [1, 1, 1]} : vector<2x16x128xf32> to vector<2x1x128xf32>
    %121 = vector.shape_cast %120 : vector<2x1x128xf32> to vector<2x128xf32>
    %122 = arith.truncf %121 : vector<2x128xf32> to vector<2x128xbf16>
    %c0_63 = arith.constant 0 : index
    %c0_64 = arith.constant 0 : index
    %123 = vector.load %arg18[%c0_63, %c0_64] : memref<128x128xbf16, #tpu.memory_space<vmem>>, vector<128x128xbf16>
    %cst_65 = arith.constant dense<0.000000e+00> : vector<2x128xf32>
    %124 = tpu.matmul %122, %123, %cst_65 {dimension_numbers = #tpu.dot_dimension_numbers<[1], [0], [0], [1], [0, 0, 1, 1], [], []>} : vector<2x128xbf16>, vector<128x128xbf16>, vector<2x128xf32> -> vector<2x128xf32>
    %c0_66 = arith.constant 0 : index
    %c0_67 = arith.constant 0 : index
    %125 = vector.load %arg19[%c0_66, %c0_67] : memref<1x128xf32, #tpu.memory_space<vmem>>, vector<1x128xf32>
    %126 = vector.broadcast %125 : vector<1x128xf32> to vector<2x128xf32>
    %127 = arith.addf %124, %126 : vector<2x128xf32>
    %128 = tpu.iota {dimensions = array<i32: 1>} : vector<2x128xi32>
    %c10_i32 = arith.constant 10 : i32
    %129 = vector.broadcast %c10_i32 : i32 to vector<2x128xi32>
    %130 = arith.cmpi slt, %128, %129 : vector<2x128xi32>
    %cst_68 = arith.constant -1.000000e+30 : f32
    %131 = vector.broadcast %cst_68 : f32 to vector<2x128xf32>
    %132 = arith.select %130, %127, %131 : vector<2x128xi1>, vector<2x128xf32>
    %cst_69 = arith.constant dense<0xFF800000> : vector<2xf32>
    %133 = vector.multi_reduction <maximumf>, %132, %cst_69 [1] : vector<2x128xf32> to vector<2xf32>
    %134 = vector.shape_cast %133 : vector<2xf32> to vector<2x1xf32>
    %135 = vector.broadcast %134 : vector<2x1xf32> to vector<2x128xf32>
    %136 = arith.subf %132, %135 : vector<2x128xf32>
    %137 = math.exp %136 : vector<2x128xf32>
    %cst_70 = arith.constant dense<0.000000e+00> : vector<2xf32>
    %138 = vector.multi_reduction <add>, %137, %cst_70 [1] : vector<2x128xf32> to vector<2xf32>
    %139 = vector.shape_cast %138 : vector<2xf32> to vector<2x1xf32>
    %140 = math.log %139 : vector<2x1xf32>
    %141 = vector.broadcast %140 : vector<2x1xf32> to vector<2x128xf32>
    %142 = arith.subf %136, %141 : vector<2x128xf32>
    %c0_71 = arith.constant 0 : index
    %c0_72 = arith.constant 0 : index
    %c0_73 = arith.constant 0 : index
    %143 = vector.load %arg20[%c0_71, %c0_72, %c0_73] : memref<1x2x128xf32, #tpu.memory_space<vmem>>, vector<1x2x128xf32>
    %144 = vector.shape_cast %143 : vector<1x2x128xf32> to vector<2x128xf32>
    %145 = vector.shape_cast %142 : vector<2x128xf32> to vector<1x2x128xf32>
    tpu.vector_store %arg20[%c0_71, %c0_72, %c0_73], %145 {strides = array<i32>} : memref<1x2x128xf32, #tpu.memory_space<vmem>>, vector<1x2x128xf32>,
    return
  }
  func.func @transform_0(%arg0: i32) -> (i32, i32, i32) {
    %c0_i32 = arith.constant 0 : i32
    %c0_i32_0 = arith.constant 0 : i32
    %c0_i32_1 = arith.constant 0 : i32
    return %arg0, %c0_i32, %c0_i32_0 : i32, i32, i32
  }
  func.func @transform_1(%arg0: i32) -> (i32, i32) {
    %c0_i32 = arith.constant 0 : i32
    %c0_i32_0 = arith.constant 0 : i32
    %c0_i32_1 = arith.constant 0 : i32
    return %c0_i32, %c0_i32_0 : i32, i32
  }
  func.func @transform_2(%arg0: i32) -> (i32, i32) {
    %c0_i32 = arith.constant 0 : i32
    %c0_i32_0 = arith.constant 0 : i32
    %c0_i32_1 = arith.constant 0 : i32
    return %c0_i32, %c0_i32_0 : i32, i32
  }
  func.func @transform_3(%arg0: i32) -> (i32, i32) {
    %c0_i32 = arith.constant 0 : i32
    %c0_i32_0 = arith.constant 0 : i32
    %c0_i32_1 = arith.constant 0 : i32
    return %c0_i32, %c0_i32_0 : i32, i32
  }
  func.func @transform_4(%arg0: i32) -> (i32, i32) {
    %c0_i32 = arith.constant 0 : i32
    %c0_i32_0 = arith.constant 0 : i32
    %c0_i32_1 = arith.constant 0 : i32
    return %c0_i32, %c0_i32_0 : i32, i32
  }
  func.func @transform_5(%arg0: i32) -> (i32, i32) {
    %c0_i32 = arith.constant 0 : i32
    %c0_i32_0 = arith.constant 0 : i32
    %c0_i32_1 = arith.constant 0 : i32
    return %c0_i32, %c0_i32_0 : i32, i32
  }
  func.func @transform_6(%arg0: i32) -> (i32, i32) {
    %c0_i32 = arith.constant 0 : i32
    %c0_i32_0 = arith.constant 0 : i32
    %c0_i32_1 = arith.constant 0 : i32
    return %c0_i32, %c0_i32_0 : i32, i32
  }
  func.func @transform_7(%arg0: i32) -> (i32, i32) {
    %c0_i32 = arith.constant 0 : i32
    %c0_i32_0 = arith.constant 0 : i32
    %c0_i32_1 = arith.constant 0 : i32
    return %c0_i32, %c0_i32_0 : i32, i32
  }
  func.func @transform_8(%arg0: i32) -> (i32, i32) {
    %c0_i32 = arith.constant 0 : i32
    %c0_i32_0 = arith.constant 0 : i32
    %c0_i32_1 = arith.constant 0 : i32
    return %c0_i32, %c0_i32_0 : i32, i32
  }
  func.func @transform_9(%arg0: i32) -> (i32, i32) {
    %c0_i32 = arith.constant 0 : i32
    %c0_i32_0 = arith.constant 0 : i32
    %c0_i32_1 = arith.constant 0 : i32
    return %c0_i32, %c0_i32_0 : i32, i32
  }
  func.func @transform_10(%arg0: i32) -> (i32, i32) {
    %c0_i32 = arith.constant 0 : i32
    %c0_i32_0 = arith.constant 0 : i32
    %c0_i32_1 = arith.constant 0 : i32
    return %c0_i32, %c0_i32_0 : i32, i32
  }
  func.func @transform_11(%arg0: i32) -> (i32, i32) {
    %c0_i32 = arith.constant 0 : i32
    %c0_i32_0 = arith.constant 0 : i32
    %c0_i32_1 = arith.constant 0 : i32
    return %c0_i32, %c0_i32_0 : i32, i32
  }
  func.func @transform_12(%arg0: i32) -> (i32, i32) {
    %c0_i32 = arith.constant 0 : i32
    %c0_i32_0 = arith.constant 0 : i32
    %c0_i32_1 = arith.constant 0 : i32
    return %c0_i32, %c0_i32_0 : i32, i32
  }
  func.func @transform_13(%arg0: i32) -> (i32, i32) {
    %c0_i32 = arith.constant 0 : i32
    %c0_i32_0 = arith.constant 0 : i32
    %c0_i32_1 = arith.constant 0 : i32
    return %c0_i32, %c0_i32_0 : i32, i32
  }
  func.func @transform_14(%arg0: i32) -> (i32, i32) {
    %c0_i32 = arith.constant 0 : i32
    %c0_i32_0 = arith.constant 0 : i32
    %c0_i32_1 = arith.constant 0 : i32
    return %c0_i32, %c0_i32_0 : i32, i32
  }
  func.func @transform_15(%arg0: i32) -> (i32, i32) {
    %c0_i32 = arith.constant 0 : i32
    %c0_i32_0 = arith.constant 0 : i32
    %c0_i32_1 = arith.constant 0 : i32
    return %c0_i32, %c0_i32_0 : i32, i32
  }
  func.func @transform_16(%arg0: i32) -> (i32, i32) {
    %c0_i32 = arith.constant 0 : i32
    %c0_i32_0 = arith.constant 0 : i32
    %c0_i32_1 = arith.constant 0 : i32
    return %c0_i32, %c0_i32_0 : i32, i32
  }
  func.func @transform_17(%arg0: i32) -> (i32, i32) {
    %c0_i32 = arith.constant 0 : i32
    %c0_i32_0 = arith.constant 0 : i32
    %c0_i32_1 = arith.constant 0 : i32
    return %c0_i32, %c0_i32_0 : i32, i32
  }
  func.func @transform_18(%arg0: i32) -> (i32, i32) {
    %c0_i32 = arith.constant 0 : i32
    %c0_i32_0 = arith.constant 0 : i32
    %c0_i32_1 = arith.constant 0 : i32
    return %c0_i32, %c0_i32_0 : i32, i32
  }
  func.func @transform_19(%arg0: i32) -> (i32, i32, i32) {
    %c0_i32 = arith.constant 0 : i32
    %c0_i32_0 = arith.constant 0 : i32
    %c0_i32_1 = arith.constant 0 : i32
    return %arg0, %c0_i32, %c0_i32_0 : i32, i32, i32
  }
}

</mosaic_0001>

<bundles_post_ra>
// kernel: tpu_custom_call.1
= control target key start
LH: loop header
LB: loop body
LE: loop exit
PB: predicated region body
PF: predicated region fallthrough
CT: control target
= control target key end

     0   :  { %s4159_s0 = inlined_call_operand.hbm [shape: f32[4,16,128], index: 0, kind: input, shape index: {}]   ;;  %s4160_s1 = inlined_call_operand.hbm [shape: bf16[256,128], index: 1, kind: input, shape index: {}]   ;;  %s4161_s2 = inlined_call_operand.vmem [shape: f32[1,128], index: 2, kind: input, shape index: {}]   ;;  %s4162_s3 = inlined_call_operand.hbm [shape: bf16[256,128], index: 3, kind: input, shape index: {}]   ;;  %s4163_s4 = inlined_call_operand.vmem [shape: f32[1,128], index: 4, kind: input, shape index: {}]   ;;  %s4164_s5 = inlined_call_operand.hbm [shape: bf16[128,128], index: 5, kind: input, shape index: {}]   ;;  %s4165_s6 = inlined_call_operand.vmem [shape: f32[1,128], index: 6, kind: input, shape index: {}]   ;;  %s4166_s7 = inlined_call_operand.hbm [shape: bf16[256,128], index: 7, kind: input, shape index: {}]   ;;  %s4167_s8 = inlined_call_operand.vmem [shape: f32[1,128], index: 8, kind: input, shape index: {}]   ;;  %s4168_s9 = inlined_call_operand.hbm [shape: bf16[256,128], index: 9, kind: input, shape index: {}]   ;;  %s4169_s10 = inlined_call_operand.vmem [shape: f32[1,128], index: 10, kind: input, shape index: {}]   ;;  %s4170_s11 = inlined_call_operand.hbm [shape: bf16[128,128], index: 11, kind: input, shape index: {}]   ;;  %s4171_s12 = inlined_call_operand.vmem [shape: f32[1,128], index: 12, kind: input, shape index: {}]   ;;  %s4172_s13 = inlined_call_operand.hbm [shape: bf16[256,128], index: 13, kind: input, shape index: {}]   ;;  %s4173_s14 = inlined_call_operand.vmem [shape: f32[1,128], index: 14, kind: input, shape index: {}]   ;;  %s4174_s15 = inlined_call_operand.hbm [shape: bf16[256,128], index: 15, kind: input, shape index: {}]   ;;  %s4175_s16 = inlined_call_operand.vmem [shape: f32[1,128], index: 16, kind: input, shape index: {}]   ;;  %s4176_s17 = inlined_call_operand.hbm [shape: bf16[128,128], index: 17, kind: input, shape index: {}]   ;;  %s4177_s18 = inlined_call_operand.vmem [shape: f32[1,128], index: 18, kind: input, shape index: {}]   ;;  %s4178_s19 = inlined_call_operand.hbm [shape: f32[2,2,128], index: 19, kind: output, shape index: {}]  }
   0x1   :  { %4181 = sst [smem:[#allocation27_spill]] %s4159_s0 }
   0x2   :  { %4182 = sst [smem:[#allocation28_spill]] %s4160_s1 }
   0x3   :  { %4183 = sst [smem:[#allocation29_spill]] %s4161_s2 }
   0x4   :  { %4184 = sst [smem:[#allocation30_spill]] %s4162_s3 }
   0x5   :  { %4185 = sst [smem:[#allocation31_spill]] %s4164_s5 }
   0x6   :  { %4186 = sst [smem:[#allocation32_spill]] %s4166_s7 }
   0x7   :  { %4187 = sst [smem:[#allocation33_spill]] %s4168_s9 }
   0x8   :  { %4188 = sst [smem:[#allocation34_spill]] %s4170_s11 }
   0x9   :  { %4189 = sst [smem:[#allocation35_spill]] %s4171_s12 }
   0xa   :  { %4190 = sst [smem:[#allocation36_spill]] %s4172_s13 }
   0xb   :  { %4191 = sst [smem:[#allocation37_spill]] %s4173_s14 }
   0xc   :  { %4192 = sst [smem:[#allocation38_spill]] %s4174_s15 }
   0xd   :  { %4193 = sst [smem:[#allocation39_spill]] %s4175_s16 }
   0xe   :  { %4194 = sst [smem:[#allocation40_spill]] %s4177_s18 }
   0xf   :  { %4195 = sst [smem:[#allocation41_spill]] %s4178_s19 }
  0x10   :  { %24 = vsyncpa [#allocation3], 0 }
  0x11   :  { %26 = vsyncpa [#allocation3 + $0x1], 0 }
  0x12   :  { %27 = vsyncpa [#allocation6], 0 }
  0x13   :  { %28 = vsyncpa [#allocation9], 0 }
  0x14   :  { %29 = vsyncpa [#allocation12], 0 }
  0x15   :  { %30 = vsyncpa [#allocation15], 0 }
  0x16   :  { %31 = vsyncpa [#allocation18], 0 }
  0x17   :  { %32 = vsyncpa [#allocation4], 0 }
  0x18   :  { %34 = vsyncpa [#allocation4 + $0x1], 0  ;;  %s3784_s0 = smov 0   ;;  %s3786_s30 = smov 0  }
  0x19   :  { %s3788_s20 = smov 0   ;;  %s3790_s21 = smov 0  }
  0x1a LB: > { %s4196_s2 = sld [smem:[#allocation28_spill]]  ;;  %s3808_s24 = sadd.s32 4294967295, %s3668_s21   ;;  %s3668_s21 = sphi %s3790_s21, %s4228_s21   ;;  %s3664_s20 = sphi %s3788_s20, %s4227_s20   ;;  %s3660_s30 = sphi %s3786_s30, %s4226_s30   ;;  %s3656_s0 = sphi %s3784_s0, %s4225_s0  }
  0x1b   : > { %p2435_p0 = scmp.ge.s32.totalorder %s3668_s21, 1  ;;  %p61_p1 = scmp.eq.s32.totalorder %s3808_s24, 0 }
  0x1c   : > { %p475_p2 = scmp.lt.s32.totalorder %s3668_s21, 3  ;;  %s3670_s3 = smov [#allocation5]  }
  0x1d   : > { %s488_s26 = sshll.u32 %s3670_s3, 4  ;;  %s4198_s5 = sld [smem:[#allocation31_spill]]  ;;  %s489_s26 = int_to_ptr.vmem [resolvable:$true] %s488_s26 }
  0x1e   : > { %p3813_p3 = pnand %p2435_p0, %p475_p2  ;;  %s4200_s9 = sld [smem:[#allocation33_spill]] }
  0x1f   : > { %s3671_s19 = smov [#allocation8]   ;;  %s3672_s16 = smov 64  }
  0x20   : > { %s486_s23 = sshll.u32 %s4196_s2, 4  ;;  %p3167_p4 = pneg %p3813_p3  ;;  %s487_s23 = int_to_ptr.hbm [resolvable:$true] %s486_s23 }
  0x21   : > { %s522_s18 = sshll.u32 %s3671_s19, 4  ;;  %s3673_s14 = smov 4   ;;  %s523_s18 = int_to_ptr.vmem [resolvable:$true] %s522_s18 }
  0x22   : > { %p3825_p6 = pnand %p3167_p4, %p61_p1  ;;  %s4201_s13 = sld [smem:[#allocation36_spill]] }
  0x23   : > { %s520_s29 = sshll.u32 %s4198_s5, 4  ;;  %s3674_s19 = smov [#allocation11]   ;;  %s521_s29 = int_to_ptr.hbm [resolvable:$true] %s520_s29 }
  0x24   : > { %s554_s3 = sshll.u32 %s4200_s9, 4  ;;  %s556_s2 = sshll.u32 %s3674_s19, 4  ;;  %s555_s3 = int_to_ptr.hbm [resolvable:$true] %s554_s3  ;;  %s557_s2 = int_to_ptr.vmem [resolvable:$true] %s556_s2 }
  0x25   : > { %3170 = dma.hbm_to_vmem [thread:$0]  (!%p3825_p6), %s487_s23, 2048, %s489_s26, [#allocation6], %s3672_s16, %s3672_s16, %s3673_s14  }
  0x26   : > { %3176 = dma.hbm_to_vmem [thread:$0]  (!%p3825_p6), %s521_s29, 1024, %s523_s18, [#allocation9], %s3672_s16, %s3672_s16, %s3673_s14  }
  0x27   : > { %3182 = dma.hbm_to_vmem [thread:$0]  (!%p3825_p6), %s555_s3, 2048, %s557_s2, [#allocation12], %s3672_s16, %s3672_s16, %s3673_s14  }
  0x28   : > { %s588_s22 = sshll.u32 %s4201_s13, 4  ;;  %s3675_s23 = smov [#allocation14]   ;;  %s589_s22 = int_to_ptr.hbm [resolvable:$true] %s588_s22 }
  0x29   : > { %s590_s26 = sshll.u32 %s3675_s23, 4  ;;  %s4202_s12 = sld [smem:[#allocation30_spill]]  ;;  %s591_s26 = int_to_ptr.vmem [resolvable:$true] %s590_s26 }
  0x2a   : > { %3188 = dma.hbm_to_vmem [thread:$0]  (!%p3825_p6), %s589_s22, 2048, %s591_s26, [#allocation15], %s3672_s16, %s3672_s16, %s3673_s14  }
  0x2b   : > { %s4203_s7 = sld [smem:[#allocation32_spill]]  ;;  %s3676_s19 = smov [#allocation7]  }
  0x2c   : > { %s505_s3 = sshll.u32 %s3676_s19, 4  ;;  %s3677_s5 = smov [#allocation10]   ;;  %s506_s3 = int_to_ptr.vmem [resolvable:$true] %s505_s3 }
  0x2d   : > { %s539_s9 = sshll.u32 %s3677_s5, 4  ;;  %s4204_s11 = sld [smem:[#allocation34_spill]]  ;;  %s540_s9 = int_to_ptr.vmem [resolvable:$true] %s539_s9 }
  0x2e   : > { %s4205_s15 = sld [smem:[#allocation38_spill]]  ;;  %s3897_s23 = sadd.s32 1, %s3668_s21  }
  0x2f   : > { %s503_s18 = sshll.u32 %s4202_s12, 4  ;;  %s3680_s12 = smov [#allocation17]   ;;  %s504_s18 = int_to_ptr.hbm [resolvable:$true] %s503_s18 }
  0x30   : > { %3173 = dma.hbm_to_vmem [thread:$0]  (!%p3825_p6), %s504_s18, 2048, %s506_s3, [#allocation6], %s3672_s16, %s3672_s16, %s3673_s14  }
  0x31   : > { %s537_s28 = sshll.u32 %s4203_s7, 4  ;;  %s3678_s18 = smov [#allocation13]   ;;  %s538_s28 = int_to_ptr.hbm [resolvable:$true] %s537_s28 }
  0x32   : > { %3179 = dma.hbm_to_vmem [thread:$0]  (!%p3825_p6), %s538_s28, 2048, %s540_s9, [#allocation9], %s3672_s16, %s3672_s16, %s3673_s14  }
  0x33   : > { %s571_s22 = sshll.u32 %s4204_s11, 4  ;;  %s573_s27 = sshll.u32 %s3678_s18, 4  ;;  %s572_s22 = int_to_ptr.hbm [resolvable:$true] %s571_s22  ;;  %s574_s27 = int_to_ptr.vmem [resolvable:$true] %s573_s27 }
  0x34   : > { %s605_s29 = sshll.u32 %s4205_s15, 4  ;;  %s3679_s28 = smov [#allocation16]   ;;  %s606_s29 = int_to_ptr.hbm [resolvable:$true] %s605_s29 }
  0x35   : > { %3185 = dma.hbm_to_vmem [thread:$0]  (!%p3825_p6), %s572_s22, 1024, %s574_s27, [#allocation12], %s3672_s16, %s3672_s16, %s3673_s14  }
  0x36   : > { %s607_s19 = sshll.u32 %s3679_s28, 4  ;;  %s622_s9 = sshll.u32 %s4176_s17, 4  ;;  %s608_s19 = int_to_ptr.vmem [resolvable:$true] %s607_s19  ;;  %s623_s9 = int_to_ptr.hbm [resolvable:$true] %s622_s9 }
  0x37   : > { %3191 = dma.hbm_to_vmem [thread:$0]  (!%p3825_p6), %s606_s29, 2048, %s608_s19, [#allocation15], %s3672_s16, %s3672_s16, %s3673_s14  }
  0x38   : > { %s624_s2 = sshll.u32 %s3680_s12, 4  ;;  %s2434_s22 = sadd.s32 4294967294, %s3668_s21   ;;  %s625_s2 = int_to_ptr.vmem [resolvable:$true] %s624_s2 }
  0x39   : > { %3194 = dma.hbm_to_vmem [thread:$0]  (!%p3825_p6), %s623_s9, 1024, %s625_s2, [#allocation18], %s3672_s16, %s3672_s16, %s3673_s14  }
  0x3a   : > { %s47_s26 = sadd.s32 1, %s3664_s20  ;;  %s44_s18 = ssub.s32 %s3668_s21, %s3897_s23 }
  0x3b   : > { %p54_p7 = scmp.ne.s32.totalorder %s3664_s20, %s3660_s30  ;;  %p45_p8 = scmp.eq.s32.totalorder %s44_s18, 0 }
  0x3c   : > { %p55_p9 = scmp.eq.s32.totalorder %s3668_s21, 0  ;;  %p60_p10 = scmp.ne.s32.totalorder %s3660_s30, %s3656_s0 }
  0x3d   : > { %p462_p11 = scmp.eq.s32.totalorder %s3808_s24, 1  ;;  %p468_p2 = scmp.eq.s32.totalorder %s2434_s22, 1 }
  0x3e   : > { %s3909_s29 = scalar_select %p45_p8, %s3664_s20, %s47_s26  }
  0x3f   : > { %p3911_p12 = por %p55_p9, %p54_p7  ;;  %p3917_p13 = por %p61_p1, %p60_p10 }
  0x40   : > { %p3921_p0 = por %p462_p11, %p54_p7  ;;  %p3212_p4 = scmp.lt.s32.totalorder %s3668_s21, 2 }
  0x41   : > { %s641_s27 = sand.u32 1, %s3664_s20   ;;  %p3927_p6 = por %p468_p2, %p60_p10 }
  0x42   : > { %s2446_s19 = sshll.u32 %s641_s27, 5  ;;  %s2998_s3 = sshll.u32 %s3668_s21, 5 }
  0x43   : > { %s4210_s12 = sld [smem:[#allocation27_spill]]  ;;  %s645_s18 = scalar_lea.vmem [#allocation2], %s2446_s19 }
  0x44   : > { %s654_s7 = sshll.u32 %s645_s18, 4  ;;  %p3937_p7 = pnand %p3212_p4, %p3911_p12  ;;  %s655_s7 = int_to_ptr.vmem [resolvable:$true] %s654_s7 }
  0x45   : > { %s642_s11 = scalar_lea.sflag [#allocation3], %s641_s27 }
  0x46   : > { %p3556_p9 = pneg %p3937_p7 }
  0x49   : > { %s651_s2 = scalar_lea.hbm %s4210_s12, %s2998_s3  ;;  %s3559_s5 = scalar_lea.hbm %s4210_s12, 64 }
  0x4a   : > { %s652_s26 = sshll.u32 %s651_s2, 4  ;;  %s653_s26 = int_to_ptr.hbm [resolvable:$true] %s652_s26 }
  0x4b   : > { %s3552_s13 = sshra.s32 %s653_s26, 4  ;;  %s3553_s13 = int_to_ptr.hbm [resolvable:$true] %s3552_s13 }
  0x4c   : > { %s3554_s15 = scalar_lea.hbm %s3553_s13, 32  ;;  %p3560_p12 = scmp.lt.s32.totalorder %s3553_s13, %s4210_s12 }
  0x4d   : > { %p3555_p8 = scmp.ne.s32.totalorder %s3553_s13, %s3554_s15  ;;  %p3561_p2 = scmp.lt.s32.totalorder %s3559_s5, %s3554_s15 }
  0x4f   : > { %p3557_p10 = pnand %p3556_p9, %p3555_p8  ;;  %p3562_p4 = por %p3561_p2, %p3560_p12 }
  0x51   : > { %p3558_p11 = pneg %p3557_p10 }
  0x53   : > { %p3563_p5 = pnand %p3562_p4, %p3558_p11 }
  0x55   : > { %3566 = shalt.err (!%p3563_p5)
}
  0x56   : > { %s3681_s27 = smov 128   ;;  %s3682_s2 = smov 8  }
  0x57   : > { %3198 = dma.hbm_to_vmem [thread:$0]  (!%p3937_p7), %s653_s26, 512, %s655_s7, %s642_s11, %s3681_s27, %s3681_s27, %s3682_s2  }
  0x58   : > { %666 = sbr.rel (%p3813_p3) target bundleno = 1514 (0x5ea), region = 96  ;;  %s3954_s18 = sand.u32 (!%p3813_p3), 1, %s3660_s30  }
  0x59   : > { %s2451_s3 = sshll.u32 (!%p3813_p3), %s3954_s18, 5  ;;  %s669_s13 = scalar_lea.sflag (!%p3813_p3), [#allocation3], %s3954_s18 }
  0x5a   : > { %s3958_s15 = scalar_lea.vmem (!%p3813_p3), [#allocation2], %s2451_s3 }
  0x5d   : > { %3627 = dma.done.wait (%p3917_p13), %s669_s13, 512  }
  0x5e   : > { %3629 = vsyncadd (%p3917_p13), %s669_s13, 4294966784 }
  0x5f   : > { %3631 = dma.done.wait (%p61_p1), [#allocation6], 4096  }
  0x60   : > { %3633 = vsyncadd (%p61_p1), [#allocation6], 4294963200 }
  0x61   : > { %3635 = dma.done.wait (%p61_p1), [#allocation9], 3072  }
  0x62   : > { %3637 = vsyncadd (%p61_p1), [#allocation9], 4294964224 }
  0x63   : > { %3639 = dma.done.wait (%p61_p1), [#allocation12], 3072  }
  0x64   : > { %3641 = vsyncadd (%p61_p1), [#allocation12], 4294964224 }
  0x65   : > { %3643 = dma.done.wait (%p61_p1), [#allocation15], 4096  }
  0x66   : > { %3645 = vsyncadd (%p61_p1), [#allocation15], 4294963200 }
  0x67   : > { %3647 = dma.done.wait (%p61_p1), [#allocation18], 1024  }
  0x68   : > { %3649 = vsyncadd (%p61_p1), [#allocation18], 4294966272  ;;  %v3006_v0 = vld [vmem:[#allocation5 + $0x38] sm:$0xff]  ;;  %v3005_v2 = vld [vmem:[#allocation5 + $0x30] sm:$0xff]  ;;  %v778_v10 = vlaneseq  ;;  %vm3683_vm2 = vmmov 1   ;;  %s4214_s25 = sld [smem:[#allocation29_spill]] }
  0x69   : > { %v3014_v1 = vld [vmem:[#allocation5 + $0x78] sm:$0xff]  ;;  %955 = vmatpush.bf16.msra.mxu0 %v3006_v0  ;;  %v3013_v3 = vld [vmem:[#allocation5 + $0x70] sm:$0xff]  ;;  %v3004_v4 = vld [vmem:[#allocation5 + $0x28] sm:$0xff]  ;;  %s4217_s13 = sld [smem:[#allocation35_spill]]  ;;  %vm2179_vm10 = vcmask 1041409   ;;  %vm2248_vm12 = vcmask 1041408  }
  0x6a   : > { %974 = vmatpush.bf16.msra.mxu1 %v3014_v1  ;;  %v3012_v5 = vld [vmem:[#allocation5 + $0x68] sm:$0xff]  ;;  %v3003_v6 = vld [vmem:[#allocation5 + $0x20] sm:$0xff]  ;;  %v3002_v8 = vld [vmem:[#allocation5 + $0x18] sm:$0xff]  ;;  %v3988_v17 = vshrl.u32 %v778_v10, 7  ;;  %s4220_s11 = sld [smem:[#allocation37_spill]]  ;;  %s2461_s9 = sshll.u32 %s3954_s18, 1 }
  0x6b   : > { %v3011_v7 = vld [vmem:[#allocation5 + $0x60] sm:$0xff]  ;;  %v3010_v9 = vld [vmem:[#allocation5 + $0x58] sm:$0xff]  ;;  %v3001_v12 = vld [vmem:[#allocation5 + $0x10] sm:$0xff]  ;;  %s4221_s26 = sld [smem:[#allocation39_spill]]  ;;  %s2994_s1 = sshll.u32 %s3808_s24, 1 }
  0x6c   : > { %v3030_v11 = vld [vmem:[#allocation7 + $0x78] sm:$0xff]  ;;  %v3009_v13 = vld [vmem:[#allocation5 + $0x50] sm:$0xff]  ;;  %v774_v14 = vld [vmem:[%s3958_s15] sm:$0xff]  ;;  %vm798_vm0 = vcmp.lt.s32.totalorder %v3988_v17, 1  ;;  %vm1282_vm4 = vcmp.lt.s32.totalorder %v3988_v17, 2  ;;  %vm1766_vm7 = vcmp.lt.s32.totalorder %v3988_v17, 4 }
  0x6d   : > { %956 = vmatpush.bf16.msra.mxu0 %v3005_v2  ;;  %v775_v15 = vld [vmem:[%s3958_s15 + $0x8] sm:$0xff]  ;;  %v777_v16 = vld [vmem:[%s3958_s15 + $0x18] sm:$0xff]  ;;  %1164 = vmatpush.bf16.msra.mxu3 %v3030_v11  ;;  %v3029_v18 = vld [vmem:[#allocation7 + $0x70] sm:$0xff]  ;;  %v794_v21 = vrot.slane %v774_v14, 7  ;;  %s4222_s5 = sld [smem:[#allocation40_spill]] }
  0x6e   : > { %975 = vmatpush.bf16.msra.mxu1 %v3013_v3  ;;  %v3000_v19 = vld [vmem:[#allocation5 + $0x8] sm:$0xff]  ;;  %v795_v22 = vrot.slane %v775_v15, 7  ;;  %v797_v23 = vrot.slane %v777_v16, 7  ;;  %v2999_v25 = vld [vmem:[#allocation5] sm:$0xff]  ;;  %vm2529_vm1 = vmneg %vm798_vm0  ;;  %v820_v31 = vpack.c.bf16 %v775_v15, %v774_v14  ;;  %s4223_s3 = sld [smem:[#allocation41_spill]] }
  0x6f   : > { %v3008_v20 = vld [vmem:[#allocation5 + $0x48] sm:$0xff]  ;;  %v3007_v26 = vld [vmem:[#allocation5 + $0x40] sm:$0xff]  ;;  %vm3998_vm3 = vmpackc.low %vm3683_vm2, %vm2529_vm1 }
  0x70   : > { %v3028_v24 = vld [vmem:[#allocation7 + $0x68] sm:$0xff]  ;;  %v801_v27 = vsel %vm798_vm0, %v794_v21, %v795_v22  ;;  %v802_v28 = vsel %vm798_vm0, %v797_v23, %v794_v21  ;;  %v3027_v29 = vld [vmem:[#allocation7 + $0x60] sm:$0xff]  ;;  %v776_v33 = vld [vmem:[%s3958_s15 + $0x10] sm:$0xff]  ;;  %s772_s15 = scalar_lea.vmem [#allocation19], %s2461_s9 }
  0x71   : > { %957 = vmatpush.bf16.msra.mxu0 %v3004_v4  ;;  %1165 = vmatpush.bf16.msra.mxu3 %v3029_v18  ;;  %v2531_v30 = vpack.c.bf16 %v801_v27, %v802_v28  ;;  %v796_v34 = vrot.slane %v776_v33, 7  ;;  %v822_v38 = vpack.c.bf16 %v777_v16, %v776_v33  ;;  %v3026_v39 = vld [vmem:[#allocation7 + $0x58] sm:$0xff]  ;;  %v3025_v42 = vld [vmem:[#allocation7 + $0x50] sm:$0xff]  ;;  %v3024_v45 = vld [vmem:[#allocation7 + $0x48] sm:$0xff]  ;;  %s2275_s7 = sshll.u32 %s772_s15, 4  ;;  %s2276_s7 = int_to_ptr.vmem [resolvable:$true] %s2275_s7 }
  0x72   : > { %976 = vmatpush.bf16.msra.mxu1 %v3012_v5  ;;  %v3022_v40 = vld [vmem:[#allocation7 + $0x38] sm:$0xff]  ;;  %v3021_v43 = vld [vmem:[#allocation7 + $0x30] sm:$0xff]  ;;  %v3020_v46 = vld [vmem:[#allocation7 + $0x28] sm:$0xff] }
  0x73   : > { %v799_v35 = vsel %vm798_vm0, %v796_v34, %v797_v23  ;;  %v800_v36 = vsel %vm798_vm0, %v795_v22, %v796_v34  ;;  %v3038_v41 = vld [vmem:[#allocation8 + $0x38] sm:$0xff]  ;;  %1145 = vmatpush.bf16.msra.mxu2 %v3022_v40  ;;  %v3037_v44 = vld [vmem:[#allocation8 + $0x30] sm:$0xff]  ;;  %v3036_v47 = vld [vmem:[#allocation8 + $0x28] sm:$0xff] }
  0x74   : > { %v2535_v37 = vpack.c.bf16 %v799_v35, %v800_v36  ;;  %v3023_v48 = vld [vmem:[#allocation7 + $0x40] sm:$0xff]  ;;  %v3018_v51 = vld [vmem:[#allocation7 + $0x18] sm:$0xff]  ;;  %v3017_v53 = vld [vmem:[#allocation7 + $0x10] sm:$0xff]  ;;  %s3602_s19 = scalar_lea.hbm %s4223_s3, 4 }
  0x75   : > { %958 = vmatpush.bf16.msra.mxu0 %v3003_v6  ;;  %1166 = vmatpush.bf16.msra.mxu3 %v3028_v24  ;;  %v3019_v49 = vld [vmem:[#allocation7 + $0x20] sm:$0xff]  ;;  %v3034_v52 = vld [vmem:[#allocation8 + $0x18] sm:$0xff]  ;;  %v3033_v54 = vld [vmem:[#allocation8 + $0x10] sm:$0xff] }
  0x76   : > { %977 = vmatpush.bf16.msra.mxu1 %v3011_v7  ;;  %v3035_v50 = vld [vmem:[#allocation8 + $0x20] sm:$0xff]  ;;  %v3016_v55 = vld [vmem:[#allocation7 + $0x8] sm:$0xff]  ;;  %v3050_v35 = vld [vmem:[#allocation10 + $0x58] sm:$0xff] }
  0x77   : > { %1146 = vmatpush.bf16.msra.mxu2 %v3021_v43  ;;  %v3032_v56 = vld [vmem:[#allocation8 + $0x8] sm:$0xff]  ;;  %v3015_v57 = vld [vmem:[#allocation7] sm:$0xff]  ;;  %v3046_v36 = vld [vmem:[#allocation10 + $0x38] sm:$0xff] }
  0x78   : > { %v3031_v58 = vld [vmem:[#allocation8] sm:$0xff]  ;;  %v3052_v33 = vld [vmem:[#allocation10 + $0x68] sm:$0xff]  ;;  %v3041_v43 = vld [vmem:[#allocation10 + $0x10] sm:$0xff] }
  0x79   : > { %959 = vmatpush.bf16.msra.mxu0 %v3002_v8  ;;  %1167 = vmatpush.bf16.msra.mxu3 %v3027_v29  ;;  %v3269_v61 = vld [vmem:[%s4214_s25] ss:$0 sm:$0xff]  ;;  %v3044_v32 = vld [vmem:[#allocation10 + $0x28] sm:$0xff]  ;;  %vm2705_vm5 = vmneg %vm1282_vm4  ;;  %s2263_s25 = scalar_lea.sflag [#allocation4], %s3954_s18 }
  0x7a   : > { %978 = vmatpush.bf16.msra.mxu1 %v3010_v9  ;;  %v3051_v34 = vld [vmem:[#allocation10 + $0x60] sm:$0xff]  ;;  %vm4040_vm6 = vmpackc.low %vm3683_vm2, %vm2705_vm5  ;;  %v3114_v17 = vld [vmem:[#allocation17 + $0x18] sm:$0xff] }
  0x7b   : > { %1147 = vmatpush.bf16.msra.mxu2 %v3020_v46  ;;  %v3047_v40 = vld [vmem:[#allocation10 + $0x40] sm:$0xff]  ;;  %vm2881_vm8 = vmneg %vm1766_vm7 }
  0x7c   : > { %vm4089_vm9 = vmpackc.low %vm3683_vm2, %vm2881_vm8 }
  0x7d   : > { %960 = vmatpush.bf16.msra.mxu0 %v3001_v12  ;;  %1168 = vmatpush.bf16.msra.mxu3 %v3026_v39  ;;  %v3048_v39 = vld [vmem:[#allocation10 + $0x48] sm:$0xff] }
  0x7e   : > { %979 = vmatpush.bf16.msra.mxu1 %v3009_v13 }
  0x7f   : > { %1148 = vmatpush.bf16.msra.mxu2 %v3019_v49 }
  0x81   : > { %961 = vmatpush.bf16.msra.mxu0 %v3000_v19  ;;  %1169 = vmatpush.bf16.msra.mxu3 %v3025_v42  ;;  %v3042_v42 = vld [vmem:[#allocation10 + $0x18] sm:$0xff] }
  0x82   : > { %980 = vmatpush.bf16.msra.mxu1 %v3008_v20 }
  0x83   : > { %1149 = vmatpush.bf16.msra.mxu2 %v3018_v51 }
  0x85   : > { %962 = vmatpush.bf16.msra.mxu0 %v2999_v25  ;;  %1170 = vmatpush.bf16.msra.mxu3 %v3024_v45  ;;  %v3040_v45 = vld [vmem:[#allocation10 + $0x8] sm:$0xff] }
  0x86   : > { %981 = vmatpush.bf16.msra.mxu1 %v3007_v26 }
  0x87   : > { %1150 = vmatpush.bf16.msra.mxu2 %v3017_v53  ;;  %v3078_v53 = vld [vmem:[#allocation13 + $0x38] sm:$0xff] }
  0x88   : > { %2532 = vmatmul.msk.bf16.vlgmr.msra.gmra.mxu0 %vm3998_vm3, %v2531_v30  ;;  %v3054_v30 = vld [vmem:[#allocation10 + $0x78] sm:$0xff] }
  0x89   : > { %982 = vmatmul.bf16.vlgmr.msra.gmra.mxu1 %v820_v31  ;;  %1251 = vmatpush.bf16.msrb.mxu0 %v3038_v41  ;;  %v3043_v41 = vld [vmem:[#allocation10 + $0x20] sm:$0xff] }
  0x8a   : > { %1171 = vmatpush.bf16.msra.mxu3 %v3023_v48  ;;  %1439 = vmatpush.bf16.msrb.mxu1 %v3046_v36  ;;  %v3039_v48 = vld [vmem:[#allocation10] sm:$0xff] }
  0x8b   : > { %1151 = vmatpush.bf16.msra.mxu2 %v3016_v55 }
  0x8d   : > { %1252 = vmatpush.bf16.msrb.mxu0 %v3037_v44 }
  0x8f   : > { %1152 = vmatpush.bf16.msra.mxu2 %v3015_v57  ;;  %v3077_v57 = vld [vmem:[#allocation13 + $0x30] sm:$0xff] }
  0x91   : > { %1253 = vmatpush.bf16.msrb.mxu0 %v3036_v47  ;;  %v3271_v47 = vld [vmem:[%s4163_s4] ss:$0 sm:$0xff] }
  0x93   : > { %1458 = vmatpush.bf16.msrb.mxu2 %v3054_v30 }
  0x95   : > { %1254 = vmatpush.bf16.msrb.mxu0 %v3035_v50  ;;  %v3270_v50 = vld [vmem:[%s4165_s6] ss:$0 sm:$0xff] }
  0x98   : > { %2536 = vmatmul.msk.bf16.gmra.mxu0 %vm3998_vm3, %v2535_v37  ;;  %v3049_v37 = vld [vmem:[#allocation10 + $0x50] sm:$0xff] }
  0x99   : > { %987 = vmatmul.bf16.gmra.mxu1 %v822_v38  ;;  %1255 = vmatpush.bf16.msrb.mxu0 %v3034_v52 }
  0x9d   : > { %1256 = vmatpush.bf16.msrb.mxu0 %v3033_v54 }
  0xa1   : > { %1257 = vmatpush.bf16.msrb.mxu0 %v3032_v56 }
  0xa5   : > { %1258 = vmatpush.bf16.msrb.mxu0 %v3031_v58 }
  0xa8   : > { %1259 = vmatmul.bf16.vlgmr.msrb.gmra.mxu0 %v820_v31  ;;  %v3053_v31 = vld [vmem:[#allocation10 + $0x70] sm:$0xff] }
  0xa9   : > { %1459 = vmatpush.bf16.msrb.mxu2 %v3053_v31 }
  0xad   : > { %1460 = vmatpush.bf16.msrb.mxu2 %v3052_v33 }
  0xb1   : > { %1461 = vmatpush.bf16.msrb.mxu2 %v3051_v34  ;;  %v3084_v34 = vld [vmem:[#allocation14 + $0x28] sm:$0xff] }
  0xb5   : > { %1462 = vmatpush.bf16.msrb.mxu2 %v3050_v35 }
  0xb8   : > { %1264 = vmatmul.bf16.gmra.mxu0 %v822_v38  ;;  %v3045_v38 = vld [vmem:[#allocation10 + $0x30] sm:$0xff] }
  0xb9   : > { %1463 = vmatpush.bf16.msrb.mxu2 %v3049_v37  ;;  %1440 = vmatpush.bf16.msrb.mxu1 %v3045_v38 }
  0xbd   : > { %1464 = vmatpush.bf16.msrb.mxu2 %v3048_v39  ;;  %1441 = vmatpush.bf16.msrb.mxu1 %v3044_v32  ;;  %v3070_v32 = vld [vmem:[#allocation11 + $0x78] sm:$0xff] }
  0xbe   : > { %1648 = vmatpush.bf16.msra.mxu0 %v3070_v32  ;;  %v3081_v32 = vld [vmem:[#allocation14 + $0x10] sm:$0xff] }
  0xc1   : > { %1465 = vmatpush.bf16.msrb.mxu2 %v3047_v40  ;;  %1442 = vmatpush.bf16.msrb.mxu1 %v3043_v41  ;;  %v3069_v40 = vld [vmem:[#allocation11 + $0x70] sm:$0xff]  ;;  %v3068_v41 = vld [vmem:[#allocation11 + $0x68] sm:$0xff] }
  0xc2   : > { %1649 = vmatpush.bf16.msra.mxu0 %v3069_v40 }
  0xc5   : > { %1443 = vmatpush.bf16.msrb.mxu1 %v3042_v42  ;;  %v3067_v42 = vld [vmem:[#allocation11 + $0x60] sm:$0xff] }
  0xc6   : > { %1650 = vmatpush.bf16.msra.mxu0 %v3068_v41 }
  0xc9   : > { %1444 = vmatpush.bf16.msrb.mxu1 %v3041_v43  ;;  %v3066_v43 = vld [vmem:[#allocation11 + $0x58] sm:$0xff] }
  0xca   : > { %1651 = vmatpush.bf16.msra.mxu0 %v3067_v42  ;;  %v3080_v42 = vld [vmem:[#allocation14 + $0x8] sm:$0xff] }
  0xcd   : > { %1445 = vmatpush.bf16.msrb.mxu1 %v3040_v45  ;;  %v3065_v45 = vld [vmem:[#allocation11 + $0x50] sm:$0xff] }
  0xce   : > { %1652 = vmatpush.bf16.msra.mxu0 %v3066_v43  ;;  %v3274_v43 = vld [vmem:[%s4169_s10] ss:$0 sm:$0xff] }
  0xd1   : > { %1446 = vmatpush.bf16.msrb.mxu1 %v3039_v48  ;;  %v3060_v48 = vld [vmem:[#allocation11 + $0x28] sm:$0xff] }
  0xd2   : > { %1653 = vmatpush.bf16.msra.mxu0 %v3065_v45  ;;  %v3079_v45 = vld [vmem:[#allocation14] sm:$0xff] }
  0xd5   : > { %1735 = vmatpush.bf16.msra.mxu1 %v3078_v53  ;;  %v3056_v53 = vld [vmem:[#allocation11 + $0x8] sm:$0xff] }
  0xd9   : > { %1736 = vmatpush.bf16.msra.mxu1 %v3077_v57  ;;  %v3272_v57 = vld [vmem:[%s4167_s8] ss:$0 sm:$0xff] }
 0x105   : > { %v964_v59 = vpop.f32.mrf.mxu0 }
 0x106   : > { %v983_v60 = vpop.f32.mrf.mxu1  ;;  %v965_v62 = vadd.f32 %v3269_v61, %v964_v59 }
 0x108   : > { %v984_v1 = vadd.f32 %v983_v60, %v965_v62 }
 0x10a   : > { %v993_v4 = vmax.f32 %v984_v1, 0.0 }
 0x10c   : > { %v997_v20 = vrot.slane %v993_v4, 7 }
 0x10d   : > { %v966_v63 = vpop.f32.mrf.mxu0 }
 0x10e   : > { %v985_v0 = vpop.f32.mrf.mxu1  ;;  %v967_v2 = vadd.f32 %v3269_v61, %v966_v63  ;;  %v3076_v63 = vld [vmem:[#allocation13 + $0x28] sm:$0xff] }
 0x10f   : > { %1737 = vmatpush.bf16.msra.mxu1 %v3076_v63 }
 0x110   : > { %v986_v3 = vadd.f32 %v985_v0, %v967_v2 }
 0x112   : > { %v994_v5 = vmax.f32 %v986_v3, 0.0 }
 0x114   : > { %v1010_v6 = vpack.c.bf16 %v994_v5, %v993_v4  ;;  %v998_v16 = vrot.slane %v994_v5, 7  ;;  %v3075_v4 = vld [vmem:[#allocation13 + $0x20] sm:$0xff] }
 0x115   : > { %v969_v7 = vpop.f32.mrf.mxu0  ;;  %1738 = vmatpush.bf16.msra.mxu1 %v3075_v4 }
 0x116   : > { %v988_v8 = vpop.f32.mrf.mxu1  ;;  %1172 = vmatmul.bf16.vlgmr.msra.gmra.mxu3 %v1010_v6  ;;  %v970_v9 = vadd.f32 %v3269_v61, %v969_v7  ;;  %v1003_v23 = vsel %vm798_vm0, %v997_v20, %v998_v16 }
 0x118   : > { %v989_v12 = vadd.f32 %v988_v8, %v970_v9  ;;  %v3074_v9 = vld [vmem:[#allocation13 + $0x18] sm:$0xff] }
 0x119   : > { %1739 = vmatpush.bf16.msra.mxu1 %v3074_v9 }
 0x11a   : > { %v995_v18 = vmax.f32 %v989_v12, 0.0 }
 0x11c   : > { %v999_v26 = vrot.slane %v995_v18, 7 }
 0x11d   : > { %v971_v11 = vpop.f32.mrf.mxu0 }
 0x11e   : > { %v972_v13 = vadd.f32 %v3269_v61, %v971_v11  ;;  %v990_v14 = vpop.f32.mrf.mxu1  ;;  %v1002_v28 = vsel %vm798_vm0, %v998_v16, %v999_v26 }
 0x120   : > { %v991_v15 = vadd.f32 %v990_v14, %v972_v13  ;;  %v3073_v13 = vld [vmem:[#allocation13 + $0x10] sm:$0xff] }
 0x121   : > { %1740 = vmatpush.bf16.msra.mxu1 %v3073_v13 }
 0x122   : > { %v996_v19 = vmax.f32 %v991_v15, 0.0 }
 0x124   : > { %v1000_v21 = vrot.slane %v996_v19, 7  ;;  %v1012_v22 = vpack.c.bf16 %v996_v19, %v995_v18 }
 0x125   : > { %v1260_v44 = vpop.f32.mrf.mxu0 }
 0x126   : > { %1177 = vmatmul.bf16.gmra.mxu3 %v1012_v22  ;;  %v1004_v24 = vsel %vm798_vm0, %v1000_v21, %v997_v20  ;;  %v1001_v27 = vsel %vm798_vm0, %v999_v26, %v1000_v21  ;;  %v1261_v55 = vadd.f32 %v3270_v50, %v1260_v44  ;;  %v3072_v22 = vld [vmem:[#allocation13 + $0x8] sm:$0xff]  ;;  %v3062_v44 = vld [vmem:[#allocation11 + $0x38] sm:$0xff] }
 0x127   : > { %v2603_v25 = vpack.c.bf16 %v1003_v23, %v1004_v24  ;;  %v2607_v29 = vpack.c.bf16 %v1001_v27, %v1002_v28  ;;  %1741 = vmatpush.bf16.msra.mxu1 %v3072_v22  ;;  %v3071_v27 = vld [vmem:[#allocation13] sm:$0xff]  ;;  %1629 = vmatpush.bf16.msrb.mxu3 %v3062_v44 }
 0x129   : > { %2604 = vmatmul.msk.bf16.vlgmr.msra.gmra.mxu2 %vm3998_vm3, %v2603_v25 }
 0x12b   : > { %1742 = vmatpush.bf16.msra.mxu1 %v3071_v27  ;;  %v3093_v27 = vld [vmem:[#allocation14 + $0x70] sm:$0xff] }
 0x12d   : > { %v1262_v52 = vpop.f32.mrf.mxu0 }
 0x12e   : > { %v1263_v61 = vadd.f32 %v3270_v50, %v1262_v52  ;;  %v3057_v52 = vld [vmem:[#allocation11 + $0x10] sm:$0xff] }
 0x135   : > { %v1265_v1 = vpop.f32.mrf.mxu0 }
 0x136   : > { %v1266_v11 = vadd.f32 %v3270_v50, %v1265_v1 }
 0x139   : > { %2608 = vmatmul.msk.bf16.gmra.mxu2 %vm3998_vm3, %v2607_v29 }
 0x13d   : > { %v1267_v14 = vpop.f32.mrf.mxu0 }
 0x13e   : > { %v1268_v19 = vadd.f32 %v3270_v50, %v1267_v14  ;;  %v3059_v50 = vld [vmem:[#allocation11 + $0x20] sm:$0xff] }
 0x199   : > { %v1173_v46 = vpop.f32.mrf.mxu3 }
 0x1a1   : > { %v1175_v54 = vpop.f32.mrf.mxu3 }
 0x1a9   : > { %v1178_v5 = vpop.f32.mrf.mxu3 }
 0x1ac   : > { %v1154_v49 = vpop.f32.mrf.mxu2 }
 0x1ad   : > { %v1155_v51 = vadd.f32 %v3271_v47, %v1154_v49  ;;  %v3063_v49 = vld [vmem:[#allocation11 + $0x40] sm:$0xff] }
 0x1af   : > { %v1174_v56 = vadd.f32 %v1173_v46, %v1155_v51  ;;  %v3061_v46 = vld [vmem:[#allocation11 + $0x30] sm:$0xff]  ;;  %v3058_v51 = vld [vmem:[#allocation11 + $0x18] sm:$0xff] }
 0x1b0   : > { %1630 = vmatpush.bf16.msrb.mxu3 %v3061_v46 }
 0x1b1   : > { %v1270_v60 = vadd.f32 %v1261_v55, %v1174_v56  ;;  %v1180_v18 = vpop.f32.mrf.mxu3  ;;  %v3055_v55 = vld [vmem:[#allocation11] sm:$0xff] }
 0x1b3   : > { %v1274_v2 = vmax.f32 %v1270_v60, 0.0 }
 0x1b4   : > { %v1156_v58 = vpop.f32.mrf.mxu2  ;;  %1631 = vmatpush.bf16.msrb.mxu3 %v3060_v48  ;;  %v3273_v48 = vld [vmem:[%s4217_s13] ss:$0 sm:$0xff]  ;;  %s2273_s13 = scalar_lea.hbm %s4223_s3, %s2994_s1 }
 0x1b5   : > { %v1157_v59 = vadd.f32 %v3271_v47, %v1156_v58  ;;  %v1278_v28 = vrot.slane %v1274_v2, 6 }
 0x1b7   : > { %v1176_v62 = vadd.f32 %v1175_v54, %v1157_v59 }
 0x1b8   : > { %1632 = vmatpush.bf16.msrb.mxu3 %v3059_v50 }
 0x1b9   : > { %v1271_v0 = vadd.f32 %v1263_v61, %v1176_v62 }
 0x1bb   : > { %v1275_v3 = vmax.f32 %v1271_v0, 0.0 }
 0x1bc   : > { %v1159_v6 = vpop.f32.mrf.mxu2  ;;  %1633 = vmatpush.bf16.msrb.mxu3 %v3058_v51 }
 0x1bd   : > { %v1304_v7 = vpack.c.bf16 %v1275_v3, %v1274_v2  ;;  %v1160_v8 = vadd.f32 %v3271_v47, %v1159_v6  ;;  %v1279_v24 = vrot.slane %v1275_v3, 6 }
 0x1bf   : > { %1466 = vmatmul.bf16.vlgmr.msrb.gmra.mxu2 %v1304_v7  ;;  %v1179_v12 = vadd.f32 %v1178_v5, %v1160_v8  ;;  %v1285_v31 = vsel %vm1282_vm4, %v1278_v28, %v1279_v24 }
 0x1c0   : > { %1634 = vmatpush.bf16.msrb.mxu3 %v3057_v52 }
 0x1c1   : > { %v1272_v21 = vadd.f32 %v1266_v11, %v1179_v12 }
 0x1c3   : > { %v1276_v25 = vmax.f32 %v1272_v21, 0.0 }
 0x1c4   : > { %v1161_v15 = vpop.f32.mrf.mxu2  ;;  %1635 = vmatpush.bf16.msrb.mxu3 %v3056_v53 }
 0x1c5   : > { %v1162_v16 = vadd.f32 %v3271_v47, %v1161_v15  ;;  %v1280_v36 = vrot.slane %v1276_v25, 6  ;;  %v3064_v47 = vld [vmem:[#allocation11 + $0x48] sm:$0xff] }
 0x1c6   : > { %1654 = vmatpush.bf16.msra.mxu0 %v3064_v47 }
 0x1c7   : > { %v1181_v20 = vadd.f32 %v1180_v18, %v1162_v16  ;;  %v1284_v38 = vsel %vm1282_vm4, %v1279_v24, %v1280_v36 }
 0x1c8   : > { %1636 = vmatpush.bf16.msrb.mxu3 %v3055_v55 }
 0x1c9   : > { %v1273_v23 = vadd.f32 %v1268_v19, %v1181_v20 }
 0x1ca   : > { %1655 = vmatpush.bf16.msra.mxu0 %v3063_v49 }
 0x1cb   : > { %v1277_v26 = vmax.f32 %v1273_v23, 0.0 }
 0x1cd   : > { %v1281_v29 = vrot.slane %v1277_v26, 6  ;;  %v1306_v30 = vpack.c.bf16 %v1277_v26, %v1276_v25  ;;  %v3094_v26 = vld [vmem:[#allocation14 + $0x78] sm:$0xff] }
 0x1ce   : > { %1942 = vmatpush.bf16.msra.mxu3 %v3094_v26 }
 0x1cf   : > { %1471 = vmatmul.bf16.gmra.mxu2 %v1306_v30  ;;  %v1286_v33 = vsel %vm1282_vm4, %v1281_v29, %v1278_v28  ;;  %v1283_v37 = vsel %vm1282_vm4, %v1280_v36, %v1281_v29  ;;  %v3092_v28 = vld [vmem:[#allocation14 + $0x68] sm:$0xff]  ;;  %v3091_v29 = vld [vmem:[#allocation14 + $0x60] sm:$0xff] }
 0x1d0   : > { %v2707_v35 = vpack.c.bf16 %v1285_v31, %v1286_v33  ;;  %v2711_v39 = vpack.c.bf16 %v1283_v37, %v1284_v38  ;;  %v3086_v31 = vld [vmem:[#allocation14 + $0x38] sm:$0xff]  ;;  %v3089_v33 = vld [vmem:[#allocation14 + $0x50] sm:$0xff]  ;;  %v3088_v36 = vld [vmem:[#allocation14 + $0x48] sm:$0xff] }
 0x1d1   : > { %1923 = vmatpush.bf16.msra.mxu2 %v3086_v31  ;;  %v3087_v37 = vld [vmem:[#allocation14 + $0x40] sm:$0xff]  ;;  %v3106_v31 = vld [vmem:[#allocation16 + $0x58] sm:$0xff] }
 0x1d2   : > { %2708 = vmatmul.msk.bf16.vlgmr.msrb.gmra.mxu1 %vm4040_vm6, %v2707_v35  ;;  %1943 = vmatpush.bf16.msra.mxu3 %v3093_v27  ;;  %v3085_v35 = vld [vmem:[#allocation14 + $0x30] sm:$0xff]  ;;  %v3083_v38 = vld [vmem:[#allocation14 + $0x20] sm:$0xff]  ;;  %v3110_v27 = vld [vmem:[#allocation16 + $0x78] sm:$0xff] }
 0x1d3   : > { %2130 = vmatpush.bf16.msrb.mxu1 %v3110_v27  ;;  %v3276_v27 = vld [vmem:[%s4221_s26] ss:$0 sm:$0xff] }
 0x1d5   : > { %1924 = vmatpush.bf16.msra.mxu2 %v3085_v35  ;;  %v3105_v35 = vld [vmem:[#allocation16 + $0x50] sm:$0xff] }
 0x1d6   : > { %1944 = vmatpush.bf16.msra.mxu3 %v3092_v28  ;;  %v3109_v28 = vld [vmem:[#allocation16 + $0x70] sm:$0xff] }
 0x1d7   : > { %2131 = vmatpush.bf16.msrb.mxu1 %v3109_v28 }
 0x1d9   : > { %1925 = vmatpush.bf16.msra.mxu2 %v3084_v34  ;;  %v3104_v34 = vld [vmem:[#allocation16 + $0x48] sm:$0xff] }
 0x1da   : > { %1945 = vmatpush.bf16.msra.mxu3 %v3091_v29  ;;  %v3108_v29 = vld [vmem:[#allocation16 + $0x68] sm:$0xff] }
 0x1db   : > { %2132 = vmatpush.bf16.msrb.mxu1 %v3108_v29 }
 0x1dd   : > { %1926 = vmatpush.bf16.msra.mxu2 %v3083_v38  ;;  %v3103_v38 = vld [vmem:[#allocation16 + $0x40] sm:$0xff] }
 0x1e2   : > { %2712 = vmatmul.msk.bf16.gmra.mxu1 %vm4040_vm6, %v2711_v39  ;;  %v3082_v39 = vld [vmem:[#allocation14 + $0x18] sm:$0xff] }
 0x1e3   : > { %1927 = vmatpush.bf16.msra.mxu2 %v3082_v39  ;;  %v3099_v39 = vld [vmem:[#allocation16 + $0x20] sm:$0xff] }
 0x1e7   : > { %1928 = vmatpush.bf16.msra.mxu2 %v3081_v32  ;;  %v3098_v32 = vld [vmem:[#allocation16 + $0x18] sm:$0xff] }
 0x1eb   : > { %1929 = vmatpush.bf16.msra.mxu2 %v3080_v42 }
 0x1ef   : > { %1930 = vmatpush.bf16.msra.mxu2 %v3079_v45  ;;  %v3275_v45 = vld [vmem:[%s4220_s11] ss:$0 sm:$0xff]  ;;  %s2277_s11 = sshll.u32 %s2273_s13, 4  ;;  %s2278_s11 = int_to_ptr.hbm [resolvable:$true] %s2277_s11 }
 0x1f0   : > { %s3596_s14 = sshra.s32 %s2278_s11, 4  ;;  %s3597_s14 = int_to_ptr.hbm [resolvable:$true] %s3596_s14 }
 0x1f1   : > { %s3598_s26 = scalar_lea.hbm %s3597_s14, 2  ;;  %p3603_p13 = scmp.lt.s32.totalorder %s3597_s14, %s4223_s3 }
 0x1f2   : > { %1743 = vmatmul.bf16.vlgmr.msra.gmra.mxu1 %v1304_v7  ;;  %p3599_p1 = scmp.ne.s32.totalorder %s3597_s14, %s3598_s26  ;;  %p3604_p7 = scmp.lt.s32.totalorder %s3602_s19, %s3598_s26 }
 0x1f4   : > { %p3600_p3 = pnand %p3599_p1, %p3921_p0  ;;  %p3605_p8 = por %p3604_p7, %p3603_p13 }
 0x1f6   : > { %p3601_p5 = pneg %p3600_p3 }
 0x1f8   : > { %p3606_p9 = pnand %p3605_p8, %p3601_p5 }
 0x202   : > { %1748 = vmatmul.bf16.gmra.mxu1 %v1306_v30  ;;  %v3090_v30 = vld [vmem:[#allocation14 + $0x58] sm:$0xff] }
 0x203   : > { %1946 = vmatpush.bf16.msra.mxu3 %v3090_v30  ;;  %v3107_v30 = vld [vmem:[#allocation16 + $0x60] sm:$0xff] }
 0x204   : > { %2133 = vmatpush.bf16.msrb.mxu1 %v3107_v30 }
 0x207   : > { %1947 = vmatpush.bf16.msra.mxu3 %v3089_v33  ;;  %v3102_v33 = vld [vmem:[#allocation16 + $0x38] sm:$0xff] }
 0x208   : > { %2134 = vmatpush.bf16.msrb.mxu1 %v3106_v31  ;;  %2113 = vmatpush.bf16.msrb.mxu0 %v3102_v33 }
 0x20b   : > { %1948 = vmatpush.bf16.msra.mxu3 %v3088_v36  ;;  %v3101_v36 = vld [vmem:[#allocation16 + $0x30] sm:$0xff] }
 0x20c   : > { %2135 = vmatpush.bf16.msrb.mxu1 %v3105_v35  ;;  %2114 = vmatpush.bf16.msrb.mxu0 %v3101_v36 }
 0x20f   : > { %1949 = vmatpush.bf16.msra.mxu3 %v3087_v37  ;;  %v3100_v37 = vld [vmem:[#allocation16 + $0x28] sm:$0xff] }
 0x210   : > { %2136 = vmatpush.bf16.msrb.mxu1 %v3104_v34  ;;  %2115 = vmatpush.bf16.msrb.mxu0 %v3100_v37 }
 0x214   : > { %2137 = vmatpush.bf16.msrb.mxu1 %v3103_v38  ;;  %2116 = vmatpush.bf16.msrb.mxu0 %v3099_v39 }
 0x218   : > { %2117 = vmatpush.bf16.msrb.mxu0 %v3098_v32 }
 0x242   : > { %v1467_v54 = vpop.f32.mrf.mxu2 }
 0x24a   : > { %v1469_v59 = vpop.f32.mrf.mxu2 }
 0x24f   : > { %v1448_v56 = vpop.f32.mrf.mxu1 }
 0x250   : > { %v1449_v58 = vadd.f32 %v3272_v57, %v1448_v56 }
 0x252   : > { %v1468_v61 = vadd.f32 %v1467_v54, %v1449_v58  ;;  %v1472_v3 = vpop.f32.mrf.mxu2 }
 0x254   : > { %v1477_v0 = vmax.f32 %v1468_v61, 0.0 }
 0x256   : > { %v1481_v15 = vrot.slane %v1477_v0, 6 }
 0x257   : > { %v1450_v60 = vpop.f32.mrf.mxu1 }
 0x258   : > { %v1451_v62 = vadd.f32 %v3272_v57, %v1450_v60 }
 0x25a   : > { %v1470_v63 = vadd.f32 %v1469_v59, %v1451_v62  ;;  %v1474_v9 = vpop.f32.mrf.mxu2 }
 0x25c   : > { %v1478_v1 = vmax.f32 %v1470_v63, 0.0 }
 0x25e   : > { %v1494_v2 = vpack.c.bf16 %v1478_v1, %v1477_v0  ;;  %v1482_v12 = vrot.slane %v1478_v1, 6 }
 0x25f   : > { %v1453_v4 = vpop.f32.mrf.mxu1 }
 0x260   : > { %1656 = vmatmul.bf16.vlgmr.msra.gmra.mxu0 %v1494_v2  ;;  %v1454_v5 = vadd.f32 %v3272_v57, %v1453_v4  ;;  %v1487_v19 = vsel %vm1282_vm4, %v1481_v15, %v1482_v12 }
 0x262   : > { %v1473_v7 = vadd.f32 %v1472_v3, %v1454_v5 }
 0x264   : > { %v1479_v13 = vmax.f32 %v1473_v7, 0.0 }
 0x266   : > { %v1483_v22 = vrot.slane %v1479_v13, 6 }
 0x267   : > { %v1455_v6 = vpop.f32.mrf.mxu1 }
 0x268   : > { %v1456_v8 = vadd.f32 %v3272_v57, %v1455_v6  ;;  %v1486_v24 = vsel %vm1282_vm4, %v1482_v12, %v1483_v22 }
 0x26a   : > { %v1475_v11 = vadd.f32 %v1474_v9, %v1456_v8 }
 0x26c   : > { %v1480_v14 = vmax.f32 %v1475_v11, 0.0 }
 0x26e   : > { %v1484_v16 = vrot.slane %v1480_v14, 6  ;;  %v1496_v18 = vpack.c.bf16 %v1480_v14, %v1479_v13 }
 0x26f   : > { %v1744_v40 = vpop.f32.mrf.mxu1 }
 0x270   : > { %1661 = vmatmul.bf16.gmra.mxu0 %v1496_v18  ;;  %v1488_v20 = vsel %vm1282_vm4, %v1484_v16, %v1481_v15  ;;  %v1485_v23 = vsel %vm1282_vm4, %v1483_v22, %v1484_v16  ;;  %v1745_v52 = vadd.f32 %v3273_v48, %v1744_v40  ;;  %v3097_v40 = vld [vmem:[#allocation16 + $0x10] sm:$0xff] }
 0x271   : > { %v2779_v21 = vpack.c.bf16 %v1487_v19, %v1488_v20  ;;  %v2783_v25 = vpack.c.bf16 %v1485_v23, %v1486_v24  ;;  %2118 = vmatpush.bf16.msrb.mxu0 %v3097_v40 }
 0x273   : > { %2780 = vmatmul.msk.bf16.vlgmr.msrb.gmra.mxu3 %vm4040_vm6, %v2779_v21 }
 0x274   : > { %3119 = vmatpush.bf16.msrb.mxu3 %v3102_v33 }
 0x277   : > { %v1746_v47 = vpop.f32.mrf.mxu1 }
 0x278   : > { %v1747_v54 = vadd.f32 %v3273_v48, %v1746_v47  ;;  %3120 = vmatpush.bf16.msrb.mxu3 %v3101_v36 }
 0x27c   : > { %3121 = vmatpush.bf16.msrb.mxu3 %v3100_v37 }
 0x27f   : > { %v1749_v58 = vpop.f32.mrf.mxu1 }
 0x280   : > { %v1750_v4 = vadd.f32 %v3273_v48, %v1749_v58  ;;  %3122 = vmatpush.bf16.msrb.mxu3 %v3099_v39 }
 0x283   : > { %2784 = vmatmul.msk.bf16.gmra.mxu3 %vm4040_vm6, %v2783_v25 }
 0x284   : > { %3123 = vmatpush.bf16.msrb.mxu3 %v3098_v32 }
 0x287   : > { %v1751_v2 = vpop.f32.mrf.mxu1 }
 0x288   : > { %v1752_v7 = vadd.f32 %v3273_v48, %v1751_v2  ;;  %3124 = vmatpush.bf16.msrb.mxu3 %v3097_v40 }
 0x2dd   : > { %v1657_v41 = vpop.f32.mrf.mxu0 }
 0x2e5   : > { %v1659_v49 = vpop.f32.mrf.mxu0 }
 0x2ed   : > { %v1662_v61 = vpop.f32.mrf.mxu0 }
 0x2f5   : > { %v1664_v6 = vpop.f32.mrf.mxu0 }
 0x2f6   : > { %v1638_v44 = vpop.f32.mrf.mxu3 }
 0x2f7   : > { %v1639_v46 = vadd.f32 %v3274_v43, %v1638_v44 }
 0x2f9   : > { %v1658_v50 = vadd.f32 %v1657_v41, %v1639_v46  ;;  %v3096_v41 = vld [vmem:[#allocation16 + $0x8] sm:$0xff] }
 0x2fa   : > { %3125 = vmatpush.bf16.msrb.mxu3 %v3096_v41  ;;  %2119 = vmatpush.bf16.msrb.mxu0 %v3096_v41 }
 0x2fb   : > { %v1754_v55 = vadd.f32 %v1745_v52, %v1658_v50 }
 0x2fd   : > { %v1758_v59 = vmax.f32 %v1754_v55, 0.0 }
 0x2fe   : > { %v1640_v51 = vpop.f32.mrf.mxu3 }
 0x2ff   : > { %v1641_v53 = vadd.f32 %v3274_v43, %v1640_v51  ;;  %v1762_v15 = vrot.slane %v1758_v59, 4 }
 0x301   : > { %v1660_v56 = vadd.f32 %v1659_v49, %v1641_v53 }
 0x303   : > { %v1755_v57 = vadd.f32 %v1747_v54, %v1660_v56 }
 0x305   : > { %v4073_v60 = vmax.f32 %v1755_v57, 0.0 }
 0x306   : > { %v1643_v62 = vpop.f32.mrf.mxu3 }
 0x307   : > { %v1788_v63 = vpack.c.bf16 %v4073_v60, %v1758_v59  ;;  %v1644_v0 = vadd.f32 %v3274_v43, %v1643_v62  ;;  %v1763_v12 = vrot.slane %v4073_v60, 4 }
 0x309   : > { %1950 = vmatmul.bf16.vlgmr.msra.gmra.mxu3 %v1788_v63  ;;  %v1663_v1 = vadd.f32 %v1662_v61, %v1644_v0  ;;  %v1769_v19 = vsel %vm1766_vm7, %v1762_v15, %v1763_v12 }
 0x30b   : > { %v1756_v9 = vadd.f32 %v1750_v4, %v1663_v1 }
 0x30d   : > { %v1760_v14 = vmax.f32 %v1756_v9, 0.0 }
 0x30e   : > { %v1645_v3 = vpop.f32.mrf.mxu3 }
 0x30f   : > { %v1646_v5 = vadd.f32 %v3274_v43, %v1645_v3  ;;  %v1764_v23 = vrot.slane %v1760_v14, 4  ;;  %v3095_v43 = vld [vmem:[#allocation16] sm:$0xff] }
 0x310   : > { %3126 = vmatpush.bf16.msrb.mxu3 %v3095_v43  ;;  %2120 = vmatpush.bf16.msrb.mxu0 %v3095_v43 }
 0x311   : > { %v1665_v8 = vadd.f32 %v1664_v6, %v1646_v5  ;;  %v1768_v25 = vsel %vm1766_vm7, %v1763_v12, %v1764_v23 }
 0x313   : > { %v1757_v11 = vadd.f32 %v1752_v7, %v1665_v8 }
 0x315   : > { %v4077_v13 = vmax.f32 %v1757_v11, 0.0 }
 0x317   : > { %v1765_v16 = vrot.slane %v4077_v13, 4  ;;  %v1790_v18 = vpack.c.bf16 %v4077_v13, %v1760_v14 }
 0x319   : > { %1955 = vmatmul.bf16.gmra.mxu3 %v1790_v18  ;;  %v1770_v20 = vsel %vm1766_vm7, %v1765_v16, %v1762_v15  ;;  %v1767_v24 = vsel %vm1766_vm7, %v1764_v23, %v1765_v16  ;;  %v3118_v15 = vld [vmem:[#allocation17 + $0x38] sm:$0xff]  ;;  %v3117_v16 = vld [vmem:[#allocation17 + $0x30] sm:$0xff]  ;;  %v3116_v18 = vld [vmem:[#allocation17 + $0x28] sm:$0xff] }
 0x31a   : > { %v2883_v22 = vpack.c.bf16 %v1769_v19, %v1770_v20  ;;  %v2887_v26 = vpack.c.bf16 %v1767_v24, %v1768_v25  ;;  %2231 = vmatpush.bf16.msrb.mxu2 %v3118_v15  ;;  %v3115_v19 = vld [vmem:[#allocation17 + $0x20] sm:$0xff]  ;;  %v3112_v24 = vld [vmem:[#allocation17 + $0x8] sm:$0xff] }
 0x31b   : > { %v3111_v25 = vld [vmem:[#allocation17] sm:$0xff] }
 0x31c   : > { %2884 = vmatmul.msk.bf16.vlgmr.msra.gmra.mxu2 %vm4089_vm9, %v2883_v22  ;;  %v3113_v22 = vld [vmem:[#allocation17 + $0x10] sm:$0xff] }
 0x31e   : > { %2232 = vmatpush.bf16.msrb.mxu2 %v3117_v16 }
 0x322   : > { %2233 = vmatpush.bf16.msrb.mxu2 %v3116_v18 }
 0x326   : > { %2234 = vmatpush.bf16.msrb.mxu2 %v3115_v19 }
 0x32a   : > { %2235 = vmatpush.bf16.msrb.mxu2 %v3114_v17 }
 0x32c   : > { %2888 = vmatmul.msk.bf16.gmra.mxu2 %vm4089_vm9, %v2887_v26 }
 0x32e   : > { %2236 = vmatpush.bf16.msrb.mxu2 %v3113_v22 }
 0x332   : > { %2237 = vmatpush.bf16.msrb.mxu2 %v3112_v24 }
 0x336   : > { %2238 = vmatpush.bf16.msrb.mxu2 %v3111_v25 }
 0x38c   : > { %v1951_v42 = vpop.f32.mrf.mxu3 }
 0x394   : > { %v1953_v47 = vpop.f32.mrf.mxu3 }
 0x39c   : > { %v1956_v55 = vpop.f32.mrf.mxu3 }
 0x39f   : > { %v1932_v44 = vpop.f32.mrf.mxu2 }
 0x3a0   : > { %v1933_v46 = vadd.f32 %v3275_v45, %v1932_v44 }
 0x3a2   : > { %v1952_v49 = vadd.f32 %v1951_v42, %v1933_v46 }
 0x3a4   : > { %v1961_v52 = vmax.f32 %v1952_v49, 0.0  ;;  %v1958_v63 = vpop.f32.mrf.mxu3 }
 0x3a6   : > { %v1965_v4 = vrot.slane %v1961_v52, 4 }
 0x3a7   : > { %v1934_v48 = vpop.f32.mrf.mxu2 }
 0x3a8   : > { %v1935_v50 = vadd.f32 %v3275_v45, %v1934_v48  ;;  %v3277_v48 = vld [vmem:[%s4222_s5] ss:$0 sm:$0xff] }
 0x3aa   : > { %v1954_v51 = vadd.f32 %v1953_v47, %v1935_v50 }
 0x3ac   : > { %v1962_v53 = vmax.f32 %v1954_v51, 0.0 }
 0x3ae   : > { %v1978_v54 = vpack.c.bf16 %v1962_v53, %v1961_v52  ;;  %v1966_v1 = vrot.slane %v1962_v53, 4 }
 0x3af   : > { %v1937_v56 = vpop.f32.mrf.mxu2 }
 0x3b0   : > { %v1938_v57 = vadd.f32 %v3275_v45, %v1937_v56  ;;  %2138 = vmatmul.bf16.vlgmr.msrb.gmra.mxu1 %v1978_v54  ;;  %v1971_v7 = vsel %vm1766_vm7, %v1965_v4, %v1966_v1 }
 0x3b2   : > { %v1957_v58 = vadd.f32 %v1956_v55, %v1938_v57 }
 0x3b4   : > { %v1963_v61 = vmax.f32 %v1957_v58, 0.0 }
 0x3b6   : > { %v1967_v2 = vrot.slane %v1963_v61, 4 }
 0x3b7   : > { %v1939_v59 = vpop.f32.mrf.mxu2 }
 0x3b8   : > { %v1940_v62 = vadd.f32 %v3275_v45, %v1939_v59  ;;  %v1970_v8 = vsel %vm1766_vm7, %v1966_v1, %v1967_v2 }
 0x3ba   : > { %v1959_v0 = vadd.f32 %v1958_v63, %v1940_v62 }
 0x3bc   : > { %v1964_v3 = vmax.f32 %v1959_v0, 0.0 }
 0x3be   : > { %v1968_v5 = vrot.slane %v1964_v3, 4  ;;  %v1980_v6 = vpack.c.bf16 %v1964_v3, %v1963_v61 }
 0x3c0   : > { %v1969_v9 = vsel %vm1766_vm7, %v1967_v2, %v1968_v5  ;;  %v1972_v11 = vsel %vm1766_vm7, %v1968_v5, %v1965_v4  ;;  %2142 = vmatmul.bf16.gmra.mxu1 %v1980_v6 }
 0x3c1   : > { %v2955_v12 = vpack.c.bf16 %v1971_v7, %v1972_v11  ;;  %v2959_v14 = vpack.c.bf16 %v1969_v9, %v1970_v8 }
 0x3c3   : > { %2956 = vmatmul.msk.bf16.vlgmr.msrb.gmra.mxu0 %vm4089_vm9, %v2955_v12  ;;  %2960 = vmatmul.msk.bf16.vlgmr.msrb.gmra.mxu3 %vm4089_vm9, %v2959_v14 }
 0x42d   : > { %v2139_v20 = vpop.f32.mrf.mxu1 }
 0x435   : > { %v2140_v23 = vpop.f32.mrf.mxu1 }
 0x43d   : > { %v2143_v26 = vpop.f32.mrf.mxu1 }
 0x440   : > { %v2122_v21 = vpop.f32.mrf.mxu0 }
 0x445   : > { %v2144_v37 = vpop.f32.mrf.mxu1 }
 0x446   : > { %v2126_v28 = vpop.f32.mrf.mxu3 }
 0x448   : > { %v2123_v29 = vpop.f32.mrf.mxu0 }
 0x449   : > { %v2124_v30 = vadd.f32 %v3276_v27, %v2123_v29 }
 0x44b   : > { %v2141_v31 = vadd.f32 %v2140_v23, %v2124_v30 }
 0x44d   : > { %v2147_v33 = vadd.f32 %v2141_v31, %v4073_v60  ;;  %v2245_v60 = vand.u32 127, %v778_v10 }
 0x44e   : > { %v2127_v35 = vpop.f32.mrf.mxu3 }
 0x44f   : > { %v2149_v36 = vmax.f32 %v2147_v33, 0.0  ;;  %v2128_v34 = vadd.f32 %v3276_v27, %v2127_v35  ;;  %vm2246_vm11 = vcmp.lt.s32.totalorder %v2245_v60, 10 }
 0x451   : > { %v2145_v38 = vadd.f32 %v2144_v37, %v2128_v34  ;;  %v2151_v39 = vpack.c.bf16 %v2149_v36, %v2149_v36 }
 0x453   : > { %v2148_v32 = vadd.f32 %v2145_v38, %v4077_v13  ;;  %v2175_v41 = vunpack.c.l.b16 %v2151_v39 }
 0x455   : > { %v2150_v40 = vmax.f32 %v2148_v32, 0.0  ;;  %v2177_v44 = vrot.slane %v2175_v41, 7 }
 0x457   : > { %v2152_v42 = vpack.c.bf16 %v2150_v40, %v2150_v40 }
 0x459   : > { %v2176_v43 = vunpack.c.l.b16 %v2152_v42 }
 0x45b   : > { %v2178_v45 = vrot.slane %v2176_v43, 6 }
 0x45d   : > { %v2180_v46 = vsel %vm2179_vm10, %v2178_v45, %v2177_v44 }
 0x45e   : > { %v2181_v47 = vpack.c.b16 %v2180_v46, %v2180_v46 }
 0x460   : > { %2239 = vmatmul.bf16.vlgmr.msrb.gmra.mxu2 %v2181_v47 }
 0x4e3   : > { %v2240_v49 = vpop.f32.mrf.mxu2 }
 0x4e4   : > { %v2241_v13 = vadd.f32 %v3277_v48, %v2240_v49 }
 0x4e6   : > { %v2247_v50 = vsel %vm2246_vm11, %v2241_v13, -1e+30 }
 0x4e7   : > { %v2249_v51 = vsel %vm2248_vm12, %v2247_v50, -inf }
 0x4e8   : > { %2250 = vmax.xlane.f32.xlu0 %v2249_v51 }
 0x4eb   : > { %v2242_v52 = vpop.f32.mrf.mxu2 }
 0x55b   : > { %v2251_v53 = vpop.xlane.xlu0 %2250 }
 0x55c   : > { %v2252_v54 = vsub.f32 %v2247_v50, %v2251_v53 }
 0x55e   : > { %v2253_v55 = vmul.f32 1.442695, %v2252_v54 }
 0x560   : > { %3278 = vpow2.f32 %v2253_v55 }
 0x566   : > { %v3279_v56 = vpop.eup %3278 }
 0x567   : > { %v2255_v10 = vsel %vm2248_vm12, %v3279_v56, 0.0 }
 0x568   : > { %2256 = vadd.xlane.f32.xlu0 %v2255_v10 }
 0x5db   : > { %v2257_v57 = vpop.xlane.xlu0 %2256 }
 0x5dc   : > { %3280 = vlog2.f32 %v2257_v57 }
 0x5e2   : > { %v3281_v58 = vpop.eup %3280 }
 0x5e3   : > { %v2259_v59 = vmul.f32 0.6931472, %v3281_v58 }
 0x5e5   : > { %v2260_v61 = vsub.f32 %v2252_v54, %v2259_v59 }
 0x5e7   : > { %2261 = vst [vmem:[%s772_s15] sm:$0x3] %v2260_v61 }
 0x5e8   : > { %3609 = shalt.err (!%p3606_p9)
}
 0x5e9   : > { %3165 = dma.vmem_to_hbm [thread:$0]  (%p3921_p0), %s2276_s7, 32, %s2278_s11, %s2263_s25  }
 0x5ea PF: > { %s2289_s18 = sand.u32 1, %s3656_s0   ;;  %p4224_p10 = scmp.ge.s32.totalorder %s3668_s21, 2 }
 0x5eb   : > { %s2290_s1 = scalar_lea.sflag [#allocation4], %s2289_s18 }
 0x5ec   : > { %p3200_p11 = pnand %p4224_p10, %p3927_p6 }
 0x5ee   : > { %p3201_p12 = pneg %p3200_p11 }
 0x5f0   : > { %3651 = dma.done.wait (%p3201_p12), %s2290_s1, 32  }
 0x5f1   : > { %3653 = vsyncadd (%p3201_p12), %s2290_s1, 4294967264  ;;  %p37_p2 = scmp.ge.s32.totalorder %s3897_s23, 4   ;;  %s4225_s0 = smov %s3660_s30 }
 0x5f2   : > { %s4226_s30 = smov %s3664_s20  ;;  %s4227_s20 = smov %s3909_s29 }
 0x5f3   : > { %s4228_s21 = smov %s3897_s23  ;;  %39 = sbr.rel (!%p37_p2) target bundleno = 26 (0x1a), region = 177 }
 0x5f8   :  { %2296 = vsyncpa [#allocation3], 1 }
 0x5f9   :  { %2298 = vsyncpa [#allocation3 + $0x1], 1 }
 0x5fa   :  { %2299 = vsyncpa [#allocation6], 1 }
 0x5fb   :  { %2300 = vsyncpa [#allocation9], 1 }
 0x5fc   :  { %2301 = vsyncpa [#allocation12], 1 }
 0x5fd   :  { %2302 = vsyncpa [#allocation15], 1 }
 0x5fe   :  { %2303 = vsyncpa [#allocation18], 1 }
 0x5ff   :  { %2304 = vsyncpa [#allocation4], 1 }
 0x600   :  { %2306 = vsyncpa [#allocation4 + $0x1], 1 }

// kernel: tpu_custom_call.1
= control target key start
LH: loop header
LB: loop body
LE: loop exit
PB: predicated region body
PF: predicated region fallthrough
CT: control target
= control target key end

     0   :  { %s4159_s0 = inlined_call_operand.hbm [shape: f32[4,16,128], index: 0, kind: input, shape index: {}]   ;;  %s4160_s1 = inlined_call_operand.hbm [shape: bf16[256,128], index: 1, kind: input, shape index: {}]   ;;  %s4161_s2 = inlined_call_operand.vmem [shape: f32[1,128], index: 2, kind: input, shape index: {}]   ;;  %s4162_s3 = inlined_call_operand.hbm [shape: bf16[256,128], index: 3, kind: input, shape index: {}]   ;;  %s4163_s4 = inlined_call_operand.vmem [shape: f32[1,128], index: 4, kind: input, shape index: {}]   ;;  %s4164_s5 = inlined_call_operand.hbm [shape: bf16[128,128], index: 5, kind: input, shape index: {}]   ;;  %s4165_s6 = inlined_call_operand.vmem [shape: f32[1,128], index: 6, kind: input, shape index: {}]   ;;  %s4166_s7 = inlined_call_operand.hbm [shape: bf16[256,128], index: 7, kind: input, shape index: {}]   ;;  %s4167_s8 = inlined_call_operand.vmem [shape: f32[1,128], index: 8, kind: input, shape index: {}]   ;;  %s4168_s9 = inlined_call_operand.hbm [shape: bf16[256,128], index: 9, kind: input, shape index: {}]   ;;  %s4169_s10 = inlined_call_operand.vmem [shape: f32[1,128], index: 10, kind: input, shape index: {}]   ;;  %s4170_s11 = inlined_call_operand.hbm [shape: bf16[128,128], index: 11, kind: input, shape index: {}]   ;;  %s4171_s12 = inlined_call_operand.vmem [shape: f32[1,128], index: 12, kind: input, shape index: {}]   ;;  %s4172_s13 = inlined_call_operand.hbm [shape: bf16[256,128], index: 13, kind: input, shape index: {}]   ;;  %s4173_s14 = inlined_call_operand.vmem [shape: f32[1,128], index: 14, kind: input, shape index: {}]   ;;  %s4174_s15 = inlined_call_operand.hbm [shape: bf16[256,128], index: 15, kind: input, shape index: {}]   ;;  %s4175_s16 = inlined_call_operand.vmem [shape: f32[1,128], index: 16, kind: input, shape index: {}]   ;;  %s4176_s17 = inlined_call_operand.hbm [shape: bf16[128,128], index: 17, kind: input, shape index: {}]   ;;  %s4177_s18 = inlined_call_operand.vmem [shape: f32[1,128], index: 18, kind: input, shape index: {}]   ;;  %s4178_s19 = inlined_call_operand.hbm [shape: f32[2,2,128], index: 19, kind: output, shape index: {}]  }
   0x1   :  { %4181 = sst [smem:[#allocation27_spill]] %s4159_s0 }
   0x2   :  { %4182 = sst [smem:[#allocation28_spill]] %s4160_s1 }
   0x3   :  { %4183 = sst [smem:[#allocation29_spill]] %s4161_s2 }
   0x4   :  { %4184 = sst [smem:[#allocation30_spill]] %s4162_s3 }
   0x5   :  { %4185 = sst [smem:[#allocation31_spill]] %s4164_s5 }
   0x6   :  { %4186 = sst [smem:[#allocation32_spill]] %s4166_s7 }
   0x7   :  { %4187 = sst [smem:[#allocation33_spill]] %s4168_s9 }
   0x8   :  { %4188 = sst [smem:[#allocation34_spill]] %s4170_s11 }
   0x9   :  { %4189 = sst [smem:[#allocation35_spill]] %s4171_s12 }
   0xa   :  { %4190 = sst [smem:[#allocation36_spill]] %s4172_s13 }
   0xb   :  { %4191 = sst [smem:[#allocation37_spill]] %s4173_s14 }
   0xc   :  { %4192 = sst [smem:[#allocation38_spill]] %s4174_s15 }
   0xd   :  { %4193 = sst [smem:[#allocation39_spill]] %s4175_s16 }
   0xe   :  { %4194 = sst [smem:[#allocation40_spill]] %s4177_s18 }
   0xf   :  { %4195 = sst [smem:[#allocation41_spill]] %s4178_s19 }
  0x10   :  { %24 = vsyncpa [#allocation3], 0 }
  0x11   :  { %26 = vsyncpa [#allocation3 + $0x1], 0 }
  0x12   :  { %27 = vsyncpa [#allocation6], 0 }
  0x13   :  { %28 = vsyncpa [#allocation9], 0 }
  0x14   :  { %29 = vsyncpa [#allocation12], 0 }
  0x15   :  { %30 = vsyncpa [#allocation15], 0 }
  0x16   :  { %31 = vsyncpa [#allocation18], 0 }
  0x17   :  { %32 = vsyncpa [#allocation4], 0 }
  0x18   :  { %34 = vsyncpa [#allocation4 + $0x1], 0  ;;  %s3784_s0 = smov 0   ;;  %s3786_s30 = smov 0  }
  0x19   :  { %s3788_s20 = smov 0   ;;  %s3790_s21 = smov 0  }
  0x1a LB: > { %s4196_s2 = sld [smem:[#allocation28_spill]]  ;;  %s3808_s24 = sadd.s32 4294967295, %s3668_s21   ;;  %s3668_s21 = sphi %s3790_s21, %s4228_s21   ;;  %s3664_s20 = sphi %s3788_s20, %s4227_s20   ;;  %s3660_s30 = sphi %s3786_s30, %s4226_s30   ;;  %s3656_s0 = sphi %s3784_s0, %s4225_s0  }
  0x1b   : > { %p2435_p0 = scmp.ge.s32.totalorder %s3668_s21, 1  ;;  %p61_p1 = scmp.eq.s32.totalorder %s3808_s24, 0 }
  0x1c   : > { %p475_p2 = scmp.lt.s32.totalorder %s3668_s21, 3  ;;  %s3670_s3 = smov [#allocation5]  }
  0x1d   : > { %s488_s26 = sshll.u32 %s3670_s3, 4  ;;  %s4198_s5 = sld [smem:[#allocation31_spill]]  ;;  %s489_s26 = int_to_ptr.vmem [resolvable:$true] %s488_s26 }
  0x1e   : > { %p3813_p3 = pnand %p2435_p0, %p475_p2  ;;  %s4200_s9 = sld [smem:[#allocation33_spill]] }
  0x1f   : > { %s3671_s19 = smov [#allocation8]   ;;  %s3672_s16 = smov 64  }
  0x20   : > { %s486_s23 = sshll.u32 %s4196_s2, 4  ;;  %p3167_p4 = pneg %p3813_p3  ;;  %s487_s23 = int_to_ptr.hbm [resolvable:$true] %s486_s23 }
  0x21   : > { %s522_s18 = sshll.u32 %s3671_s19, 4  ;;  %s3673_s14 = smov 4   ;;  %s523_s18 = int_to_ptr.vmem [resolvable:$true] %s522_s18 }
  0x22   : > { %p3825_p6 = pnand %p3167_p4, %p61_p1  ;;  %s4201_s13 = sld [smem:[#allocation36_spill]] }
  0x23   : > { %s520_s29 = sshll.u32 %s4198_s5, 4  ;;  %s3674_s19 = smov [#allocation11]   ;;  %s521_s29 = int_to_ptr.hbm [resolvable:$true] %s520_s29 }
  0x24   : > { %s554_s3 = sshll.u32 %s4200_s9, 4  ;;  %s556_s2 = sshll.u32 %s3674_s19, 4  ;;  %s555_s3 = int_to_ptr.hbm [resolvable:$true] %s554_s3  ;;  %s557_s2 = int_to_ptr.vmem [resolvable:$true] %s556_s2 }
  0x25   : > { %3170 = dma.hbm_to_vmem [thread:$0]  (!%p3825_p6), %s487_s23, 2048, %s489_s26, [#allocation6], %s3672_s16, %s3672_s16, %s3673_s14  }
  0x26   : > { %3176 = dma.hbm_to_vmem [thread:$0]  (!%p3825_p6), %s521_s29, 1024, %s523_s18, [#allocation9], %s3672_s16, %s3672_s16, %s3673_s14  }
  0x27   : > { %3182 = dma.hbm_to_vmem [thread:$0]  (!%p3825_p6), %s555_s3, 2048, %s557_s2, [#allocation12], %s3672_s16, %s3672_s16, %s3673_s14  }
  0x28   : > { %s588_s22 = sshll.u32 %s4201_s13, 4  ;;  %s3675_s23 = smov [#allocation14]   ;;  %s589_s22 = int_to_ptr.hbm [resolvable:$true] %s588_s22 }
  0x29   : > { %s590_s26 = sshll.u32 %s3675_s23, 4  ;;  %s4202_s12 = sld [smem:[#allocation30_spill]]  ;;  %s591_s26 = int_to_ptr.vmem [resolvable:$true] %s590_s26 }
  0x2a   : > { %3188 = dma.hbm_to_vmem [thread:$0]  (!%p3825_p6), %s589_s22, 2048, %s591_s26, [#allocation15], %s3672_s16, %s3672_s16, %s3673_s14  }
  0x2b   : > { %s4203_s7 = sld [smem:[#allocation32_spill]]  ;;  %s3676_s19 = smov [#allocation7]  }
  0x2c   : > { %s505_s3 = sshll.u32 %s3676_s19, 4  ;;  %s3677_s5 = smov [#allocation10]   ;;  %s506_s3 = int_to_ptr.vmem [resolvable:$true] %s505_s3 }
  0x2d   : > { %s539_s9 = sshll.u32 %s3677_s5, 4  ;;  %s4204_s11 = sld [smem:[#allocation34_spill]]  ;;  %s540_s9 = int_to_ptr.vmem [resolvable:$true] %s539_s9 }
  0x2e   : > { %s4205_s15 = sld [smem:[#allocation38_spill]]  ;;  %s3897_s23 = sadd.s32 1, %s3668_s21  }
  0x2f   : > { %s503_s18 = sshll.u32 %s4202_s12, 4  ;;  %s3680_s12 = smov [#allocation17]   ;;  %s504_s18 = int_to_ptr.hbm [resolvable:$true] %s503_s18 }
  0x30   : > { %3173 = dma.hbm_to_vmem [thread:$0]  (!%p3825_p6), %s504_s18, 2048, %s506_s3, [#allocation6], %s3672_s16, %s3672_s16, %s3673_s14  }
  0x31   : > { %s537_s28 = sshll.u32 %s4203_s7, 4  ;;  %s3678_s18 = smov [#allocation13]   ;;  %s538_s28 = int_to_ptr.hbm [resolvable:$true] %s537_s28 }
  0x32   : > { %3179 = dma.hbm_to_vmem [thread:$0]  (!%p3825_p6), %s538_s28, 2048, %s540_s9, [#allocation9], %s3672_s16, %s3672_s16, %s3673_s14  }
  0x33   : > { %s571_s22 = sshll.u32 %s4204_s11, 4  ;;  %s573_s27 = sshll.u32 %s3678_s18, 4  ;;  %s572_s22 = int_to_ptr.hbm [resolvable:$true] %s571_s22  ;;  %s574_s27 = int_to_ptr.vmem [resolvable:$true] %s573_s27 }
  0x34   : > { %s605_s29 = sshll.u32 %s4205_s15, 4  ;;  %s3679_s28 = smov [#allocation16]   ;;  %s606_s29 = int_to_ptr.hbm [resolvable:$true] %s605_s29 }
  0x35   : > { %3185 = dma.hbm_to_vmem [thread:$0]  (!%p3825_p6), %s572_s22, 1024, %s574_s27, [#allocation12], %s3672_s16, %s3672_s16, %s3673_s14  }
  0x36   : > { %s607_s19 = sshll.u32 %s3679_s28, 4  ;;  %s622_s9 = sshll.u32 %s4176_s17, 4  ;;  %s608_s19 = int_to_ptr.vmem [resolvable:$true] %s607_s19  ;;  %s623_s9 = int_to_ptr.hbm [resolvable:$true] %s622_s9 }
  0x37   : > { %3191 = dma.hbm_to_vmem [thread:$0]  (!%p3825_p6), %s606_s29, 2048, %s608_s19, [#allocation15], %s3672_s16, %s3672_s16, %s3673_s14  }
  0x38   : > { %s624_s2 = sshll.u32 %s3680_s12, 4  ;;  %s2434_s22 = sadd.s32 4294967294, %s3668_s21   ;;  %s625_s2 = int_to_ptr.vmem [resolvable:$true] %s624_s2 }
  0x39   : > { %3194 = dma.hbm_to_vmem [thread:$0]  (!%p3825_p6), %s623_s9, 1024, %s625_s2, [#allocation18], %s3672_s16, %s3672_s16, %s3673_s14  }
  0x3a   : > { %s47_s26 = sadd.s32 1, %s3664_s20  ;;  %s44_s18 = ssub.s32 %s3668_s21, %s3897_s23 }
  0x3b   : > { %p54_p7 = scmp.ne.s32.totalorder %s3664_s20, %s3660_s30  ;;  %p45_p8 = scmp.eq.s32.totalorder %s44_s18, 0 }
  0x3c   : > { %p55_p9 = scmp.eq.s32.totalorder %s3668_s21, 0  ;;  %p60_p10 = scmp.ne.s32.totalorder %s3660_s30, %s3656_s0 }
  0x3d   : > { %p462_p11 = scmp.eq.s32.totalorder %s3808_s24, 1  ;;  %p468_p2 = scmp.eq.s32.totalorder %s2434_s22, 1 }
  0x3e   : > { %s3909_s29 = scalar_select %p45_p8, %s3664_s20, %s47_s26  }
  0x3f   : > { %p3911_p12 = por %p55_p9, %p54_p7  ;;  %p3917_p13 = por %p61_p1, %p60_p10 }
  0x40   : > { %p3921_p0 = por %p462_p11, %p54_p7  ;;  %p3212_p4 = scmp.lt.s32.totalorder %s3668_s21, 2 }
  0x41   : > { %s641_s27 = sand.u32 1, %s3664_s20   ;;  %p3927_p6 = por %p468_p2, %p60_p10 }
  0x42   : > { %s2446_s19 = sshll.u32 %s641_s27, 5  ;;  %s2998_s3 = sshll.u32 %s3668_s21, 5 }
  0x43   : > { %s4210_s12 = sld [smem:[#allocation27_spill]]  ;;  %s645_s18 = scalar_lea.vmem [#allocation2], %s2446_s19 }
  0x44   : > { %s654_s7 = sshll.u32 %s645_s18, 4  ;;  %p3937_p7 = pnand %p3212_p4, %p3911_p12  ;;  %s655_s7 = int_to_ptr.vmem [resolvable:$true] %s654_s7 }
  0x45   : > { %s642_s11 = scalar_lea.sflag [#allocation3], %s641_s27 }
  0x46   : > { %p3556_p9 = pneg %p3937_p7 }
  0x49   : > { %s651_s2 = scalar_lea.hbm %s4210_s12, %s2998_s3  ;;  %s3559_s5 = scalar_lea.hbm %s4210_s12, 64 }
  0x4a   : > { %s652_s26 = sshll.u32 %s651_s2, 4  ;;  %s653_s26 = int_to_ptr.hbm [resolvable:$true] %s652_s26 }
  0x4b   : > { %s3552_s13 = sshra.s32 %s653_s26, 4  ;;  %s3553_s13 = int_to_ptr.hbm [resolvable:$true] %s3552_s13 }
  0x4c   : > { %s3554_s15 = scalar_lea.hbm %s3553_s13, 32  ;;  %p3560_p12 = scmp.lt.s32.totalorder %s3553_s13, %s4210_s12 }
  0x4d   : > { %p3555_p8 = scmp.ne.s32.totalorder %s3553_s13, %s3554_s15  ;;  %p3561_p2 = scmp.lt.s32.totalorder %s3559_s5, %s3554_s15 }
  0x4f   : > { %p3557_p10 = pnand %p3556_p9, %p3555_p8  ;;  %p3562_p4 = por %p3561_p2, %p3560_p12 }
  0x51   : > { %p3558_p11 = pneg %p3557_p10 }
  0x53   : > { %p3563_p5 = pnand %p3562_p4, %p3558_p11 }
  0x55   : > { %3566 = shalt.err (!%p3563_p5)
}
  0x56   : > { %s3681_s27 = smov 128   ;;  %s3682_s2 = smov 8  }
  0x57   : > { %3198 = dma.hbm_to_vmem [thread:$0]  (!%p3937_p7), %s653_s26, 512, %s655_s7, %s642_s11, %s3681_s27, %s3681_s27, %s3682_s2  }
  0x58   : > { %666 = sbr.rel (%p3813_p3) target bundleno = 1514 (0x5ea), region = 96  ;;  %s3954_s18 = sand.u32 (!%p3813_p3), 1, %s3660_s30  }
  0x59   : > { %s2451_s3 = sshll.u32 (!%p3813_p3), %s3954_s18, 5  ;;  %s669_s13 = scalar_lea.sflag (!%p3813_p3), [#allocation3], %s3954_s18 }
  0x5a   : > { %s3958_s15 = scalar_lea.vmem (!%p3813_p3), [#allocation2], %s2451_s3 }
  0x5d   : > { %3627 = dma.done.wait (%p3917_p13), %s669_s13, 512  }
  0x5e   : > { %3629 = vsyncadd (%p3917_p13), %s669_s13, 4294966784 }
  0x5f   : > { %3631 = dma.done.wait (%p61_p1), [#allocation6], 4096  }
  0x60   : > { %3633 = vsyncadd (%p61_p1), [#allocation6], 4294963200 }
  0x61   : > { %3635 = dma.done.wait (%p61_p1), [#allocation9], 3072  }
  0x62   : > { %3637 = vsyncadd (%p61_p1), [#allocation9], 4294964224 }
  0x63   : > { %3639 = dma.done.wait (%p61_p1), [#allocation12], 3072  }
  0x64   : > { %3641 = vsyncadd (%p61_p1), [#allocation12], 4294964224 }
  0x65   : > { %3643 = dma.done.wait (%p61_p1), [#allocation15], 4096  }
  0x66   : > { %3645 = vsyncadd (%p61_p1), [#allocation15], 4294963200 }
  0x67   : > { %3647 = dma.done.wait (%p61_p1), [#allocation18], 1024  }
  0x68   : > { %3649 = vsyncadd (%p61_p1), [#allocation18], 4294966272  ;;  %v3006_v0 = vld [vmem:[#allocation5 + $0x38] sm:$0xff]  ;;  %v3005_v2 = vld [vmem:[#allocation5 + $0x30] sm:$0xff]  ;;  %v778_v10 = vlaneseq  ;;  %vm3683_vm2 = vmmov 1   ;;  %s4214_s25 = sld [smem:[#allocation29_spill]] }
  0x69   : > { %v3014_v1 = vld [vmem:[#allocation5 + $0x78] sm:$0xff]  ;;  %955 = vmatpush.bf16.msra.mxu0 %v3006_v0  ;;  %v3013_v3 = vld [vmem:[#allocation5 + $0x70] sm:$0xff]  ;;  %v3004_v4 = vld [vmem:[#allocation5 + $0x28] sm:$0xff]  ;;  %s4217_s13 = sld [smem:[#allocation35_spill]]  ;;  %vm2179_vm10 = vcmask 1041409   ;;  %vm2248_vm12 = vcmask 1041408  }
  0x6a   : > { %974 = vmatpush.bf16.msra.mxu1 %v3014_v1  ;;  %v3012_v5 = vld [vmem:[#allocation5 + $0x68] sm:$0xff]  ;;  %v3003_v6 = vld [vmem:[#allocation5 + $0x20] sm:$0xff]  ;;  %v3002_v8 = vld [vmem:[#allocation5 + $0x18] sm:$0xff]  ;;  %v3988_v17 = vshrl.u32 %v778_v10, 7  ;;  %s4220_s11 = sld [smem:[#allocation37_spill]]  ;;  %s2461_s9 = sshll.u32 %s3954_s18, 1 }
  0x6b   : > { %v3011_v7 = vld [vmem:[#allocation5 + $0x60] sm:$0xff]  ;;  %v3010_v9 = vld [vmem:[#allocation5 + $0x58] sm:$0xff]  ;;  %v3001_v12 = vld [vmem:[#allocation5 + $0x10] sm:$0xff]  ;;  %s4221_s26 = sld [smem:[#allocation39_spill]]  ;;  %s2994_s1 = sshll.u32 %s3808_s24, 1 }
  0x6c   : > { %v3030_v11 = vld [vmem:[#allocation7 + $0x78] sm:$0xff]  ;;  %v3009_v13 = vld [vmem:[#allocation5 + $0x50] sm:$0xff]  ;;  %v774_v14 = vld [vmem:[%s3958_s15] sm:$0xff]  ;;  %vm798_vm0 = vcmp.lt.s32.totalorder %v3988_v17, 1  ;;  %vm1282_vm4 = vcmp.lt.s32.totalorder %v3988_v17, 2  ;;  %vm1766_vm7 = vcmp.lt.s32.totalorder %v3988_v17, 4 }
  0x6d   : > { %956 = vmatpush.bf16.msra.mxu0 %v3005_v2  ;;  %v775_v15 = vld [vmem:[%s3958_s15 + $0x8] sm:$0xff]  ;;  %v777_v16 = vld [vmem:[%s3958_s15 + $0x18] sm:$0xff]  ;;  %1164 = vmatpush.bf16.msra.mxu3 %v3030_v11  ;;  %v3029_v18 = vld [vmem:[#allocation7 + $0x70] sm:$0xff]  ;;  %v794_v21 = vrot.slane %v774_v14, 7  ;;  %s4222_s5 = sld [smem:[#allocation40_spill]] }
  0x6e   : > { %975 = vmatpush.bf16.msra.mxu1 %v3013_v3  ;;  %v3000_v19 = vld [vmem:[#allocation5 + $0x8] sm:$0xff]  ;;  %v795_v22 = vrot.slane %v775_v15, 7  ;;  %v797_v23 = vrot.slane %v777_v16, 7  ;;  %v2999_v25 = vld [vmem:[#allocation5] sm:$0xff]  ;;  %vm2529_vm1 = vmneg %vm798_vm0  ;;  %v820_v31 = vpack.c.bf16 %v775_v15, %v774_v14  ;;  %s4223_s3 = sld [smem:[#allocation41_spill]] }
  0x6f   : > { %v3008_v20 = vld [vmem:[#allocation5 + $0x48] sm:$0xff]  ;;  %v3007_v26 = vld [vmem:[#allocation5 + $0x40] sm:$0xff]  ;;  %vm3998_vm3 = vmpackc.low %vm3683_vm2, %vm2529_vm1 }
  0x70   : > { %v3028_v24 = vld [vmem:[#allocation7 + $0x68] sm:$0xff]  ;;  %v801_v27 = vsel %vm798_vm0, %v794_v21, %v795_v22  ;;  %v802_v28 = vsel %vm798_vm0, %v797_v23, %v794_v21  ;;  %v3027_v29 = vld [vmem:[#allocation7 + $0x60] sm:$0xff]  ;;  %v776_v33 = vld [vmem:[%s3958_s15 + $0x10] sm:$0xff]  ;;  %s772_s15 = scalar_lea.vmem [#allocation19], %s2461_s9 }
  0x71   : > { %957 = vmatpush.bf16.msra.mxu0 %v3004_v4  ;;  %1165 = vmatpush.bf16.msra.mxu3 %v3029_v18  ;;  %v2531_v30 = vpack.c.bf16 %v801_v27, %v802_v28  ;;  %v796_v34 = vrot.slane %v776_v33, 7  ;;  %v822_v38 = vpack.c.bf16 %v777_v16, %v776_v33  ;;  %v3026_v39 = vld [vmem:[#allocation7 + $0x58] sm:$0xff]  ;;  %v3025_v42 = vld [vmem:[#allocation7 + $0x50] sm:$0xff]  ;;  %v3024_v45 = vld [vmem:[#allocation7 + $0x48] sm:$0xff]  ;;  %s2275_s7 = sshll.u32 %s772_s15, 4  ;;  %s2276_s7 = int_to_ptr.vmem [resolvable:$true] %s2275_s7 }
  0x72   : > { %976 = vmatpush.bf16.msra.mxu1 %v3012_v5  ;;  %v3022_v40 = vld [vmem:[#allocation7 + $0x38] sm:$0xff]  ;;  %v3021_v43 = vld [vmem:[#allocation7 + $0x30] sm:$0xff]  ;;  %v3020_v46 = vld [vmem:[#allocation7 + $0x28] sm:$0xff] }
  0x73   : > { %v799_v35 = vsel %vm798_vm0, %v796_v34, %v797_v23  ;;  %v800_v36 = vsel %vm798_vm0, %v795_v22, %v796_v34  ;;  %v3038_v41 = vld [vmem:[#allocation8 + $0x38] sm:$0xff]  ;;  %1145 = vmatpush.bf16.msra.mxu2 %v3022_v40  ;;  %v3037_v44 = vld [vmem:[#allocation8 + $0x30] sm:$0xff]  ;;  %v3036_v47 = vld [vmem:[#allocation8 + $0x28] sm:$0xff] }
  0x74   : > { %v2535_v37 = vpack.c.bf16 %v799_v35, %v800_v36  ;;  %v3023_v48 = vld [vmem:[#allocation7 + $0x40] sm:$0xff]  ;;  %v3018_v51 = vld [vmem:[#allocation7 + $0x18] sm:$0xff]  ;;  %v3017_v53 = vld [vmem:[#allocation7 + $0x10] sm:$0xff]  ;;  %s3602_s19 = scalar_lea.hbm %s4223_s3, 4 }
  0x75   : > { %958 = vmatpush.bf16.msra.mxu0 %v3003_v6  ;;  %1166 = vmatpush.bf16.msra.mxu3 %v3028_v24  ;;  %v3019_v49 = vld [vmem:[#allocation7 + $0x20] sm:$0xff]  ;;  %v3034_v52 = vld [vmem:[#allocation8 + $0x18] sm:$0xff]  ;;  %v3033_v54 = vld [vmem:[#allocation8 + $0x10] sm:$0xff] }
  0x76   : > { %977 = vmatpush.bf16.msra.mxu1 %v3011_v7  ;;  %v3035_v50 = vld [vmem:[#allocation8 + $0x20] sm:$0xff]  ;;  %v3016_v55 = vld [vmem:[#allocation7 + $0x8] sm:$0xff]  ;;  %v3050_v35 = vld [vmem:[#allocation10 + $0x58] sm:$0xff] }
  0x77   : > { %1146 = vmatpush.bf16.msra.mxu2 %v3021_v43  ;;  %v3032_v56 = vld [vmem:[#allocation8 + $0x8] sm:$0xff]  ;;  %v3015_v57 = vld [vmem:[#allocation7] sm:$0xff]  ;;  %v3046_v36 = vld [vmem:[#allocation10 + $0x38] sm:$0xff] }
  0x78   : > { %v3031_v58 = vld [vmem:[#allocation8] sm:$0xff]  ;;  %v3052_v33 = vld [vmem:[#allocation10 + $0x68] sm:$0xff]  ;;  %v3041_v43 = vld [vmem:[#allocation10 + $0x10] sm:$0xff] }
  0x79   : > { %959 = vmatpush.bf16.msra.mxu0 %v3002_v8  ;;  %1167 = vmatpush.bf16.msra.mxu3 %v3027_v29  ;;  %v3269_v61 = vld [vmem:[%s4214_s25] ss:$0 sm:$0xff]  ;;  %v3044_v32 = vld [vmem:[#allocation10 + $0x28] sm:$0xff]  ;;  %vm2705_vm5 = vmneg %vm1282_vm4  ;;  %s2263_s25 = scalar_lea.sflag [#allocation4], %s3954_s18 }
  0x7a   : > { %978 = vmatpush.bf16.msra.mxu1 %v3010_v9  ;;  %v3051_v34 = vld [vmem:[#allocation10 + $0x60] sm:$0xff]  ;;  %vm4040_vm6 = vmpackc.low %vm3683_vm2, %vm2705_vm5  ;;  %v3114_v17 = vld [vmem:[#allocation17 + $0x18] sm:$0xff] }
  0x7b   : > { %1147 = vmatpush.bf16.msra.mxu2 %v3020_v46  ;;  %v3047_v40 = vld [vmem:[#allocation10 + $0x40] sm:$0xff]  ;;  %vm2881_vm8 = vmneg %vm1766_vm7 }
  0x7c   : > { %vm4089_vm9 = vmpackc.low %vm3683_vm2, %vm2881_vm8 }
  0x7d   : > { %960 = vmatpush.bf16.msra.mxu0 %v3001_v12  ;;  %1168 = vmatpush.bf16.msra.mxu3 %v3026_v39  ;;  %v3048_v39 = vld [vmem:[#allocation10 + $0x48] sm:$0xff] }
  0x7e   : > { %979 = vmatpush.bf16.msra.mxu1 %v3009_v13 }
  0x7f   : > { %1148 = vmatpush.bf16.msra.mxu2 %v3019_v49 }
  0x81   : > { %961 = vmatpush.bf16.msra.mxu0 %v3000_v19  ;;  %1169 = vmatpush.bf16.msra.mxu3 %v3025_v42  ;;  %v3042_v42 = vld [vmem:[#allocation10 + $0x18] sm:$0xff] }
  0x82   : > { %980 = vmatpush.bf16.msra.mxu1 %v3008_v20 }
  0x83   : > { %1149 = vmatpush.bf16.msra.mxu2 %v3018_v51 }
  0x85   : > { %962 = vmatpush.bf16.msra.mxu0 %v2999_v25  ;;  %1170 = vmatpush.bf16.msra.mxu3 %v3024_v45  ;;  %v3040_v45 = vld [vmem:[#allocation10 + $0x8] sm:$0xff] }
  0x86   : > { %981 = vmatpush.bf16.msra.mxu1 %v3007_v26 }
  0x87   : > { %1150 = vmatpush.bf16.msra.mxu2 %v3017_v53  ;;  %v3078_v53 = vld [vmem:[#allocation13 + $0x38] sm:$0xff] }
  0x88   : > { %2532 = vmatmul.msk.bf16.vlgmr.msra.gmra.mxu0 %vm3998_vm3, %v2531_v30  ;;  %v3054_v30 = vld [vmem:[#allocation10 + $0x78] sm:$0xff] }
  0x89   : > { %982 = vmatmul.bf16.vlgmr.msra.gmra.mxu1 %v820_v31  ;;  %1251 = vmatpush.bf16.msrb.mxu0 %v3038_v41  ;;  %v3043_v41 = vld [vmem:[#allocation10 + $0x20] sm:$0xff] }
  0x8a   : > { %1171 = vmatpush.bf16.msra.mxu3 %v3023_v48  ;;  %1439 = vmatpush.bf16.msrb.mxu1 %v3046_v36  ;;  %v3039_v48 = vld [vmem:[#allocation10] sm:$0xff] }
  0x8b   : > { %1151 = vmatpush.bf16.msra.mxu2 %v3016_v55 }
  0x8d   : > { %1252 = vmatpush.bf16.msrb.mxu0 %v3037_v44 }
  0x8f   : > { %1152 = vmatpush.bf16.msra.mxu2 %v3015_v57  ;;  %v3077_v57 = vld [vmem:[#allocation13 + $0x30] sm:$0xff] }
  0x91   : > { %1253 = vmatpush.bf16.msrb.mxu0 %v3036_v47  ;;  %v3271_v47 = vld [vmem:[%s4163_s4] ss:$0 sm:$0xff] }
  0x93   : > { %1458 = vmatpush.bf16.msrb.mxu2 %v3054_v30 }
  0x95   : > { %1254 = vmatpush.bf16.msrb.mxu0 %v3035_v50  ;;  %v3270_v50 = vld [vmem:[%s4165_s6] ss:$0 sm:$0xff] }
  0x98   : > { %2536 = vmatmul.msk.bf16.gmra.mxu0 %vm3998_vm3, %v2535_v37  ;;  %v3049_v37 = vld [vmem:[#allocation10 + $0x50] sm:$0xff] }
  0x99   : > { %987 = vmatmul.bf16.gmra.mxu1 %v822_v38  ;;  %1255 = vmatpush.bf16.msrb.mxu0 %v3034_v52 }
  0x9d   : > { %1256 = vmatpush.bf16.msrb.mxu0 %v3033_v54 }
  0xa1   : > { %1257 = vmatpush.bf16.msrb.mxu0 %v3032_v56 }
  0xa5   : > { %1258 = vmatpush.bf16.msrb.mxu0 %v3031_v58 }
  0xa8   : > { %1259 = vmatmul.bf16.vlgmr.msrb.gmra.mxu0 %v820_v31  ;;  %v3053_v31 = vld [vmem:[#allocation10 + $0x70] sm:$0xff] }
  0xa9   : > { %1459 = vmatpush.bf16.msrb.mxu2 %v3053_v31 }
  0xad   : > { %1460 = vmatpush.bf16.msrb.mxu2 %v3052_v33 }
  0xb1   : > { %1461 = vmatpush.bf16.msrb.mxu2 %v3051_v34  ;;  %v3084_v34 = vld [vmem:[#allocation14 + $0x28] sm:$0xff] }
  0xb5   : > { %1462 = vmatpush.bf16.msrb.mxu2 %v3050_v35 }
  0xb8   : > { %1264 = vmatmul.bf16.gmra.mxu0 %v822_v38  ;;  %v3045_v38 = vld [vmem:[#allocation10 + $0x30] sm:$0xff] }
  0xb9   : > { %1463 = vmatpush.bf16.msrb.mxu2 %v3049_v37  ;;  %1440 = vmatpush.bf16.msrb.mxu1 %v3045_v38 }
  0xbd   : > { %1464 = vmatpush.bf16.msrb.mxu2 %v3048_v39  ;;  %1441 = vmatpush.bf16.msrb.mxu1 %v3044_v32  ;;  %v3070_v32 = vld [vmem:[#allocation11 + $0x78] sm:$0xff] }
  0xbe   : > { %1648 = vmatpush.bf16.msra.mxu0 %v3070_v32  ;;  %v3081_v32 = vld [vmem:[#allocation14 + $0x10] sm:$0xff] }
  0xc1   : > { %1465 = vmatpush.bf16.msrb.mxu2 %v3047_v40  ;;  %1442 = vmatpush.bf16.msrb.mxu1 %v3043_v41  ;;  %v3069_v40 = vld [vmem:[#allocation11 + $0x70] sm:$0xff]  ;;  %v3068_v41 = vld [vmem:[#allocation11 + $0x68] sm:$0xff] }
  0xc2   : > { %1649 = vmatpush.bf16.msra.mxu0 %v3069_v40 }
  0xc5   : > { %1443 = vmatpush.bf16.msrb.mxu1 %v3042_v42  ;;  %v3067_v42 = vld [vmem:[#allocation11 + $0x60] sm:$0xff] }
  0xc6   : > { %1650 = vmatpush.bf16.msra.mxu0 %v3068_v41 }
  0xc9   : > { %1444 = vmatpush.bf16.msrb.mxu1 %v3041_v43  ;;  %v3066_v43 = vld [vmem:[#allocation11 + $0x58] sm:$0xff] }
  0xca   : > { %1651 = vmatpush.bf16.msra.mxu0 %v3067_v42  ;;  %v3080_v42 = vld [vmem:[#allocation14 + $0x8] sm:$0xff] }
  0xcd   : > { %1445 = vmatpush.bf16.msrb.mxu1 %v3040_v45  ;;  %v3065_v45 = vld [vmem:[#allocation11 + $0x50] sm:$0xff] }
  0xce   : > { %1652 = vmatpush.bf16.msra.mxu0 %v3066_v43  ;;  %v3274_v43 = vld [vmem:[%s4169_s10] ss:$0 sm:$0xff] }
  0xd1   : > { %1446 = vmatpush.bf16.msrb.mxu1 %v3039_v48  ;;  %v3060_v48 = vld [vmem:[#allocation11 + $0x28] sm:$0xff] }
  0xd2   : > { %1653 = vmatpush.bf16.msra.mxu0 %v3065_v45  ;;  %v3079_v45 = vld [vmem:[#allocation14] sm:$0xff] }
  0xd5   : > { %1735 = vmatpush.bf16.msra.mxu1 %v3078_v53  ;;  %v3056_v53 = vld [vmem:[#allocation11 + $0x8] sm:$0xff] }
  0xd9   : > { %1736 = vmatpush.bf16.msra.mxu1 %v3077_v57  ;;  %v3272_v57 = vld [vmem:[%s4167_s8] ss:$0 sm:$0xff] }
 0x105   : > { %v964_v59 = vpop.f32.mrf.mxu0 }
 0x106   : > { %v983_v60 = vpop.f32.mrf.mxu1  ;;  %v965_v62 = vadd.f32 %v3269_v61, %v964_v59 }
 0x108   : > { %v984_v1 = vadd.f32 %v983_v60, %v965_v62 }
 0x10a   : > { %v993_v4 = vmax.f32 %v984_v1, 0.0 }
 0x10c   : > { %v997_v20 = vrot.slane %v993_v4, 7 }
 0x10d   : > { %v966_v63 = vpop.f32.mrf.mxu0 }
 0x10e   : > { %v985_v0 = vpop.f32.mrf.mxu1  ;;  %v967_v2 = vadd.f32 %v3269_v61, %v966_v63  ;;  %v3076_v63 = vld [vmem:[#allocation13 + $0x28] sm:$0xff] }
 0x10f   : > { %1737 = vmatpush.bf16.msra.mxu1 %v3076_v63 }
 0x110   : > { %v986_v3 = vadd.f32 %v985_v0, %v967_v2 }
 0x112   : > { %v994_v5 = vmax.f32 %v986_v3, 0.0 }
 0x114   : > { %v1010_v6 = vpack.c.bf16 %v994_v5, %v993_v4  ;;  %v998_v16 = vrot.slane %v994_v5, 7  ;;  %v3075_v4 = vld [vmem:[#allocation13 + $0x20] sm:$0xff] }
 0x115   : > { %v969_v7 = vpop.f32.mrf.mxu0  ;;  %1738 = vmatpush.bf16.msra.mxu1 %v3075_v4 }
 0x116   : > { %v988_v8 = vpop.f32.mrf.mxu1  ;;  %1172 = vmatmul.bf16.vlgmr.msra.gmra.mxu3 %v1010_v6  ;;  %v970_v9 = vadd.f32 %v3269_v61, %v969_v7  ;;  %v1003_v23 = vsel %vm798_vm0, %v997_v20, %v998_v16 }
 0x118   : > { %v989_v12 = vadd.f32 %v988_v8, %v970_v9  ;;  %v3074_v9 = vld [vmem:[#allocation13 + $0x18] sm:$0xff] }
 0x119   : > { %1739 = vmatpush.bf16.msra.mxu1 %v3074_v9 }
 0x11a   : > { %v995_v18 = vmax.f32 %v989_v12, 0.0 }
 0x11c   : > { %v999_v26 = vrot.slane %v995_v18, 7 }
 0x11d   : > { %v971_v11 = vpop.f32.mrf.mxu0 }
 0x11e   : > { %v972_v13 = vadd.f32 %v3269_v61, %v971_v11  ;;  %v990_v14 = vpop.f32.mrf.mxu1  ;;  %v1002_v28 = vsel %vm798_vm0, %v998_v16, %v999_v26 }
 0x120   : > { %v991_v15 = vadd.f32 %v990_v14, %v972_v13  ;;  %v3073_v13 = vld [vmem:[#allocation13 + $0x10] sm:$0xff] }
 0x121   : > { %1740 = vmatpush.bf16.msra.mxu1 %v3073_v13 }
 0x122   : > { %v996_v19 = vmax.f32 %v991_v15, 0.0 }
 0x124   : > { %v1000_v21 = vrot.slane %v996_v19, 7  ;;  %v1012_v22 = vpack.c.bf16 %v996_v19, %v995_v18 }
 0x125   : > { %v1260_v44 = vpop.f32.mrf.mxu0 }
 0x126   : > { %1177 = vmatmul.bf16.gmra.mxu3 %v1012_v22  ;;  %v1004_v24 = vsel %vm798_vm0, %v1000_v21, %v997_v20  ;;  %v1001_v27 = vsel %vm798_vm0, %v999_v26, %v1000_v21  ;;  %v1261_v55 = vadd.f32 %v3270_v50, %v1260_v44  ;;  %v3072_v22 = vld [vmem:[#allocation13 + $0x8] sm:$0xff]  ;;  %v3062_v44 = vld [vmem:[#allocation11 + $0x38] sm:$0xff] }
 0x127   : > { %v2603_v25 = vpack.c.bf16 %v1003_v23, %v1004_v24  ;;  %v2607_v29 = vpack.c.bf16 %v1001_v27, %v1002_v28  ;;  %1741 = vmatpush.bf16.msra.mxu1 %v3072_v22  ;;  %v3071_v27 = vld [vmem:[#allocation13] sm:$0xff]  ;;  %1629 = vmatpush.bf16.msrb.mxu3 %v3062_v44 }
 0x129   : > { %2604 = vmatmul.msk.bf16.vlgmr.msra.gmra.mxu2 %vm3998_vm3, %v2603_v25 }
 0x12b   : > { %1742 = vmatpush.bf16.msra.mxu1 %v3071_v27  ;;  %v3093_v27 = vld [vmem:[#allocation14 + $0x70] sm:$0xff] }
 0x12d   : > { %v1262_v52 = vpop.f32.mrf.mxu0 }
 0x12e   : > { %v1263_v61 = vadd.f32 %v3270_v50, %v1262_v52  ;;  %v3057_v52 = vld [vmem:[#allocation11 + $0x10] sm:$0xff] }
 0x135   : > { %v1265_v1 = vpop.f32.mrf.mxu0 }
 0x136   : > { %v1266_v11 = vadd.f32 %v3270_v50, %v1265_v1 }
 0x139   : > { %2608 = vmatmul.msk.bf16.gmra.mxu2 %vm3998_vm3, %v2607_v29 }
 0x13d   : > { %v1267_v14 = vpop.f32.mrf.mxu0 }
 0x13e   : > { %v1268_v19 = vadd.f32 %v3270_v50, %v1267_v14  ;;  %v3059_v50 = vld [vmem:[#allocation11 + $0x20] sm:$0xff] }
 0x199   : > { %v1173_v46 = vpop.f32.mrf.mxu3 }
 0x1a1   : > { %v1175_v54 = vpop.f32.mrf.mxu3 }
 0x1a9   : > { %v1178_v5 = vpop.f32.mrf.mxu3 }
 0x1ac   : > { %v1154_v49 = vpop.f32.mrf.mxu2 }
 0x1ad   : > { %v1155_v51 = vadd.f32 %v3271_v47, %v1154_v49  ;;  %v3063_v49 = vld [vmem:[#allocation11 + $0x40] sm:$0xff] }
 0x1af   : > { %v1174_v56 = vadd.f32 %v1173_v46, %v1155_v51  ;;  %v3061_v46 = vld [vmem:[#allocation11 + $0x30] sm:$0xff]  ;;  %v3058_v51 = vld [vmem:[#allocation11 + $0x18] sm:$0xff] }
 0x1b0   : > { %1630 = vmatpush.bf16.msrb.mxu3 %v3061_v46 }
 0x1b1   : > { %v1270_v60 = vadd.f32 %v1261_v55, %v1174_v56  ;;  %v1180_v18 = vpop.f32.mrf.mxu3  ;;  %v3055_v55 = vld [vmem:[#allocation11] sm:$0xff] }
 0x1b3   : > { %v1274_v2 = vmax.f32 %v1270_v60, 0.0 }
 0x1b4   : > { %v1156_v58 = vpop.f32.mrf.mxu2  ;;  %1631 = vmatpush.bf16.msrb.mxu3 %v3060_v48  ;;  %v3273_v48 = vld [vmem:[%s4217_s13] ss:$0 sm:$0xff]  ;;  %s2273_s13 = scalar_lea.hbm %s4223_s3, %s2994_s1 }
 0x1b5   : > { %v1157_v59 = vadd.f32 %v3271_v47, %v1156_v58  ;;  %v1278_v28 = vrot.slane %v1274_v2, 6 }
 0x1b7   : > { %v1176_v62 = vadd.f32 %v1175_v54, %v1157_v59 }
 0x1b8   : > { %1632 = vmatpush.bf16.msrb.mxu3 %v3059_v50 }
 0x1b9   : > { %v1271_v0 = vadd.f32 %v1263_v61, %v1176_v62 }
 0x1bb   : > { %v1275_v3 = vmax.f32 %v1271_v0, 0.0 }
 0x1bc   : > { %v1159_v6 = vpop.f32.mrf.mxu2  ;;  %1633 = vmatpush.bf16.msrb.mxu3 %v3058_v51 }
 0x1bd   : > { %v1304_v7 = vpack.c.bf16 %v1275_v3, %v1274_v2  ;;  %v1160_v8 = vadd.f32 %v3271_v47, %v1159_v6  ;;  %v1279_v24 = vrot.slane %v1275_v3, 6 }
 0x1bf   : > { %1466 = vmatmul.bf16.vlgmr.msrb.gmra.mxu2 %v1304_v7  ;;  %v1179_v12 = vadd.f32 %v1178_v5, %v1160_v8  ;;  %v1285_v31 = vsel %vm1282_vm4, %v1278_v28, %v1279_v24 }
 0x1c0   : > { %1634 = vmatpush.bf16.msrb.mxu3 %v3057_v52 }
 0x1c1   : > { %v1272_v21 = vadd.f32 %v1266_v11, %v1179_v12 }
 0x1c3   : > { %v1276_v25 = vmax.f32 %v1272_v21, 0.0 }
 0x1c4   : > { %v1161_v15 = vpop.f32.mrf.mxu2  ;;  %1635 = vmatpush.bf16.msrb.mxu3 %v3056_v53 }
 0x1c5   : > { %v1162_v16 = vadd.f32 %v3271_v47, %v1161_v15  ;;  %v1280_v36 = vrot.slane %v1276_v25, 6  ;;  %v3064_v47 = vld [vmem:[#allocation11 + $0x48] sm:$0xff] }
 0x1c6   : > { %1654 = vmatpush.bf16.msra.mxu0 %v3064_v47 }
 0x1c7   : > { %v1181_v20 = vadd.f32 %v1180_v18, %v1162_v16  ;;  %v1284_v38 = vsel %vm1282_vm4, %v1279_v24, %v1280_v36 }
 0x1c8   : > { %1636 = vmatpush.bf16.msrb.mxu3 %v3055_v55 }
 0x1c9   : > { %v1273_v23 = vadd.f32 %v1268_v19, %v1181_v20 }
 0x1ca   : > { %1655 = vmatpush.bf16.msra.mxu0 %v3063_v49 }
 0x1cb   : > { %v1277_v26 = vmax.f32 %v1273_v23, 0.0 }
 0x1cd   : > { %v1281_v29 = vrot.slane %v1277_v26, 6  ;;  %v1306_v30 = vpack.c.bf16 %v1277_v26, %v1276_v25  ;;  %v3094_v26 = vld [vmem:[#allocation14 + $0x78] sm:$0xff] }
 0x1ce   : > { %1942 = vmatpush.bf16.msra.mxu3 %v3094_v26 }
 0x1cf   : > { %1471 = vmatmul.bf16.gmra.mxu2 %v1306_v30  ;;  %v1286_v33 = vsel %vm1282_vm4, %v1281_v29, %v1278_v28  ;;  %v1283_v37 = vsel %vm1282_vm4, %v1280_v36, %v1281_v29  ;;  %v3092_v28 = vld [vmem:[#allocation14 + $0x68] sm:$0xff]  ;;  %v3091_v29 = vld [vmem:[#allocation14 + $0x60] sm:$0xff] }
 0x1d0   : > { %v2707_v35 = vpack.c.bf16 %v1285_v31, %v1286_v33  ;;  %v2711_v39 = vpack.c.bf16 %v1283_v37, %v1284_v38  ;;  %v3086_v31 = vld [vmem:[#allocation14 + $0x38] sm:$0xff]  ;;  %v3089_v33 = vld [vmem:[#allocation14 + $0x50] sm:$0xff]  ;;  %v3088_v36 = vld [vmem:[#allocation14 + $0x48] sm:$0xff] }
 0x1d1   : > { %1923 = vmatpush.bf16.msra.mxu2 %v3086_v31  ;;  %v3087_v37 = vld [vmem:[#allocation14 + $0x40] sm:$0xff]  ;;  %v3106_v31 = vld [vmem:[#allocation16 + $0x58] sm:$0xff] }
 0x1d2   : > { %2708 = vmatmul.msk.bf16.vlgmr.msrb.gmra.mxu1 %vm4040_vm6, %v2707_v35  ;;  %1943 = vmatpush.bf16.msra.mxu3 %v3093_v27  ;;  %v3085_v35 = vld [vmem:[#allocation14 + $0x30] sm:$0xff]  ;;  %v3083_v38 = vld [vmem:[#allocation14 + $0x20] sm:$0xff]  ;;  %v3110_v27 = vld [vmem:[#allocation16 + $0x78] sm:$0xff] }
 0x1d3   : > { %2130 = vmatpush.bf16.msrb.mxu1 %v3110_v27  ;;  %v3276_v27 = vld [vmem:[%s4221_s26] ss:$0 sm:$0xff] }
 0x1d5   : > { %1924 = vmatpush.bf16.msra.mxu2 %v3085_v35  ;;  %v3105_v35 = vld [vmem:[#allocation16 + $0x50] sm:$0xff] }
 0x1d6   : > { %1944 = vmatpush.bf16.msra.mxu3 %v3092_v28  ;;  %v3109_v28 = vld [vmem:[#allocation16 + $0x70] sm:$0xff] }
 0x1d7   : > { %2131 = vmatpush.bf16.msrb.mxu1 %v3109_v28 }
 0x1d9   : > { %1925 = vmatpush.bf16.msra.mxu2 %v3084_v34  ;;  %v3104_v34 = vld [vmem:[#allocation16 + $0x48] sm:$0xff] }
 0x1da   : > { %1945 = vmatpush.bf16.msra.mxu3 %v3091_v29  ;;  %v3108_v29 = vld [vmem:[#allocation16 + $0x68] sm:$0xff] }
 0x1db   : > { %2132 = vmatpush.bf16.msrb.mxu1 %v3108_v29 }
 0x1dd   : > { %1926 = vmatpush.bf16.msra.mxu2 %v3083_v38  ;;  %v3103_v38 = vld [vmem:[#allocation16 + $0x40] sm:$0xff] }
 0x1e2   : > { %2712 = vmatmul.msk.bf16.gmra.mxu1 %vm4040_vm6, %v2711_v39  ;;  %v3082_v39 = vld [vmem:[#allocation14 + $0x18] sm:$0xff] }
 0x1e3   : > { %1927 = vmatpush.bf16.msra.mxu2 %v3082_v39  ;;  %v3099_v39 = vld [vmem:[#allocation16 + $0x20] sm:$0xff] }
 0x1e7   : > { %1928 = vmatpush.bf16.msra.mxu2 %v3081_v32  ;;  %v3098_v32 = vld [vmem:[#allocation16 + $0x18] sm:$0xff] }
 0x1eb   : > { %1929 = vmatpush.bf16.msra.mxu2 %v3080_v42 }
 0x1ef   : > { %1930 = vmatpush.bf16.msra.mxu2 %v3079_v45  ;;  %v3275_v45 = vld [vmem:[%s4220_s11] ss:$0 sm:$0xff]  ;;  %s2277_s11 = sshll.u32 %s2273_s13, 4  ;;  %s2278_s11 = int_to_ptr.hbm [resolvable:$true] %s2277_s11 }
 0x1f0   : > { %s3596_s14 = sshra.s32 %s2278_s11, 4  ;;  %s3597_s14 = int_to_ptr.hbm [resolvable:$true] %s3596_s14 }
 0x1f1   : > { %s3598_s26 = scalar_lea.hbm %s3597_s14, 2  ;;  %p3603_p13 = scmp.lt.s32.totalorder %s3597_s14, %s4223_s3 }
 0x1f2   : > { %1743 = vmatmul.bf16.vlgmr.msra.gmra.mxu1 %v1304_v7  ;;  %p3599_p1 = scmp.ne.s32.totalorder %s3597_s14, %s3598_s26  ;;  %p3604_p7 = scmp.lt.s32.totalorder %s3602_s19, %s3598_s26 }
 0x1f4   : > { %p3600_p3 = pnand %p3599_p1, %p3921_p0  ;;  %p3605_p8 = por %p3604_p7, %p3603_p13 }
 0x1f6   : > { %p3601_p5 = pneg %p3600_p3 }
 0x1f8   : > { %p3606_p9 = pnand %p3605_p8, %p3601_p5 }
 0x202   : > { %1748 = vmatmul.bf16.gmra.mxu1 %v1306_v30  ;;  %v3090_v30 = vld [vmem:[#allocation14 + $0x58] sm:$0xff] }
 0x203   : > { %1946 = vmatpush.bf16.msra.mxu3 %v3090_v30  ;;  %v3107_v30 = vld [vmem:[#allocation16 + $0x60] sm:$0xff] }
 0x204   : > { %2133 = vmatpush.bf16.msrb.mxu1 %v3107_v30 }
 0x207   : > { %1947 = vmatpush.bf16.msra.mxu3 %v3089_v33  ;;  %v3102_v33 = vld [vmem:[#allocation16 + $0x38] sm:$0xff] }
 0x208   : > { %2134 = vmatpush.bf16.msrb.mxu1 %v3106_v31  ;;  %2113 = vmatpush.bf16.msrb.mxu0 %v3102_v33 }
 0x20b   : > { %1948 = vmatpush.bf16.msra.mxu3 %v3088_v36  ;;  %v3101_v36 = vld [vmem:[#allocation16 + $0x30] sm:$0xff] }
 0x20c   : > { %2135 = vmatpush.bf16.msrb.mxu1 %v3105_v35  ;;  %2114 = vmatpush.bf16.msrb.mxu0 %v3101_v36 }
 0x20f   : > { %1949 = vmatpush.bf16.msra.mxu3 %v3087_v37  ;;  %v3100_v37 = vld [vmem:[#allocation16 + $0x28] sm:$0xff] }
 0x210   : > { %2136 = vmatpush.bf16.msrb.mxu1 %v3104_v34  ;;  %2115 = vmatpush.bf16.msrb.mxu0 %v3100_v37 }
 0x214   : > { %2137 = vmatpush.bf16.msrb.mxu1 %v3103_v38  ;;  %2116 = vmatpush.bf16.msrb.mxu0 %v3099_v39 }
 0x218   : > { %2117 = vmatpush.bf16.msrb.mxu0 %v3098_v32 }
 0x242   : > { %v1467_v54 = vpop.f32.mrf.mxu2 }
 0x24a   : > { %v1469_v59 = vpop.f32.mrf.mxu2 }
 0x24f   : > { %v1448_v56 = vpop.f32.mrf.mxu1 }
 0x250   : > { %v1449_v58 = vadd.f32 %v3272_v57, %v1448_v56 }
 0x252   : > { %v1468_v61 = vadd.f32 %v1467_v54, %v1449_v58  ;;  %v1472_v3 = vpop.f32.mrf.mxu2 }
 0x254   : > { %v1477_v0 = vmax.f32 %v1468_v61, 0.0 }
 0x256   : > { %v1481_v15 = vrot.slane %v1477_v0, 6 }
 0x257   : > { %v1450_v60 = vpop.f32.mrf.mxu1 }
 0x258   : > { %v1451_v62 = vadd.f32 %v3272_v57, %v1450_v60 }
 0x25a   : > { %v1470_v63 = vadd.f32 %v1469_v59, %v1451_v62  ;;  %v1474_v9 = vpop.f32.mrf.mxu2 }
 0x25c   : > { %v1478_v1 = vmax.f32 %v1470_v63, 0.0 }
 0x25e   : > { %v1494_v2 = vpack.c.bf16 %v1478_v1, %v1477_v0  ;;  %v1482_v12 = vrot.slane %v1478_v1, 6 }
 0x25f   : > { %v1453_v4 = vpop.f32.mrf.mxu1 }
 0x260   : > { %1656 = vmatmul.bf16.vlgmr.msra.gmra.mxu0 %v1494_v2  ;;  %v1454_v5 = vadd.f32 %v3272_v57, %v1453_v4  ;;  %v1487_v19 = vsel %vm1282_vm4, %v1481_v15, %v1482_v12 }
 0x262   : > { %v1473_v7 = vadd.f32 %v1472_v3, %v1454_v5 }
 0x264   : > { %v1479_v13 = vmax.f32 %v1473_v7, 0.0 }
 0x266   : > { %v1483_v22 = vrot.slane %v1479_v13, 6 }
 0x267   : > { %v1455_v6 = vpop.f32.mrf.mxu1 }
 0x268   : > { %v1456_v8 = vadd.f32 %v3272_v57, %v1455_v6  ;;  %v1486_v24 = vsel %vm1282_vm4, %v1482_v12, %v1483_v22 }
 0x26a   : > { %v1475_v11 = vadd.f32 %v1474_v9, %v1456_v8 }
 0x26c   : > { %v1480_v14 = vmax.f32 %v1475_v11, 0.0 }
 0x26e   : > { %v1484_v16 = vrot.slane %v1480_v14, 6  ;;  %v1496_v18 = vpack.c.bf16 %v1480_v14, %v1479_v13 }
 0x26f   : > { %v1744_v40 = vpop.f32.mrf.mxu1 }
 0x270   : > { %1661 = vmatmul.bf16.gmra.mxu0 %v1496_v18  ;;  %v1488_v20 = vsel %vm1282_vm4, %v1484_v16, %v1481_v15  ;;  %v1485_v23 = vsel %vm1282_vm4, %v1483_v22, %v1484_v16  ;;  %v1745_v52 = vadd.f32 %v3273_v48, %v1744_v40  ;;  %v3097_v40 = vld [vmem:[#allocation16 + $0x10] sm:$0xff] }
 0x271   : > { %v2779_v21 = vpack.c.bf16 %v1487_v19, %v1488_v20  ;;  %v2783_v25 = vpack.c.bf16 %v1485_v23, %v1486_v24  ;;  %2118 = vmatpush.bf16.msrb.mxu0 %v3097_v40 }
 0x273   : > { %2780 = vmatmul.msk.bf16.vlgmr.msrb.gmra.mxu3 %vm4040_vm6, %v2779_v21 }
 0x274   : > { %3119 = vmatpush.bf16.msrb.mxu3 %v3102_v33 }
 0x277   : > { %v1746_v47 = vpop.f32.mrf.mxu1 }
 0x278   : > { %v1747_v54 = vadd.f32 %v3273_v48, %v1746_v47  ;;  %3120 = vmatpush.bf16.msrb.mxu3 %v3101_v36 }
 0x27c   : > { %3121 = vmatpush.bf16.msrb.mxu3 %v3100_v37 }
 0x27f   : > { %v1749_v58 = vpop.f32.mrf.mxu1 }
 0x280   : > { %v1750_v4 = vadd.f32 %v3273_v48, %v1749_v58  ;;  %3122 = vmatpush.bf16.msrb.mxu3 %v3099_v39 }
 0x283   : > { %2784 = vmatmul.msk.bf16.gmra.mxu3 %vm4040_vm6, %v2783_v25 }
 0x284   : > { %3123 = vmatpush.bf16.msrb.mxu3 %v3098_v32 }
 0x287   : > { %v1751_v2 = vpop.f32.mrf.mxu1 }
 0x288   : > { %v1752_v7 = vadd.f32 %v3273_v48, %v1751_v2  ;;  %3124 = vmatpush.bf16.msrb.mxu3 %v3097_v40 }
 0x2dd   : > { %v1657_v41 = vpop.f32.mrf.mxu0 }
 0x2e5   : > { %v1659_v49 = vpop.f32.mrf.mxu0 }
 0x2ed   : > { %v1662_v61 = vpop.f32.mrf.mxu0 }
 0x2f5   : > { %v1664_v6 = vpop.f32.mrf.mxu0 }
 0x2f6   : > { %v1638_v44 = vpop.f32.mrf.mxu3 }
 0x2f7   : > { %v1639_v46 = vadd.f32 %v3274_v43, %v1638_v44 }
 0x2f9   : > { %v1658_v50 = vadd.f32 %v1657_v41, %v1639_v46  ;;  %v3096_v41 = vld [vmem:[#allocation16 + $0x8] sm:$0xff] }
 0x2fa   : > { %3125 = vmatpush.bf16.msrb.mxu3 %v3096_v41  ;;  %2119 = vmatpush.bf16.msrb.mxu0 %v3096_v41 }
 0x2fb   : > { %v1754_v55 = vadd.f32 %v1745_v52, %v1658_v50 }
 0x2fd   : > { %v1758_v59 = vmax.f32 %v1754_v55, 0.0 }
 0x2fe   : > { %v1640_v51 = vpop.f32.mrf.mxu3 }
 0x2ff   : > { %v1641_v53 = vadd.f32 %v3274_v43, %v1640_v51  ;;  %v1762_v15 = vrot.slane %v1758_v59, 4 }
 0x301   : > { %v1660_v56 = vadd.f32 %v1659_v49, %v1641_v53 }
 0x303   : > { %v1755_v57 = vadd.f32 %v1747_v54, %v1660_v56 }
 0x305   : > { %v4073_v60 = vmax.f32 %v1755_v57, 0.0 }
 0x306   : > { %v1643_v62 = vpop.f32.mrf.mxu3 }
 0x307   : > { %v1788_v63 = vpack.c.bf16 %v4073_v60, %v1758_v59  ;;  %v1644_v0 = vadd.f32 %v3274_v43, %v1643_v62  ;;  %v1763_v12 = vrot.slane %v4073_v60, 4 }
 0x309   : > { %1950 = vmatmul.bf16.vlgmr.msra.gmra.mxu3 %v1788_v63  ;;  %v1663_v1 = vadd.f32 %v1662_v61, %v1644_v0  ;;  %v1769_v19 = vsel %vm1766_vm7, %v1762_v15, %v1763_v12 }
 0x30b   : > { %v1756_v9 = vadd.f32 %v1750_v4, %v1663_v1 }
 0x30d   : > { %v1760_v14 = vmax.f32 %v1756_v9, 0.0 }
 0x30e   : > { %v1645_v3 = vpop.f32.mrf.mxu3 }
 0x30f   : > { %v1646_v5 = vadd.f32 %v3274_v43, %v1645_v3  ;;  %v1764_v23 = vrot.slane %v1760_v14, 4  ;;  %v3095_v43 = vld [vmem:[#allocation16] sm:$0xff] }
 0x310   : > { %3126 = vmatpush.bf16.msrb.mxu3 %v3095_v43  ;;  %2120 = vmatpush.bf16.msrb.mxu0 %v3095_v43 }
 0x311   : > { %v1665_v8 = vadd.f32 %v1664_v6, %v1646_v5  ;;  %v1768_v25 = vsel %vm1766_vm7, %v1763_v12, %v1764_v23 }
 0x313   : > { %v1757_v11 = vadd.f32 %v1752_v7, %v1665_v8 }
 0x315   : > { %v4077_v13 = vmax.f32 %v1757_v11, 0.0 }
 0x317   : > { %v1765_v16 = vrot.slane %v4077_v13, 4  ;;  %v1790_v18 = vpack.c.bf16 %v4077_v13, %v1760_v14 }
 0x319   : > { %1955 = vmatmul.bf16.gmra.mxu3 %v1790_v18  ;;  %v1770_v20 = vsel %vm1766_vm7, %v1765_v16, %v1762_v15  ;;  %v1767_v24 = vsel %vm1766_vm7, %v1764_v23, %v1765_v16  ;;  %v3118_v15 = vld [vmem:[#allocation17 + $0x38] sm:$0xff]  ;;  %v3117_v16 = vld [vmem:[#allocation17 + $0x30] sm:$0xff]  ;;  %v3116_v18 = vld [vmem:[#allocation17 + $0x28] sm:$0xff] }
 0x31a   : > { %v2883_v22 = vpack.c.bf16 %v1769_v19, %v1770_v20  ;;  %v2887_v26 = vpack.c.bf16 %v1767_v24, %v1768_v25  ;;  %2231 = vmatpush.bf16.msrb.mxu2 %v3118_v15  ;;  %v3115_v19 = vld [vmem:[#allocation17 + $0x20] sm:$0xff]  ;;  %v3112_v24 = vld [vmem:[#allocation17 + $0x8] sm:$0xff] }
 0x31b   : > { %v3111_v25 = vld [vmem:[#allocation17] sm:$0xff] }
 0x31c   : > { %2884 = vmatmul.msk.bf16.vlgmr.msra.gmra.mxu2 %vm4089_vm9, %v2883_v22  ;;  %v3113_v22 = vld [vmem:[#allocation17 + $0x10] sm:$0xff] }
 0x31e   : > { %2232 = vmatpush.bf16.msrb.mxu2 %v3117_v16 }
 0x322   : > { %2233 = vmatpush.bf16.msrb.mxu2 %v3116_v18 }
 0x326   : > { %2234 = vmatpush.bf16.msrb.mxu2 %v3115_v19 }
 0x32a   : > { %2235 = vmatpush.bf16.msrb.mxu2 %v3114_v17 }
 0x32c   : > { %2888 = vmatmul.msk.bf16.gmra.mxu2 %vm4089_vm9, %v2887_v26 }
 0x32e   : > { %2236 = vmatpush.bf16.msrb.mxu2 %v3113_v22 }
 0x332   : > { %2237 = vmatpush.bf16.msrb.mxu2 %v3112_v24 }
 0x336   : > { %2238 = vmatpush.bf16.msrb.mxu2 %v3111_v25 }
 0x38c   : > { %v1951_v42 = vpop.f32.mrf.mxu3 }
 0x394   : > { %v1953_v47 = vpop.f32.mrf.mxu3 }
 0x39c   : > { %v1956_v55 = vpop.f32.mrf.mxu3 }
 0x39f   : > { %v1932_v44 = vpop.f32.mrf.mxu2 }
 0x3a0   : > { %v1933_v46 = vadd.f32 %v3275_v45, %v1932_v44 }
 0x3a2   : > { %v1952_v49 = vadd.f32 %v1951_v42, %v1933_v46 }
 0x3a4   : > { %v1961_v52 = vmax.f32 %v1952_v49, 0.0  ;;  %v1958_v63 = vpop.f32.mrf.mxu3 }
 0x3a6   : > { %v1965_v4 = vrot.slane %v1961_v52, 4 }
 0x3a7   : > { %v1934_v48 = vpop.f32.mrf.mxu2 }
 0x3a8   : > { %v1935_v50 = vadd.f32 %v3275_v45, %v1934_v48  ;;  %v3277_v48 = vld [vmem:[%s4222_s5] ss:$0 sm:$0xff] }
 0x3aa   : > { %v1954_v51 = vadd.f32 %v1953_v47, %v1935_v50 }
 0x3ac   : > { %v1962_v53 = vmax.f32 %v1954_v51, 0.0 }
 0x3ae   : > { %v1978_v54 = vpack.c.bf16 %v1962_v53, %v1961_v52  ;;  %v1966_v1 = vrot.slane %v1962_v53, 4 }
 0x3af   : > { %v1937_v56 = vpop.f32.mrf.mxu2 }
 0x3b0   : > { %v1938_v57 = vadd.f32 %v3275_v45, %v1937_v56  ;;  %2138 = vmatmul.bf16.vlgmr.msrb.gmra.mxu1 %v1978_v54  ;;  %v1971_v7 = vsel %vm1766_vm7, %v1965_v4, %v1966_v1 }
 0x3b2   : > { %v1957_v58 = vadd.f32 %v1956_v55, %v1938_v57 }
 0x3b4   : > { %v1963_v61 = vmax.f32 %v1957_v58, 0.0 }
 0x3b6   : > { %v1967_v2 = vrot.slane %v1963_v61, 4 }
 0x3b7   : > { %v1939_v59 = vpop.f32.mrf.mxu2 }
 0x3b8   : > { %v1940_v62 = vadd.f32 %v3275_v45, %v1939_v59  ;;  %v1970_v8 = vsel %vm1766_vm7, %v1966_v1, %v1967_v2 }
 0x3ba   : > { %v1959_v0 = vadd.f32 %v1958_v63, %v1940_v62 }
 0x3bc   : > { %v1964_v3 = vmax.f32 %v1959_v0, 0.0 }
 0x3be   : > { %v1968_v5 = vrot.slane %v1964_v3, 4  ;;  %v1980_v6 = vpack.c.bf16 %v1964_v3, %v1963_v61 }
 0x3c0   : > { %v1969_v9 = vsel %vm1766_vm7, %v1967_v2, %v1968_v5  ;;  %v1972_v11 = vsel %vm1766_vm7, %v1968_v5, %v1965_v4  ;;  %2142 = vmatmul.bf16.gmra.mxu1 %v1980_v6 }
 0x3c1   : > { %v2955_v12 = vpack.c.bf16 %v1971_v7, %v1972_v11  ;;  %v2959_v14 = vpack.c.bf16 %v1969_v9, %v1970_v8 }
 0x3c3   : > { %2956 = vmatmul.msk.bf16.vlgmr.msrb.gmra.mxu0 %vm4089_vm9, %v2955_v12  ;;  %2960 = vmatmul.msk.bf16.vlgmr.msrb.gmra.mxu3 %vm4089_vm9, %v2959_v14 }
 0x42d   : > { %v2139_v20 = vpop.f32.mrf.mxu1 }
 0x435   : > { %v2140_v23 = vpop.f32.mrf.mxu1 }
 0x43d   : > { %v2143_v26 = vpop.f32.mrf.mxu1 }
 0x440   : > { %v2122_v21 = vpop.f32.mrf.mxu0 }
 0x445   : > { %v2144_v37 = vpop.f32.mrf.mxu1 }
 0x446   : > { %v2126_v28 = vpop.f32.mrf.mxu3 }
 0x448   : > { %v2123_v29 = vpop.f32.mrf.mxu0 }
 0x449   : > { %v2124_v30 = vadd.f32 %v3276_v27, %v2123_v29 }
 0x44b   : > { %v2141_v31 = vadd.f32 %v2140_v23, %v2124_v30 }
 0x44d   : > { %v2147_v33 = vadd.f32 %v2141_v31, %v4073_v60  ;;  %v2245_v60 = vand.u32 127, %v778_v10 }
 0x44e   : > { %v2127_v35 = vpop.f32.mrf.mxu3 }
 0x44f   : > { %v2149_v36 = vmax.f32 %v2147_v33, 0.0  ;;  %v2128_v34 = vadd.f32 %v3276_v27, %v2127_v35  ;;  %vm2246_vm11 = vcmp.lt.s32.totalorder %v2245_v60, 10 }
 0x451   : > { %v2145_v38 = vadd.f32 %v2144_v37, %v2128_v34  ;;  %v2151_v39 = vpack.c.bf16 %v2149_v36, %v2149_v36 }
 0x453   : > { %v2148_v32 = vadd.f32 %v2145_v38, %v4077_v13  ;;  %v2175_v41 = vunpack.c.l.b16 %v2151_v39 }
 0x455   : > { %v2150_v40 = vmax.f32 %v2148_v32, 0.0  ;;  %v2177_v44 = vrot.slane %v2175_v41, 7 }
 0x457   : > { %v2152_v42 = vpack.c.bf16 %v2150_v40, %v2150_v40 }
 0x459   : > { %v2176_v43 = vunpack.c.l.b16 %v2152_v42 }
 0x45b   : > { %v2178_v45 = vrot.slane %v2176_v43, 6 }
 0x45d   : > { %v2180_v46 = vsel %vm2179_vm10, %v2178_v45, %v2177_v44 }
 0x45e   : > { %v2181_v47 = vpack.c.b16 %v2180_v46, %v2180_v46 }
 0x460   : > { %2239 = vmatmul.bf16.vlgmr.msrb.gmra.mxu2 %v2181_v47 }
 0x4e3   : > { %v2240_v49 = vpop.f32.mrf.mxu2 }
 0x4e4   : > { %v2241_v13 = vadd.f32 %v3277_v48, %v2240_v49 }
 0x4e6   : > { %v2247_v50 = vsel %vm2246_vm11, %v2241_v13, -1e+30 }
 0x4e7   : > { %v2249_v51 = vsel %vm2248_vm12, %v2247_v50, -inf }
 0x4e8   : > { %2250 = vmax.xlane.f32.xlu0 %v2249_v51 }
 0x4eb   : > { %v2242_v52 = vpop.f32.mrf.mxu2 }
 0x55b   : > { %v2251_v53 = vpop.xlane.xlu0 %2250 }
 0x55c   : > { %v2252_v54 = vsub.f32 %v2247_v50, %v2251_v53 }
 0x55e   : > { %v2253_v55 = vmul.f32 1.442695, %v2252_v54 }
 0x560   : > { %3278 = vpow2.f32 %v2253_v55 }
 0x566   : > { %v3279_v56 = vpop.eup %3278 }
 0x567   : > { %v2255_v10 = vsel %vm2248_vm12, %v3279_v56, 0.0 }
 0x568   : > { %2256 = vadd.xlane.f32.xlu0 %v2255_v10 }
 0x5db   : > { %v2257_v57 = vpop.xlane.xlu0 %2256 }
 0x5dc   : > { %3280 = vlog2.f32 %v2257_v57 }
 0x5e2   : > { %v3281_v58 = vpop.eup %3280 }
 0x5e3   : > { %v2259_v59 = vmul.f32 0.6931472, %v3281_v58 }
 0x5e5   : > { %v2260_v61 = vsub.f32 %v2252_v54, %v2259_v59 }
 0x5e7   : > { %2261 = vst [vmem:[%s772_s15] sm:$0x3] %v2260_v61 }
 0x5e8   : > { %3609 = shalt.err (!%p3606_p9)
}
 0x5e9   : > { %3165 = dma.vmem_to_hbm [thread:$0]  (%p3921_p0), %s2276_s7, 32, %s2278_s11, %s2263_s25  }
 0x5ea PF: > { %s2289_s18 = sand.u32 1, %s3656_s0   ;;  %p4224_p10 = scmp.ge.s32.totalorder %s3668_s21, 2 }
 0x5eb   : > { %s2290_s1 = scalar_lea.sflag [#allocation4], %s2289_s18 }
 0x5ec   : > { %p3200_p11 = pnand %p4224_p10, %p3927_p6 }
 0x5ee   : > { %p3201_p12 = pneg %p3200_p11 }
 0x5f0   : > { %3651 = dma.done.wait (%p3201_p12), %s2290_s1, 32  }
 0x5f1   : > { %3653 = vsyncadd (%p3201_p12), %s2290_s1, 4294967264  ;;  %p37_p2 = scmp.ge.s32.totalorder %s3897_s23, 4   ;;  %s4225_s0 = smov %s3660_s30 }
 0x5f2   : > { %s4226_s30 = smov %s3664_s20  ;;  %s4227_s20 = smov %s3909_s29 }
 0x5f3   : > { %s4228_s21 = smov %s3897_s23  ;;  %39 = sbr.rel (!%p37_p2) target bundleno = 26 (0x1a), region = 177 }
 0x5f8   :  { %2296 = vsyncpa [#allocation3], 1 }
 0x5f9   :  { %2298 = vsyncpa [#allocation3 + $0x1], 1 }
 0x5fa   :  { %2299 = vsyncpa [#allocation6], 1 }
 0x5fb   :  { %2300 = vsyncpa [#allocation9], 1 }
 0x5fc   :  { %2301 = vsyncpa [#allocation12], 1 }
 0x5fd   :  { %2302 = vsyncpa [#allocation15], 1 }
 0x5fe   :  { %2303 = vsyncpa [#allocation18], 1 }
 0x5ff   :  { %2304 = vsyncpa [#allocation4], 1 }
 0x600   :  { %2306 = vsyncpa [#allocation4 + $0x1], 1 }

</bundles_post_ra>
